<compile_context>
chip_gen: v5e
topology: v5e:2x2
jax: 0.10.0
libtpu: 0.0.40
codegen_flags: <defaults>
</compile_context>

<pallas_src>
import numpy as np
import jax
import jax.numpy as jnp
from jax import lax
from jax.experimental import pallas as pl
from jax.experimental.pallas import tpu as pltpu


CFG = dict(
    input_length=128,
    input_depth=4,
    profile_length=100,
    num_tasks=2,
    num_strands=2,
    num_dil_conv_layers=3,
    dil_conv_filter_sizes=(3, 3, 3),
    dil_conv_stride=1,          # (PyTorch module never passes stride to Conv1d)
    dil_conv_dilations=(1, 2, 4),
    dil_conv_depth=8,
    prof_conv_kernel_size=15,
    prof_conv_stride=1,         # (PyTorch module never passes stride to Conv1d)
)


def derived_last_size(cfg):
    last = cfg["input_length"]
    for k, d in zip(cfg["dil_conv_filter_sizes"], cfg["dil_conv_dilations"]):
        last = last - d * (k - 1)
    prof_pred_size = last - (cfg["prof_conv_kernel_size"] - 1)
    assert prof_pred_size == cfg["profile_length"], (prof_pred_size, cfg["profile_length"])
    return last


# ----------------------------------------------------------------------------
# Kernel
# ----------------------------------------------------------------------------
def make_kernel(cfg, BB):
    L = cfg["input_length"]
    D = cfg["input_depth"]
    depth = cfg["dil_conv_depth"]
    T, S = cfg["num_tasks"], cfg["num_strands"]
    TS = T * S
    O = cfg["profile_length"]
    n = cfg["num_dil_conv_layers"]
    filts = cfg["dil_conv_filter_sizes"]
    dils = cfg["dil_conv_dilations"]
    Kp = cfg["prof_conv_kernel_size"]
    last = derived_last_size(cfg)
    start = (L - last) // 2
    N = BB * L

    assert (L & (L - 1)) == 0, "count-head reduction assumes power-of-two input_length"
    assert O < L, "need one spare per-sample column to carry the count output"
    # Profile-head taps read conv_sum[:, b*L + j + start + k] for j < O without a padding
    # mask; they must never cross the 128-lane sample boundary.
    assert start + (Kp - 1) + (O - 1) <= L - 1, "profile taps would cross sample boundary"

    def kernel(x_ref, cont_ref, w0_ref, wl_ref, db_ref, wprof_ref, wmisc_ref, out_ref):
        # x_ref:     (D, N)
        # cont_ref:  (TS, N), zero-padded past column O inside every 128-lane sample group
        # w0_ref:    (K0, depth, D)           per-tap layer-0 weights
        # wl_ref:    (n-1, Kmax, depth, depth) per-tap weights for layers 1..n-1
        # db_ref:    (n, depth, 1)            dilated-conv biases
        # wprof_ref: (Kp, TS, depth)          per-tap profile weights (1x1 head folded in)
        # wmisc_ref: (TS, 2 + 2*TS + depth)   [b_prof | W_pcont | W_cnt/last | b_cnt | W_ccnt]
        # out_ref:   (TS, N)
        x = x_ref[...]
        cont = cont_ref[...]

        # Hoisted within-sample lane position (L is a power of two).
        col = lax.broadcasted_iota(jnp.int32, (1, N), 1)
        lmod = jnp.bitwise_and(col, L - 1)

        def shift_in_sample(a, s):
            # y[:, b*L + l] = a[:, b*L + l + s] if 0 <= l + s < L else 0 (zero padding)
            if s == 0:
                return a
            rolled = pltpu.roll(a, shift=(-s) % N, axis=1)
            mask = (lmod < (L - s)) if s > 0 else (lmod >= (-s))
            return jnp.where(mask, rolled, 0.0)

        # ---- dilated conv tower with residual running sum (ReLU); per-tap matmuls ----
        K0, d0 = filts[0], dils[0]
        pad0 = (d0 * (K0 - 1)) // 2
        acc = None
        for k in range(K0):
            t = jnp.dot(w0_ref[k], shift_in_sample(x, k * d0 - pad0),
                        preferred_element_type=jnp.float32)
            acc = t if acc is None else acc + t
        conv_sum = jnp.maximum(acc + db_ref[0], 0.0)                  # (depth, N)

        for i in range(1, n):
            K, d = filts[i], dils[i]
            pad = (d * (K - 1)) // 2
            acc = None
            for k in range(K):
                t = jnp.dot(wl_ref[i - 1, k], shift_in_sample(conv_sum, k * d - pad),
                            preferred_element_type=jnp.float32)
                acc = t if acc is None else acc + t
            conv_sum = conv_sum + jnp.maximum(acc + db_ref[i], 0.0)

        # static slices of the packed small-weight slab (zero runtime cost)
        b_prof = wmisc_ref[:, 0:1]                                    # (TS, 1)
        w_pcont = wmisc_ref[:, 1:1 + TS]                              # (TS, TS)
        w_cnt = wmisc_ref[:, 1 + TS:1 + TS + depth]                   # (TS, depth), /last folded
        b_cnt = wmisc_ref[:, 1 + TS + depth:2 + TS + depth]           # (TS, 1)
        w_ccnt = wmisc_ref[:, 2 + TS + depth:2 + 2 * TS + depth]      # (TS, TS)

        # ---- profile head: per-tap matmul, roll the small (TS, N) result, accumulate ----
        # prof[:, b*L + j] = sum_k Wprof_k @ conv_sum[:, b*L + j + start + k] for j < O
        prof = None
        for k in range(Kp):
            a_k = jnp.dot(wprof_ref[k], conv_sum, preferred_element_type=jnp.float32)
            sh = start + k
            if sh != 0:
                a_k = pltpu.roll(a_k, shift=(-sh) % N, axis=1)
            prof = a_k if prof is None else prof + a_k
        prof = prof + jnp.dot(w_pcont, cont, preferred_element_type=jnp.float32)
        prof = prof + b_prof                                          # (TS, N)

        # ---- counts head: per-sample mean over cropped window + control counts ----
        q = jnp.dot(w_cnt, conv_sum, preferred_element_type=jnp.float32)     # (TS, N)
        win = jnp.logical_and(lmod >= start, lmod < start + last)
        r = jnp.where(win, q, 0.0)
        # relies on cont being zero past column O within each sample (wrapper guarantees it)
        r = r + jnp.dot(w_ccnt, cont, preferred_element_type=jnp.float32)
        # roll-add butterfly: column b*L accumulates the sum over sample b's L columns
        sh = 1
        while sh < L:
            r = r + pltpu.roll(r, shift=N - sh, axis=1)
            sh *= 2
        # land the per-sample total at column b*L + O and add the folded bias
        cnt = pltpu.roll(r, shift=O, axis=1) + b_cnt

        # columns [0, O): profile logits; column O: counts; columns (O, L): unused
        out_ref[...] = jnp.where(lmod < O, prof, cnt)

    return kernel


# ----------------------------------------------------------------------------
# Wrapper: layout plumbing + algebraic folding of the tiny linear layers
# ----------------------------------------------------------------------------
def _block_diag_per_task(w, T, S):
    # w: (T*S, S) per-task blocks stacked -> (T*S, T*S) block-diagonal (groups=T conv)
    m = jnp.zeros((T * S, T * S), jnp.float32)
    for t in range(T):
        m = m.at[t * S:(t + 1) * S, t * S:(t + 1) * S].set(w[t * S:(t + 1) * S])
    return m


def prepare_kernel_weights(params, cfg):
    D = cfg["input_depth"]
    depth = cfg["dil_conv_depth"]
    T, S = cfg["num_tasks"], cfg["num_strands"]
    TS = T * S
    n = cfg["num_dil_conv_layers"]
    filts = cfg["dil_conv_filter_sizes"]
    Kp = cfg["prof_conv_kernel_size"]
    last = derived_last_size(cfg)

    f32 = lambda a: jnp.asarray(a, jnp.float32)

    # layer 0 per-tap weights (cin = D): (K0, depth, D)
    w0 = jnp.transpose(f32(params["dil_w0"]), (2, 0, 1))

    # layers 1..n-1 per-tap weights, padded to a common Kmax: (n-1, Kmax, depth, depth)
    if n > 1:
        Kmax = max(filts[1:])
        wl_list = []
        for i in range(1, n):
            wi = jnp.transpose(f32(params[f"dil_w{i}"]), (2, 0, 1))   # (K, depth, depth)
            wi = jnp.pad(wi, ((0, Kmax - filts[i]), (0, 0), (0, 0)))
            wl_list.append(wi)
        wl = jnp.stack(wl_list, axis=0)
    else:
        wl = jnp.zeros((1, 1, depth, depth), jnp.float32)             # unused placeholder

    db = jnp.stack([f32(params[f"dil_b{i}"]) for i in range(n)], axis=0)[:, :, None]

    # grouped 1x1 convs as block-diagonal matrices, folded through the linear heads
    P1p = _block_diag_per_task(f32(params["p1_w"])[:, :S, 0], T, S)
    P1c = _block_diag_per_task(f32(params["p1_w"])[:, S:, 0], T, S)
    C1p = _block_diag_per_task(f32(params["c1_w"])[:, :S, 0], T, S)
    C1c = _block_diag_per_task(f32(params["c1_w"])[:, S:, 0], T, S)

    prof_w = f32(params["prof_w"])                                    # (TS, depth, Kp)
    wprof = jnp.stack([P1p @ prof_w[:, :, k] for k in range(Kp)], axis=0)   # (Kp, TS, depth)

    b_prof = P1p @ f32(params["prof_b"])[:, None] + f32(params["p1_b"])[:, None]     # (TS,1)
    w_cnt = (C1p @ f32(params["cd_w"])) / float(last)                 # 1/last folded in
    b_cnt = C1p @ f32(params["cd_b"])[:, None] + f32(params["c1_b"])[:, None]        # (TS,1)
    wmisc = jnp.concatenate([b_prof, P1c, w_cnt, b_cnt, C1c], axis=1)  # (TS, 2+2*TS+depth)

    return w0, wl, db, wprof, wmisc


def forward(params, input_seqs, cont_profs, cfg, block_batch=128):
    B, I, D = input_seqs.shape
    L = cfg["input_length"]
    O = cfg["profile_length"]
    T, S = cfg["num_tasks"], cfg["num_strands"]
    TS = T * S
    assert I == L and D == cfg["input_depth"]
    assert cont_profs.shape == (B, T, O, S)
    assert O <= L

    # Batch blocking: BB samples per grid step (multiple of 8 for sublane tiling).
    # Aim for >= 2 grid steps whenever the batch allows it so the "parallel" grid axis
    # can be sharded across v7x's two TensorCores.
    B8 = -(-B // 8) * 8
    cap = max(8, (int(block_batch) // 8) * 8)
    if B8 > 8:
        half = -(-B8 // 2)
        half = -(-half // 8) * 8
        BB = int(min(cap, half))
    else:
        BB = int(min(cap, B8))
    Bp = -(-B8 // BB) * BB
    N = BB * L

    # x2[c, b*L + l] = input_seqs[b, l, c]
    x = jnp.transpose(input_seqs.astype(jnp.float32), (0, 2, 1))       # (B, D, L)
    x = jnp.pad(x, ((0, Bp - B), (0, 0), (0, 0)))
    x2 = jnp.transpose(x, (1, 0, 2)).reshape(D, Bp * L)

    # c2[t*S+s, b*L + j] = cont_profs[b, t, j, s] for j < O, else 0.
    # The count head's roll-add butterfly relies on this zero padding past column O.
    c = jnp.transpose(cont_profs.astype(jnp.float32), (1, 3, 0, 2)).reshape(TS, B, O)
    c = jnp.pad(c, ((0, 0), (0, Bp - B), (0, L - O)))
    c2 = c.reshape(TS, Bp * L)

    ws = prepare_kernel_weights(params, cfg)

    def full_spec(arr):
        shp = tuple(arr.shape)
        nd = len(shp)
        return pl.BlockSpec(shp, lambda i, _nd=nd: (0,) * _nd)

    in_specs = [pl.BlockSpec((D, N), lambda i: (0, i)),
                pl.BlockSpec((TS, N), lambda i: (0, i))]
    in_specs += [full_spec(w) for w in ws]

    out = pl.pallas_call(
        make_kernel(cfg, BB),
        grid=(Bp // BB,),
        in_specs=in_specs,
        out_specs=pl.BlockSpec((TS, N), lambda i: (0, i)),
        out_shape=jax.ShapeDtypeStruct((TS, Bp * L), jnp.float32),
        compiler_params=pltpu.CompilerParams(
            dimension_semantics=("parallel",),
            vmem_limit_bytes=32 * 1024 * 1024),
    )(x2, c2, *ws)

    out3 = out.reshape(TS, Bp, L)[:, :B]
    prof_pred = jnp.transpose(out3[:, :, :O].reshape(T, S, B, O), (2, 0, 3, 1))  # (B,T,O,S)
    count_pred = jnp.transpose(out3[:, :, O].reshape(T, S, B), (2, 0, 1))        # (B,T,S)
    return prof_pred, count_pred


# ----------------------------------------------------------------------------
# Deterministic synthetic parameters (PyTorch Conv1d/Linear layouts)
# ----------------------------------------------------------------------------
def init_params(cfg, key):
    D = cfg["input_depth"]
    depth = cfg["dil_conv_depth"]
    T, S = cfg["num_tasks"], cfg["num_strands"]
    TS = T * S
    Kp = cfg["prof_conv_kernel_size"]
    params = {}

    def rnd(shape, scale=0.1):
        nonlocal key
        key, sub = jax.random.split(key)
        return scale * jax.random.normal(sub, shape, jnp.float32)

    for i in range(cfg["num_dil_conv_layers"]):
        K = cfg["dil_conv_filter_sizes"][i]
        cin = D if i == 0 else depth
        params[f"dil_w{i}"] = rnd((depth, cin, K))      # Conv1d (out, in, K)
        params[f"dil_b{i}"] = rnd((depth,))
    params["prof_w"] = rnd((TS, depth, Kp))             # prof_large_conv
    params["prof_b"] = rnd((TS,))
    params["p1_w"] = rnd((TS, 2 * S, 1))                # prof_one_conv (groups=T)
    params["p1_b"] = rnd((TS,))
    params["cd_w"] = rnd((TS, depth))                   # count_dense
    params["cd_b"] = rnd((TS,))
    params["c1_w"] = rnd((TS, 2 * S, 1))                # count_one_conv (groups=T)
    params["c1_b"] = rnd((TS,))
    return params


# ----------------------------------------------------------------------------
# Pure-JAX reference mirroring the PyTorch forward pass
# ----------------------------------------------------------------------------
def reference_forward(params, input_seqs, cont_profs, cfg):
    B = input_seqs.shape[0]
    O = cfg["profile_length"]
    T, S = cfg["num_tasks"], cfg["num_strands"]
    n = cfg["num_dil_conv_layers"]
    filts = cfg["dil_conv_filter_sizes"]
    dils = cfg["dil_conv_dilations"]
    last = derived_last_size(cfg)

    x = jnp.transpose(input_seqs, (0, 2, 1))             # (B, D, L)
    cont = jnp.transpose(cont_profs, (0, 1, 3, 2))       # (B, T, S, O)
    cont_counts = jnp.sum(cont, axis=3)                  # (B, T, S)

    cur, dil_sum = x, None
    for i in range(n):
        w, b = params[f"dil_w{i}"], params[f"dil_b{i}"]
        K, d = filts[i], dils[i]
        pad = (d * (K - 1)) // 2
        out = lax.conv_general_dilated(
            cur, w, window_strides=(1,), padding=[(pad, pad)], rhs_dilation=(d,),
            dimension_numbers=("NCH", "OIH", "NCH"))
        out = jnp.maximum(out + b[None, :, None], 0.0)
        dil_sum = out if dil_sum is None else dil_sum + out
        cur = dil_sum

    start = (dil_sum.shape[2] - last) // 2
    cut = dil_sum[:, :, start:start + last]

    prof_large = lax.conv_general_dilated(
        cut, params["prof_w"], window_strides=(1,), padding=[(0, 0)],
        dimension_numbers=("NCH", "OIH", "NCH")) + params["prof_b"][None, :, None]
    prof4 = prof_large.reshape(B, T, S, O)
    prof_with_cont = jnp.concatenate([prof4, cont], axis=2)          # (B, T, 2S, O)
    pw = params["p1_w"][..., 0].reshape(T, S, 2 * S)
    prof_one = (jnp.einsum("tsu,btuo->btso", pw, prof_with_cont)
                + params["p1_b"].reshape(1, T, S, 1))
    prof_pred = jnp.transpose(prof_one, (0, 1, 3, 2))                # (B, T, O, S)

    pooled = jnp.mean(cut, axis=2)                                   # (B, depth)
    dense = pooled @ params["cd_w"].T + params["cd_b"][None]         # (B, TS)
    count_with_cont = jnp.concatenate([dense.reshape(B, T, S), cont_counts], axis=2)
    cw = params["c1_w"][..., 0].reshape(T, S, 2 * S)
    count_pred = (jnp.einsum("tsu,btu->bts", cw, count_with_cont)
                  + params["c1_b"].reshape(1, T, S))
    return prof_pred, count_pred


# ----------------------------------------------------------------------------
if __name__ == "__main__":
    cfg = CFG
    root = jax.random.PRNGKey(0)
    kparams, kdata = jax.random.split(root)
    params = init_params(cfg, kparams)

    def run_case(B, block_batch, case_id):
        k1, k2 = jax.random.split(jax.random.fold_in(kdata, case_id))
        input_seqs = jax.random.normal(
            k1, (B, cfg["input_length"], cfg["input_depth"]), jnp.float32)
        cont_profs = jax.random.uniform(
            k2, (B, cfg["num_tasks"], cfg["profile_length"], cfg["num_strands"]),
            jnp.float32, 0.0, 2.0)

        prof_pred, count_pred = forward(params, input_seqs, cont_profs, cfg,
                                        block_batch=block_batch)
        jax.block_until_ready((prof_pred, count_pred))

        assert prof_pred.shape == (B, cfg["num_tasks"], cfg["profile_length"],
                                   cfg["num_strands"])
        assert count_pred.shape == (B, cfg["num_tasks"], cfg["num_strands"])

        ref_prof, ref_count = reference_forward(params, input_seqs, cont_profs, cfg)
        np.testing.assert_allclose(np.asarray(prof_pred), np.asarray(ref_prof),
                                   rtol=1e-3, atol=1e-3)
        np.testing.assert_allclose(np.asarray(count_pred), np.asarray(ref_count),
                                   rtol=1e-3, atol=1e-3)

    run_case(B=2, block_batch=128, case_id=0)    # single grid step, padded batch
    run_case(B=20, block_batch=8, case_id=1)     # multi-step grid (3 steps) + padding
    run_case(B=20, block_batch=128, case_id=2)   # auto-split into 2 steps (v7x megacore)
    print("KERNEL_OK")
</pallas_src>

<mosaic_0001>
module attributes {stable_mosaic.version = 11 : i64} {
  func.func @kernel(%arg0: i32, %arg1: memref<4x1024xf32, #tpu.memory_space<vmem>>, %arg2: memref<4x1024xf32, #tpu.memory_space<vmem>>, %arg3: memref<3x8x4xf32, #tpu.memory_space<vmem>>, %arg4: memref<2x3x8x8xf32, #tpu.memory_space<vmem>>, %arg5: memref<3x8x1xf32, #tpu.memory_space<vmem>>, %arg6: memref<15x4x8xf32, #tpu.memory_space<vmem>>, %arg7: memref<4x18xf32, #tpu.memory_space<vmem>>, %arg8: memref<4x1024xf32, #tpu.memory_space<vmem>>) attributes {dimension_semantics = [#tpu.dimension_semantics<parallel>], iteration_bounds = array<i64: 1>, scalar_prefetch = 0 : i64, scratch_operands = 0 : i64, tpu.core_type = #tpu.core_type<tc>, window_params = [{transform_indices = @transform_0, window_bounds = array<i64: 4, 1024>}, {transform_indices = @transform_1, window_bounds = array<i64: 4, 1024>}, {pipeline_mode = #tpu.pipeline_mode<synchronous>, transform_indices = @transform_2, window_bounds = array<i64: 3, 8, 4>}, {pipeline_mode = #tpu.pipeline_mode<synchronous>, transform_indices = @transform_3, window_bounds = array<i64: 2, 3, 8, 8>}, {pipeline_mode = #tpu.pipeline_mode<synchronous>, transform_indices = @transform_4, window_bounds = array<i64: 3, 8, 1>}, {pipeline_mode = #tpu.pipeline_mode<synchronous>, transform_indices = @transform_5, window_bounds = array<i64: 15, 4, 8>}, {pipeline_mode = #tpu.pipeline_mode<synchronous>, transform_indices = @transform_6, window_bounds = array<i64: 4, 18>}, {transform_indices = @transform_7, window_bounds = array<i64: 4, 1024>}]} {
    %c0 = arith.constant 0 : index
    %c0_0 = arith.constant 0 : index
    %0 = vector.load %arg1[%c0, %c0_0] : memref<4x1024xf32, #tpu.memory_space<vmem>>, vector<4x1024xf32>
    %c0_1 = arith.constant 0 : index
    %c0_2 = arith.constant 0 : index
    %1 = vector.load %arg2[%c0_1, %c0_2] : memref<4x1024xf32, #tpu.memory_space<vmem>>, vector<4x1024xf32>
    %2 = tpu.iota {dimensions = array<i32: 1>} : vector<1x1024xi32>
    %c127_i32 = arith.constant 127 : i32
    %3 = vector.broadcast %c127_i32 : i32 to vector<1x1024xi32>
    %4 = arith.andi %2, %3 : vector<1x1024xi32>
    %c0_3 = arith.constant 0 : index
    %c0_4 = arith.constant 0 : index
    %c0_5 = arith.constant 0 : index
    %5 = vector.load %arg3[%c0_3, %c0_4, %c0_5] : memref<3x8x4xf32, #tpu.memory_space<vmem>>, vector<1x8x4xf32>
    %6 = vector.shape_cast %5 : vector<1x8x4xf32> to vector<8x4xf32>
    %c1_i32 = arith.constant 1 : i32
    %7 = tpu.dynamic_rotate %0 by %c1_i32 dim 1 : vector<4x1024xf32>, i32 -> vector<4x1024xf32>
    %c1_i32_6 = arith.constant 1 : i32
    %8 = vector.broadcast %c1_i32_6 : i32 to vector<1x1024xi32>
    %9 = arith.cmpi sge, %4, %8 : vector<1x1024xi32>
    %cst = arith.constant 0.000000e+00 : f32
    %10 = vector.shape_cast %9 : vector<1x1024xi1> to vector<1x1024xi1>
    %11 = vector.broadcast %10 : vector<1x1024xi1> to vector<4x1024xi1>
    %12 = vector.broadcast %cst : f32 to vector<4x1024xf32>
    %13 = arith.select %11, %7, %12 : vector<4x1024xi1>, vector<4x1024xf32>
    %cst_7 = arith.constant dense<0.000000e+00> : vector<8x1024xf32>
    %14 = tpu.matmul %6, %13, %cst_7 {dimension_numbers = #tpu.dot_dimension_numbers<[1], [0], [0], [1], [0, 0, 1, 1], [], []>} : vector<8x4xf32>, vector<4x1024xf32>, vector<8x1024xf32> -> vector<8x1024xf32>
    %c1 = arith.constant 1 : index
    %c0_8 = arith.constant 0 : index
    %c0_9 = arith.constant 0 : index
    %15 = vector.load %arg3[%c1, %c0_8, %c0_9] : memref<3x8x4xf32, #tpu.memory_space<vmem>>, vector<1x8x4xf32>
    %16 = vector.shape_cast %15 : vector<1x8x4xf32> to vector<8x4xf32>
    %cst_10 = arith.constant dense<0.000000e+00> : vector<8x1024xf32>
    %17 = tpu.matmul %16, %0, %cst_10 {dimension_numbers = #tpu.dot_dimension_numbers<[1], [0], [0], [1], [0, 0, 1, 1], [], []>} : vector<8x4xf32>, vector<4x1024xf32>, vector<8x1024xf32> -> vector<8x1024xf32>
    %18 = arith.addf %14, %17 : vector<8x1024xf32>
    %c2 = arith.constant 2 : index
    %c0_11 = arith.constant 0 : index
    %c0_12 = arith.constant 0 : index
    %19 = vector.load %arg3[%c2, %c0_11, %c0_12] : memref<3x8x4xf32, #tpu.memory_space<vmem>>, vector<1x8x4xf32>
    %20 = vector.shape_cast %19 : vector<1x8x4xf32> to vector<8x4xf32>
    %c1023_i32 = arith.constant 1023 : i32
    %21 = tpu.dynamic_rotate %0 by %c1023_i32 dim 1 : vector<4x1024xf32>, i32 -> vector<4x1024xf32>
    %c127_i32_13 = arith.constant 127 : i32
    %22 = vector.broadcast %c127_i32_13 : i32 to vector<1x1024xi32>
    %23 = arith.cmpi slt, %4, %22 : vector<1x1024xi32>
    %cst_14 = arith.constant 0.000000e+00 : f32
    %24 = vector.shape_cast %23 : vector<1x1024xi1> to vector<1x1024xi1>
    %25 = vector.broadcast %24 : vector<1x1024xi1> to vector<4x1024xi1>
    %26 = vector.broadcast %cst_14 : f32 to vector<4x1024xf32>
    %27 = arith.select %25, %21, %26 : vector<4x1024xi1>, vector<4x1024xf32>
    %cst_15 = arith.constant dense<0.000000e+00> : vector<8x1024xf32>
    %28 = tpu.matmul %20, %27, %cst_15 {dimension_numbers = #tpu.dot_dimension_numbers<[1], [0], [0], [1], [0, 0, 1, 1], [], []>} : vector<8x4xf32>, vector<4x1024xf32>, vector<8x1024xf32> -> vector<8x1024xf32>
    %29 = arith.addf %18, %28 : vector<8x1024xf32>
    %c0_16 = arith.constant 0 : index
    %c0_17 = arith.constant 0 : index
    %c0_18 = arith.constant 0 : index
    %30 = vector.load %arg5[%c0_16, %c0_17, %c0_18] : memref<3x8x1xf32, #tpu.memory_space<vmem>>, vector<1x8x1xf32>
    %31 = vector.shape_cast %30 : vector<1x8x1xf32> to vector<8x1xf32>
    %32 = vector.broadcast %31 : vector<8x1xf32> to vector<8x1024xf32>
    %33 = arith.addf %29, %32 : vector<8x1024xf32>
    %cst_19 = arith.constant 0.000000e+00 : f32
    %34 = vector.broadcast %cst_19 : f32 to vector<8x1024xf32>
    %35 = arith.maximumf %33, %34 : vector<8x1024xf32>
    %c0_20 = arith.constant 0 : index
    %c0_21 = arith.constant 0 : index
    %c0_22 = arith.constant 0 : index
    %c0_23 = arith.constant 0 : index
    %36 = vector.load %arg4[%c0_20, %c0_21, %c0_22, %c0_23] : memref<2x3x8x8xf32, #tpu.memory_space<vmem>>, vector<1x1x8x8xf32>
    %37 = vector.shape_cast %36 : vector<1x1x8x8xf32> to vector<8x8xf32>
    %c2_i32 = arith.constant 2 : i32
    %38 = tpu.dynamic_rotate %35 by %c2_i32 dim 1 : vector<8x1024xf32>, i32 -> vector<8x1024xf32>
    %c2_i32_24 = arith.constant 2 : i32
    %39 = vector.broadcast %c2_i32_24 : i32 to vector<1x1024xi32>
    %40 = arith.cmpi sge, %4, %39 : vector<1x1024xi32>
    %cst_25 = arith.constant 0.000000e+00 : f32
    %41 = vector.shape_cast %40 : vector<1x1024xi1> to vector<1x1024xi1>
    %42 = vector.broadcast %41 : vector<1x1024xi1> to vector<8x1024xi1>
    %43 = vector.broadcast %cst_25 : f32 to vector<8x1024xf32>
    %44 = arith.select %42, %38, %43 : vector<8x1024xi1>, vector<8x1024xf32>
    %cst_26 = arith.constant dense<0.000000e+00> : vector<8x1024xf32>
    %45 = tpu.matmul %37, %44, %cst_26 {dimension_numbers = #tpu.dot_dimension_numbers<[1], [0], [0], [1], [0, 0, 1, 1], [], []>} : vector<8x8xf32>, vector<8x1024xf32>, vector<8x1024xf32> -> vector<8x1024xf32>
    %c0_27 = arith.constant 0 : index
    %c1_28 = arith.constant 1 : index
    %c0_29 = arith.constant 0 : index
    %c0_30 = arith.constant 0 : index
    %46 = vector.load %arg4[%c0_27, %c1_28, %c0_29, %c0_30] : memref<2x3x8x8xf32, #tpu.memory_space<vmem>>, vector<1x1x8x8xf32>
    %47 = vector.shape_cast %46 : vector<1x1x8x8xf32> to vector<8x8xf32>
    %cst_31 = arith.constant dense<0.000000e+00> : vector<8x1024xf32>
    %48 = tpu.matmul %47, %35, %cst_31 {dimension_numbers = #tpu.dot_dimension_numbers<[1], [0], [0], [1], [0, 0, 1, 1], [], []>} : vector<8x8xf32>, vector<8x1024xf32>, vector<8x1024xf32> -> vector<8x1024xf32>
    %49 = arith.addf %45, %48 : vector<8x1024xf32>
    %c0_32 = arith.constant 0 : index
    %c2_33 = arith.constant 2 : index
    %c0_34 = arith.constant 0 : index
    %c0_35 = arith.constant 0 : index
    %50 = vector.load %arg4[%c0_32, %c2_33, %c0_34, %c0_35] : memref<2x3x8x8xf32, #tpu.memory_space<vmem>>, vector<1x1x8x8xf32>
    %51 = vector.shape_cast %50 : vector<1x1x8x8xf32> to vector<8x8xf32>
    %c1022_i32 = arith.constant 1022 : i32
    %52 = tpu.dynamic_rotate %35 by %c1022_i32 dim 1 : vector<8x1024xf32>, i32 -> vector<8x1024xf32>
    %c126_i32 = arith.constant 126 : i32
    %53 = vector.broadcast %c126_i32 : i32 to vector<1x1024xi32>
    %54 = arith.cmpi slt, %4, %53 : vector<1x1024xi32>
    %cst_36 = arith.constant 0.000000e+00 : f32
    %55 = vector.shape_cast %54 : vector<1x1024xi1> to vector<1x1024xi1>
    %56 = vector.broadcast %55 : vector<1x1024xi1> to vector<8x1024xi1>
    %57 = vector.broadcast %cst_36 : f32 to vector<8x1024xf32>
    %58 = arith.select %56, %52, %57 : vector<8x1024xi1>, vector<8x1024xf32>
    %cst_37 = arith.constant dense<0.000000e+00> : vector<8x1024xf32>
    %59 = tpu.matmul %51, %58, %cst_37 {dimension_numbers = #tpu.dot_dimension_numbers<[1], [0], [0], [1], [0, 0, 1, 1], [], []>} : vector<8x8xf32>, vector<8x1024xf32>, vector<8x1024xf32> -> vector<8x1024xf32>
    %60 = arith.addf %49, %59 : vector<8x1024xf32>
    %c1_38 = arith.constant 1 : index
    %c0_39 = arith.constant 0 : index
    %c0_40 = arith.constant 0 : index
    %61 = vector.load %arg5[%c1_38, %c0_39, %c0_40] : memref<3x8x1xf32, #tpu.memory_space<vmem>>, vector<1x8x1xf32>
    %62 = vector.shape_cast %61 : vector<1x8x1xf32> to vector<8x1xf32>
    %63 = vector.broadcast %62 : vector<8x1xf32> to vector<8x1024xf32>
    %64 = arith.addf %60, %63 : vector<8x1024xf32>
    %cst_41 = arith.constant 0.000000e+00 : f32
    %65 = vector.broadcast %cst_41 : f32 to vector<8x1024xf32>
    %66 = arith.maximumf %64, %65 : vector<8x1024xf32>
    %67 = arith.addf %35, %66 : vector<8x1024xf32>
    %c1_42 = arith.constant 1 : index
    %c0_43 = arith.constant 0 : index
    %c0_44 = arith.constant 0 : index
    %c0_45 = arith.constant 0 : index
    %68 = vector.load %arg4[%c1_42, %c0_43, %c0_44, %c0_45] : memref<2x3x8x8xf32, #tpu.memory_space<vmem>>, vector<1x1x8x8xf32>
    %69 = vector.shape_cast %68 : vector<1x1x8x8xf32> to vector<8x8xf32>
    %c4_i32 = arith.constant 4 : i32
    %70 = tpu.dynamic_rotate %67 by %c4_i32 dim 1 : vector<8x1024xf32>, i32 -> vector<8x1024xf32>
    %c4_i32_46 = arith.constant 4 : i32
    %71 = vector.broadcast %c4_i32_46 : i32 to vector<1x1024xi32>
    %72 = arith.cmpi sge, %4, %71 : vector<1x1024xi32>
    %cst_47 = arith.constant 0.000000e+00 : f32
    %73 = vector.shape_cast %72 : vector<1x1024xi1> to vector<1x1024xi1>
    %74 = vector.broadcast %73 : vector<1x1024xi1> to vector<8x1024xi1>
    %75 = vector.broadcast %cst_47 : f32 to vector<8x1024xf32>
    %76 = arith.select %74, %70, %75 : vector<8x1024xi1>, vector<8x1024xf32>
    %cst_48 = arith.constant dense<0.000000e+00> : vector<8x1024xf32>
    %77 = tpu.matmul %69, %76, %cst_48 {dimension_numbers = #tpu.dot_dimension_numbers<[1], [0], [0], [1], [0, 0, 1, 1], [], []>} : vector<8x8xf32>, vector<8x1024xf32>, vector<8x1024xf32> -> vector<8x1024xf32>
    %c1_49 = arith.constant 1 : index
    %c1_50 = arith.constant 1 : index
    %c0_51 = arith.constant 0 : index
    %c0_52 = arith.constant 0 : index
    %78 = vector.load %arg4[%c1_49, %c1_50, %c0_51, %c0_52] : memref<2x3x8x8xf32, #tpu.memory_space<vmem>>, vector<1x1x8x8xf32>
    %79 = vector.shape_cast %78 : vector<1x1x8x8xf32> to vector<8x8xf32>
    %cst_53 = arith.constant dense<0.000000e+00> : vector<8x1024xf32>
    %80 = tpu.matmul %79, %67, %cst_53 {dimension_numbers = #tpu.dot_dimension_numbers<[1], [0], [0], [1], [0, 0, 1, 1], [], []>} : vector<8x8xf32>, vector<8x1024xf32>, vector<8x1024xf32> -> vector<8x1024xf32>
    %81 = arith.addf %77, %80 : vector<8x1024xf32>
    %c1_54 = arith.constant 1 : index
    %c2_55 = arith.constant 2 : index
    %c0_56 = arith.constant 0 : index
    %c0_57 = arith.constant 0 : index
    %82 = vector.load %arg4[%c1_54, %c2_55, %c0_56, %c0_57] : memref<2x3x8x8xf32, #tpu.memory_space<vmem>>, vector<1x1x8x8xf32>
    %83 = vector.shape_cast %82 : vector<1x1x8x8xf32> to vector<8x8xf32>
    %c1020_i32 = arith.constant 1020 : i32
    %84 = tpu.dynamic_rotate %67 by %c1020_i32 dim 1 : vector<8x1024xf32>, i32 -> vector<8x1024xf32>
    %c124_i32 = arith.constant 124 : i32
    %85 = vector.broadcast %c124_i32 : i32 to vector<1x1024xi32>
    %86 = arith.cmpi slt, %4, %85 : vector<1x1024xi32>
    %cst_58 = arith.constant 0.000000e+00 : f32
    %87 = vector.shape_cast %86 : vector<1x1024xi1> to vector<1x1024xi1>
    %88 = vector.broadcast %87 : vector<1x1024xi1> to vector<8x1024xi1>
    %89 = vector.broadcast %cst_58 : f32 to vector<8x1024xf32>
    %90 = arith.select %88, %84, %89 : vector<8x1024xi1>, vector<8x1024xf32>
    %cst_59 = arith.constant dense<0.000000e+00> : vector<8x1024xf32>
    %91 = tpu.matmul %83, %90, %cst_59 {dimension_numbers = #tpu.dot_dimension_numbers<[1], [0], [0], [1], [0, 0, 1, 1], [], []>} : vector<8x8xf32>, vector<8x1024xf32>, vector<8x1024xf32> -> vector<8x1024xf32>
    %92 = arith.addf %81, %91 : vector<8x1024xf32>
    %c2_60 = arith.constant 2 : index
    %c0_61 = arith.constant 0 : index
    %c0_62 = arith.constant 0 : index
    %93 = vector.load %arg5[%c2_60, %c0_61, %c0_62] : memref<3x8x1xf32, #tpu.memory_space<vmem>>, vector<1x8x1xf32>
    %94 = vector.shape_cast %93 : vector<1x8x1xf32> to vector<8x1xf32>
    %95 = vector.broadcast %94 : vector<8x1xf32> to vector<8x1024xf32>
    %96 = arith.addf %92, %95 : vector<8x1024xf32>
    %cst_63 = arith.constant 0.000000e+00 : f32
    %97 = vector.broadcast %cst_63 : f32 to vector<8x1024xf32>
    %98 = arith.maximumf %96, %97 : vector<8x1024xf32>
    %99 = arith.addf %67, %98 : vector<8x1024xf32>
    %c0_64 = arith.constant 0 : index
    %c0_65 = arith.constant 0 : index
    %100 = vector.load %arg7[%c0_64, %c0_65] : memref<4x18xf32, #tpu.memory_space<vmem>>, vector<4x1xf32>
    %c0_66 = arith.constant 0 : index
    %c1_67 = arith.constant 1 : index
    %101 = vector.load %arg7[%c0_66, %c1_67] : memref<4x18xf32, #tpu.memory_space<vmem>>, vector<4x4xf32>
    %c0_68 = arith.constant 0 : index
    %c5 = arith.constant 5 : index
    %102 = vector.load %arg7[%c0_68, %c5] : memref<4x18xf32, #tpu.memory_space<vmem>>, vector<4x8xf32>
    %c0_69 = arith.constant 0 : index
    %c13 = arith.constant 13 : index
    %103 = vector.load %arg7[%c0_69, %c13] : memref<4x18xf32, #tpu.memory_space<vmem>>, vector<4x1xf32>
    %c0_70 = arith.constant 0 : index
    %c14 = arith.constant 14 : index
    %104 = vector.load %arg7[%c0_70, %c14] : memref<4x18xf32, #tpu.memory_space<vmem>>, vector<4x4xf32>
    %c0_71 = arith.constant 0 : index
    %c0_72 = arith.constant 0 : index
    %c0_73 = arith.constant 0 : index
    %105 = vector.load %arg6[%c0_71, %c0_72, %c0_73] : memref<15x4x8xf32, #tpu.memory_space<vmem>>, vector<1x4x8xf32>
    %106 = vector.shape_cast %105 : vector<1x4x8xf32> to vector<4x8xf32>
    %cst_74 = arith.constant dense<0.000000e+00> : vector<4x1024xf32>
    %107 = tpu.matmul %106, %99, %cst_74 {dimension_numbers = #tpu.dot_dimension_numbers<[1], [0], [0], [1], [0, 0, 1, 1], [], []>} : vector<4x8xf32>, vector<8x1024xf32>, vector<4x1024xf32> -> vector<4x1024xf32>
    %c1017_i32 = arith.constant 1017 : i32
    %108 = tpu.dynamic_rotate %107 by %c1017_i32 dim 1 : vector<4x1024xf32>, i32 -> vector<4x1024xf32>
    %c1_75 = arith.constant 1 : index
    %c0_76 = arith.constant 0 : index
    %c0_77 = arith.constant 0 : index
    %109 = vector.load %arg6[%c1_75, %c0_76, %c0_77] : memref<15x4x8xf32, #tpu.memory_space<vmem>>, vector<1x4x8xf32>
    %110 = vector.shape_cast %109 : vector<1x4x8xf32> to vector<4x8xf32>
    %cst_78 = arith.constant dense<0.000000e+00> : vector<4x1024xf32>
    %111 = tpu.matmul %110, %99, %cst_78 {dimension_numbers = #tpu.dot_dimension_numbers<[1], [0], [0], [1], [0, 0, 1, 1], [], []>} : vector<4x8xf32>, vector<8x1024xf32>, vector<4x1024xf32> -> vector<4x1024xf32>
    %c1016_i32 = arith.constant 1016 : i32
    %112 = tpu.dynamic_rotate %111 by %c1016_i32 dim 1 : vector<4x1024xf32>, i32 -> vector<4x1024xf32>
    %113 = arith.addf %108, %112 : vector<4x1024xf32>
    %c2_79 = arith.constant 2 : index
    %c0_80 = arith.constant 0 : index
    %c0_81 = arith.constant 0 : index
    %114 = vector.load %arg6[%c2_79, %c0_80, %c0_81] : memref<15x4x8xf32, #tpu.memory_space<vmem>>, vector<1x4x8xf32>
    %115 = vector.shape_cast %114 : vector<1x4x8xf32> to vector<4x8xf32>
    %cst_82 = arith.constant dense<0.000000e+00> : vector<4x1024xf32>
    %116 = tpu.matmul %115, %99, %cst_82 {dimension_numbers = #tpu.dot_dimension_numbers<[1], [0], [0], [1], [0, 0, 1, 1], [], []>} : vector<4x8xf32>, vector<8x1024xf32>, vector<4x1024xf32> -> vector<4x1024xf32>
    %c1015_i32 = arith.constant 1015 : i32
    %117 = tpu.dynamic_rotate %116 by %c1015_i32 dim 1 : vector<4x1024xf32>, i32 -> vector<4x1024xf32>
    %118 = arith.addf %113, %117 : vector<4x1024xf32>
    %c3 = arith.constant 3 : index
    %c0_83 = arith.constant 0 : index
    %c0_84 = arith.constant 0 : index
    %119 = vector.load %arg6[%c3, %c0_83, %c0_84] : memref<15x4x8xf32, #tpu.memory_space<vmem>>, vector<1x4x8xf32>
    %120 = vector.shape_cast %119 : vector<1x4x8xf32> to vector<4x8xf32>
    %cst_85 = arith.constant dense<0.000000e+00> : vector<4x1024xf32>
    %121 = tpu.matmul %120, %99, %cst_85 {dimension_numbers = #tpu.dot_dimension_numbers<[1], [0], [0], [1], [0, 0, 1, 1], [], []>} : vector<4x8xf32>, vector<8x1024xf32>, vector<4x1024xf32> -> vector<4x1024xf32>
    %c1014_i32 = arith.constant 1014 : i32
    %122 = tpu.dynamic_rotate %121 by %c1014_i32 dim 1 : vector<4x1024xf32>, i32 -> vector<4x1024xf32>
    %123 = arith.addf %118, %122 : vector<4x1024xf32>
    %c4 = arith.constant 4 : index
    %c0_86 = arith.constant 0 : index
    %c0_87 = arith.constant 0 : index
    %124 = vector.load %arg6[%c4, %c0_86, %c0_87] : memref<15x4x8xf32, #tpu.memory_space<vmem>>, vector<1x4x8xf32>
    %125 = vector.shape_cast %124 : vector<1x4x8xf32> to vector<4x8xf32>
    %cst_88 = arith.constant dense<0.000000e+00> : vector<4x1024xf32>
    %126 = tpu.matmul %125, %99, %cst_88 {dimension_numbers = #tpu.dot_dimension_numbers<[1], [0], [0], [1], [0, 0, 1, 1], [], []>} : vector<4x8xf32>, vector<8x1024xf32>, vector<4x1024xf32> -> vector<4x1024xf32>
    %c1013_i32 = arith.constant 1013 : i32
    %127 = tpu.dynamic_rotate %126 by %c1013_i32 dim 1 : vector<4x1024xf32>, i32 -> vector<4x1024xf32>
    %128 = arith.addf %123, %127 : vector<4x1024xf32>
    %c5_89 = arith.constant 5 : index
    %c0_90 = arith.constant 0 : index
    %c0_91 = arith.constant 0 : index
    %129 = vector.load %arg6[%c5_89, %c0_90, %c0_91] : memref<15x4x8xf32, #tpu.memory_space<vmem>>, vector<1x4x8xf32>
    %130 = vector.shape_cast %129 : vector<1x4x8xf32> to vector<4x8xf32>
    %cst_92 = arith.constant dense<0.000000e+00> : vector<4x1024xf32>
    %131 = tpu.matmul %130, %99, %cst_92 {dimension_numbers = #tpu.dot_dimension_numbers<[1], [0], [0], [1], [0, 0, 1, 1], [], []>} : vector<4x8xf32>, vector<8x1024xf32>, vector<4x1024xf32> -> vector<4x1024xf32>
    %c1012_i32 = arith.constant 1012 : i32
    %132 = tpu.dynamic_rotate %131 by %c1012_i32 dim 1 : vector<4x1024xf32>, i32 -> vector<4x1024xf32>
    %133 = arith.addf %128, %132 : vector<4x1024xf32>
    %c6 = arith.constant 6 : index
    %c0_93 = arith.constant 0 : index
    %c0_94 = arith.constant 0 : index
    %134 = vector.load %arg6[%c6, %c0_93, %c0_94] : memref<15x4x8xf32, #tpu.memory_space<vmem>>, vector<1x4x8xf32>
    %135 = vector.shape_cast %134 : vector<1x4x8xf32> to vector<4x8xf32>
    %cst_95 = arith.constant dense<0.000000e+00> : vector<4x1024xf32>
    %136 = tpu.matmul %135, %99, %cst_95 {dimension_numbers = #tpu.dot_dimension_numbers<[1], [0], [0], [1], [0, 0, 1, 1], [], []>} : vector<4x8xf32>, vector<8x1024xf32>, vector<4x1024xf32> -> vector<4x1024xf32>
    %c1011_i32 = arith.constant 1011 : i32
    %137 = tpu.dynamic_rotate %136 by %c1011_i32 dim 1 : vector<4x1024xf32>, i32 -> vector<4x1024xf32>
    %138 = arith.addf %133, %137 : vector<4x1024xf32>
    %c7 = arith.constant 7 : index
    %c0_96 = arith.constant 0 : index
    %c0_97 = arith.constant 0 : index
    %139 = vector.load %arg6[%c7, %c0_96, %c0_97] : memref<15x4x8xf32, #tpu.memory_space<vmem>>, vector<1x4x8xf32>
    %140 = vector.shape_cast %139 : vector<1x4x8xf32> to vector<4x8xf32>
    %cst_98 = arith.constant dense<0.000000e+00> : vector<4x1024xf32>
    %141 = tpu.matmul %140, %99, %cst_98 {dimension_numbers = #tpu.dot_dimension_numbers<[1], [0], [0], [1], [0, 0, 1, 1], [], []>} : vector<4x8xf32>, vector<8x1024xf32>, vector<4x1024xf32> -> vector<4x1024xf32>
    %c1010_i32 = arith.constant 1010 : i32
    %142 = tpu.dynamic_rotate %141 by %c1010_i32 dim 1 : vector<4x1024xf32>, i32 -> vector<4x1024xf32>
    %143 = arith.addf %138, %142 : vector<4x1024xf32>
    %c8 = arith.constant 8 : index
    %c0_99 = arith.constant 0 : index
    %c0_100 = arith.constant 0 : index
    %144 = vector.load %arg6[%c8, %c0_99, %c0_100] : memref<15x4x8xf32, #tpu.memory_space<vmem>>, vector<1x4x8xf32>
    %145 = vector.shape_cast %144 : vector<1x4x8xf32> to vector<4x8xf32>
    %cst_101 = arith.constant dense<0.000000e+00> : vector<4x1024xf32>
    %146 = tpu.matmul %145, %99, %cst_101 {dimension_numbers = #tpu.dot_dimension_numbers<[1], [0], [0], [1], [0, 0, 1, 1], [], []>} : vector<4x8xf32>, vector<8x1024xf32>, vector<4x1024xf32> -> vector<4x1024xf32>
    %c1009_i32 = arith.constant 1009 : i32
    %147 = tpu.dynamic_rotate %146 by %c1009_i32 dim 1 : vector<4x1024xf32>, i32 -> vector<4x1024xf32>
    %148 = arith.addf %143, %147 : vector<4x1024xf32>
    %c9 = arith.constant 9 : index
    %c0_102 = arith.constant 0 : index
    %c0_103 = arith.constant 0 : index
    %149 = vector.load %arg6[%c9, %c0_102, %c0_103] : memref<15x4x8xf32, #tpu.memory_space<vmem>>, vector<1x4x8xf32>
    %150 = vector.shape_cast %149 : vector<1x4x8xf32> to vector<4x8xf32>
    %cst_104 = arith.constant dense<0.000000e+00> : vector<4x1024xf32>
    %151 = tpu.matmul %150, %99, %cst_104 {dimension_numbers = #tpu.dot_dimension_numbers<[1], [0], [0], [1], [0, 0, 1, 1], [], []>} : vector<4x8xf32>, vector<8x1024xf32>, vector<4x1024xf32> -> vector<4x1024xf32>
    %c1008_i32 = arith.constant 1008 : i32
    %152 = tpu.dynamic_rotate %151 by %c1008_i32 dim 1 : vector<4x1024xf32>, i32 -> vector<4x1024xf32>
    %153 = arith.addf %148, %152 : vector<4x1024xf32>
    %c10 = arith.constant 10 : index
    %c0_105 = arith.constant 0 : index
    %c0_106 = arith.constant 0 : index
    %154 = vector.load %arg6[%c10, %c0_105, %c0_106] : memref<15x4x8xf32, #tpu.memory_space<vmem>>, vector<1x4x8xf32>
    %155 = vector.shape_cast %154 : vector<1x4x8xf32> to vector<4x8xf32>
    %cst_107 = arith.constant dense<0.000000e+00> : vector<4x1024xf32>
    %156 = tpu.matmul %155, %99, %cst_107 {dimension_numbers = #tpu.dot_dimension_numbers<[1], [0], [0], [1], [0, 0, 1, 1], [], []>} : vector<4x8xf32>, vector<8x1024xf32>, vector<4x1024xf32> -> vector<4x1024xf32>
    %c1007_i32 = arith.constant 1007 : i32
    %157 = tpu.dynamic_rotate %156 by %c1007_i32 dim 1 : vector<4x1024xf32>, i32 -> vector<4x1024xf32>
    %158 = arith.addf %153, %157 : vector<4x1024xf32>
    %c11 = arith.constant 11 : index
    %c0_108 = arith.constant 0 : index
    %c0_109 = arith.constant 0 : index
    %159 = vector.load %arg6[%c11, %c0_108, %c0_109] : memref<15x4x8xf32, #tpu.memory_space<vmem>>, vector<1x4x8xf32>
    %160 = vector.shape_cast %159 : vector<1x4x8xf32> to vector<4x8xf32>
    %cst_110 = arith.constant dense<0.000000e+00> : vector<4x1024xf32>
    %161 = tpu.matmul %160, %99, %cst_110 {dimension_numbers = #tpu.dot_dimension_numbers<[1], [0], [0], [1], [0, 0, 1, 1], [], []>} : vector<4x8xf32>, vector<8x1024xf32>, vector<4x1024xf32> -> vector<4x1024xf32>
    %c1006_i32 = arith.constant 1006 : i32
    %162 = tpu.dynamic_rotate %161 by %c1006_i32 dim 1 : vector<4x1024xf32>, i32 -> vector<4x1024xf32>
    %163 = arith.addf %158, %162 : vector<4x1024xf32>
    %c12 = arith.constant 12 : index
    %c0_111 = arith.constant 0 : index
    %c0_112 = arith.constant 0 : index
    %164 = vector.load %arg6[%c12, %c0_111, %c0_112] : memref<15x4x8xf32, #tpu.memory_space<vmem>>, vector<1x4x8xf32>
    %165 = vector.shape_cast %164 : vector<1x4x8xf32> to vector<4x8xf32>
    %cst_113 = arith.constant dense<0.000000e+00> : vector<4x1024xf32>
    %166 = tpu.matmul %165, %99, %cst_113 {dimension_numbers = #tpu.dot_dimension_numbers<[1], [0], [0], [1], [0, 0, 1, 1], [], []>} : vector<4x8xf32>, vector<8x1024xf32>, vector<4x1024xf32> -> vector<4x1024xf32>
    %c1005_i32 = arith.constant 1005 : i32
    %167 = tpu.dynamic_rotate %166 by %c1005_i32 dim 1 : vector<4x1024xf32>, i32 -> vector<4x1024xf32>
    %168 = arith.addf %163, %167 : vector<4x1024xf32>
    %c13_114 = arith.constant 13 : index
    %c0_115 = arith.constant 0 : index
    %c0_116 = arith.constant 0 : index
    %169 = vector.load %arg6[%c13_114, %c0_115, %c0_116] : memref<15x4x8xf32, #tpu.memory_space<vmem>>, vector<1x4x8xf32>
    %170 = vector.shape_cast %169 : vector<1x4x8xf32> to vector<4x8xf32>
    %cst_117 = arith.constant dense<0.000000e+00> : vector<4x1024xf32>
    %171 = tpu.matmul %170, %99, %cst_117 {dimension_numbers = #tpu.dot_dimension_numbers<[1], [0], [0], [1], [0, 0, 1, 1], [], []>} : vector<4x8xf32>, vector<8x1024xf32>, vector<4x1024xf32> -> vector<4x1024xf32>
    %c1004_i32 = arith.constant 1004 : i32
    %172 = tpu.dynamic_rotate %171 by %c1004_i32 dim 1 : vector<4x1024xf32>, i32 -> vector<4x1024xf32>
    %173 = arith.addf %168, %172 : vector<4x1024xf32>
    %c14_118 = arith.constant 14 : index
    %c0_119 = arith.constant 0 : index
    %c0_120 = arith.constant 0 : index
    %174 = vector.load %arg6[%c14_118, %c0_119, %c0_120] : memref<15x4x8xf32, #tpu.memory_space<vmem>>, vector<1x4x8xf32>
    %175 = vector.shape_cast %174 : vector<1x4x8xf32> to vector<4x8xf32>
    %cst_121 = arith.constant dense<0.000000e+00> : vector<4x1024xf32>
    %176 = tpu.matmul %175, %99, %cst_121 {dimension_numbers = #tpu.dot_dimension_numbers<[1], [0], [0], [1], [0, 0, 1, 1], [], []>} : vector<4x8xf32>, vector<8x1024xf32>, vector<4x1024xf32> -> vector<4x1024xf32>
    %c1003_i32 = arith.constant 1003 : i32
    %177 = tpu.dynamic_rotate %176 by %c1003_i32 dim 1 : vector<4x1024xf32>, i32 -> vector<4x1024xf32>
    %178 = arith.addf %173, %177 : vector<4x1024xf32>
    %cst_122 = arith.constant dense<0.000000e+00> : vector<4x1024xf32>
    %179 = tpu.matmul %101, %1, %cst_122 {dimension_numbers = #tpu.dot_dimension_numbers<[1], [0], [0], [1], [0, 0, 1, 1], [], []>} : vector<4x4xf32>, vector<4x1024xf32>, vector<4x1024xf32> -> vector<4x1024xf32>
    %180 = arith.addf %178, %179 : vector<4x1024xf32>
    %181 = vector.broadcast %100 : vector<4x1xf32> to vector<4x1024xf32>
    %182 = arith.addf %180, %181 : vector<4x1024xf32>
    %cst_123 = arith.constant dense<0.000000e+00> : vector<4x1024xf32>
    %183 = tpu.matmul %102, %99, %cst_123 {dimension_numbers = #tpu.dot_dimension_numbers<[1], [0], [0], [1], [0, 0, 1, 1], [], []>} : vector<4x8xf32>, vector<8x1024xf32>, vector<4x1024xf32> -> vector<4x1024xf32>
    %c7_i32 = arith.constant 7 : i32
    %184 = vector.broadcast %c7_i32 : i32 to vector<1x1024xi32>
    %185 = arith.cmpi sge, %4, %184 : vector<1x1024xi32>
    %c121_i32 = arith.constant 121 : i32
    %186 = vector.broadcast %c121_i32 : i32 to vector<1x1024xi32>
    %187 = arith.cmpi slt, %4, %186 : vector<1x1024xi32>
    %188 = arith.andi %185, %187 : vector<1x1024xi1>
    %cst_124 = arith.constant 0.000000e+00 : f32
    %189 = vector.shape_cast %188 : vector<1x1024xi1> to vector<1x1024xi1>
    %190 = vector.broadcast %189 : vector<1x1024xi1> to vector<4x1024xi1>
    %191 = vector.broadcast %cst_124 : f32 to vector<4x1024xf32>
    %192 = arith.select %190, %183, %191 : vector<4x1024xi1>, vector<4x1024xf32>
    %cst_125 = arith.constant dense<0.000000e+00> : vector<4x1024xf32>
    %193 = tpu.matmul %104, %1, %cst_125 {dimension_numbers = #tpu.dot_dimension_numbers<[1], [0], [0], [1], [0, 0, 1, 1], [], []>} : vector<4x4xf32>, vector<4x1024xf32>, vector<4x1024xf32> -> vector<4x1024xf32>
    %194 = arith.addf %192, %193 : vector<4x1024xf32>
    %c1023_i32_126 = arith.constant 1023 : i32
    %195 = tpu.dynamic_rotate %194 by %c1023_i32_126 dim 1 : vector<4x1024xf32>, i32 -> vector<4x1024xf32>
    %196 = arith.addf %194, %195 : vector<4x1024xf32>
    %c1022_i32_127 = arith.constant 1022 : i32
    %197 = tpu.dynamic_rotate %196 by %c1022_i32_127 dim 1 : vector<4x1024xf32>, i32 -> vector<4x1024xf32>
    %198 = arith.addf %196, %197 : vector<4x1024xf32>
    %c1020_i32_128 = arith.constant 1020 : i32
    %199 = tpu.dynamic_rotate %198 by %c1020_i32_128 dim 1 : vector<4x1024xf32>, i32 -> vector<4x1024xf32>
    %200 = arith.addf %198, %199 : vector<4x1024xf32>
    %c1016_i32_129 = arith.constant 1016 : i32
    %201 = tpu.dynamic_rotate %200 by %c1016_i32_129 dim 1 : vector<4x1024xf32>, i32 -> vector<4x1024xf32>
    %202 = arith.addf %200, %201 : vector<4x1024xf32>
    %c1008_i32_130 = arith.constant 1008 : i32
    %203 = tpu.dynamic_rotate %202 by %c1008_i32_130 dim 1 : vector<4x1024xf32>, i32 -> vector<4x1024xf32>
    %204 = arith.addf %202, %203 : vector<4x1024xf32>
    %c992_i32 = arith.constant 992 : i32
    %205 = tpu.dynamic_rotate %204 by %c992_i32 dim 1 : vector<4x1024xf32>, i32 -> vector<4x1024xf32>
    %206 = arith.addf %204, %205 : vector<4x1024xf32>
    %c960_i32 = arith.constant 960 : i32
    %207 = tpu.dynamic_rotate %206 by %c960_i32 dim 1 : vector<4x1024xf32>, i32 -> vector<4x1024xf32>
    %208 = arith.addf %206, %207 : vector<4x1024xf32>
    %c100_i32 = arith.constant 100 : i32
    %209 = tpu.dynamic_rotate %208 by %c100_i32 dim 1 : vector<4x1024xf32>, i32 -> vector<4x1024xf32>
    %210 = vector.broadcast %103 : vector<4x1xf32> to vector<4x1024xf32>
    %211 = arith.addf %209, %210 : vector<4x1024xf32>
    %c100_i32_131 = arith.constant 100 : i32
    %212 = vector.broadcast %c100_i32_131 : i32 to vector<1x1024xi32>
    %213 = arith.cmpi slt, %4, %212 : vector<1x1024xi32>
    %214 = vector.shape_cast %213 : vector<1x1024xi1> to vector<1x1024xi1>
    %215 = vector.broadcast %214 : vector<1x1024xi1> to vector<4x1024xi1>
    %216 = arith.select %215, %182, %211 : vector<4x1024xi1>, vector<4x1024xf32>
    %c0_132 = arith.constant 0 : index
    %c0_133 = arith.constant 0 : index
    %217 = vector.load %arg8[%c0_132, %c0_133] : memref<4x1024xf32, #tpu.memory_space<vmem>>, vector<4x1024xf32>
    tpu.vector_store %arg8[%c0_132, %c0_133], %216 {strides = array<i32>} : memref<4x1024xf32, #tpu.memory_space<vmem>>, vector<4x1024xf32>,
    return
  }
  func.func @transform_0(%arg0: i32) -> (i32, i32) {
    %c0_i32 = arith.constant 0 : i32
    %c0_i32_0 = arith.constant 0 : i32
    return %c0_i32, %arg0 : i32, i32
  }
  func.func @transform_1(%arg0: i32) -> (i32, i32) {
    %c0_i32 = arith.constant 0 : i32
    %c0_i32_0 = arith.constant 0 : i32
    return %c0_i32, %arg0 : i32, i32
  }
  func.func @transform_2(%arg0: i32) -> (i32, i32, i32) {
    %c0_i32 = arith.constant 0 : i32
    %c0_i32_0 = arith.constant 0 : i32
    %c0_i32_1 = arith.constant 0 : i32
    %c0_i32_2 = arith.constant 0 : i32
    return %c0_i32, %c0_i32_0, %c0_i32_1 : i32, i32, i32
  }
  func.func @transform_3(%arg0: i32) -> (i32, i32, i32, i32) {
    %c0_i32 = arith.constant 0 : i32
    %c0_i32_0 = arith.constant 0 : i32
    %c0_i32_1 = arith.constant 0 : i32
    %c0_i32_2 = arith.constant 0 : i32
    %c0_i32_3 = arith.constant 0 : i32
    return %c0_i32, %c0_i32_0, %c0_i32_1, %c0_i32_2 : i32, i32, i32, i32
  }
  func.func @transform_4(%arg0: i32) -> (i32, i32, i32) {
    %c0_i32 = arith.constant 0 : i32
    %c0_i32_0 = arith.constant 0 : i32
    %c0_i32_1 = arith.constant 0 : i32
    %c0_i32_2 = arith.constant 0 : i32
    return %c0_i32, %c0_i32_0, %c0_i32_1 : i32, i32, i32
  }
  func.func @transform_5(%arg0: i32) -> (i32, i32, i32) {
    %c0_i32 = arith.constant 0 : i32
    %c0_i32_0 = arith.constant 0 : i32
    %c0_i32_1 = arith.constant 0 : i32
    %c0_i32_2 = arith.constant 0 : i32
    return %c0_i32, %c0_i32_0, %c0_i32_1 : i32, i32, i32
  }
  func.func @transform_6(%arg0: i32) -> (i32, i32) {
    %c0_i32 = arith.constant 0 : i32
    %c0_i32_0 = arith.constant 0 : i32
    %c0_i32_1 = arith.constant 0 : i32
    return %c0_i32, %c0_i32_0 : i32, i32
  }
  func.func @transform_7(%arg0: i32) -> (i32, i32) {
    %c0_i32 = arith.constant 0 : i32
    %c0_i32_0 = arith.constant 0 : i32
    return %c0_i32, %arg0 : i32, i32
  }
}

</mosaic_0001>

<bundles_post_ra>
// kernel: tpu_custom_call.1
= control target key start
LH: loop header
LB: loop body
LE: loop exit
PB: predicated region body
PF: predicated region fallthrough
CT: control target
= control target key end

     0   :  { %s8734_s0 = inlined_call_operand.vmem [shape: f32[4,1024], index: 0, kind: input, shape index: {}]   ;;  %s8735_s1 = inlined_call_operand.vmem [shape: f32[4,1024], index: 1, kind: input, shape index: {}]   ;;  %s8736_s2 = inlined_call_operand.vmem [shape: f32[3,8,4], index: 2, kind: input, shape index: {}]   ;;  %s8737_s3 = inlined_call_operand.vmem [shape: f32[2,3,8,8], index: 3, kind: input, shape index: {}]   ;;  %s8738_s4 = inlined_call_operand.vmem [shape: f32[3,8,1], index: 4, kind: input, shape index: {}]   ;;  %s8739_s5 = inlined_call_operand.vmem [shape: f32[15,4,8], index: 5, kind: input, shape index: {}]   ;;  %s8740_s6 = inlined_call_operand.vmem [shape: f32[4,18], index: 6, kind: input, shape index: {}]   ;;  %s8741_s7 = inlined_call_operand.hbm [shape: f32[4,1024], index: 7, kind: output, shape index: {}]  }
   0x1   :  { %v28_v0 = vld [vmem:[%s8734_s0 + $0x8] sm:$0xff]  ;;  %v27_v1 = vld [vmem:[%s8734_s0] sm:$0xff]  ;;  %v30_v2 = vld [vmem:[%s8734_s0 + $0x18] sm:$0xff] }
   0x2   :  { %59 = vst [vmem:[#allocation1 + $0x10] ss:$2 sm:$0xff] %v28_v0  ;;  %v29_v3 = vld [vmem:[%s8734_s0 + $0x10] sm:$0xff] }
   0x3   :  { %12 = vsyncpa [#allocation3], 0  ;;  %57 = vst [vmem:[#allocation1] ss:$2 sm:$0xff] %v27_v1  ;;  %s6419_s9 = smov 1   ;;  %vm158_vm0 = vcmask 1043456   ;;  %v35_v34 = vlaneseq }
   0x4   :  { %63 = vst [vmem:[#allocation1 + $0x30] ss:$2 sm:$0xff] %v30_v2  ;;  %v6049_v16 = vld [vmem:[%s8736_s2 + $0x8] sm:$0xff]  ;;  %vm154_vm1 = vcmask 31744   ;;  %v6521_v22 = vld [vmem:[%s8735_s1] sm:$0xff]  ;;  %v6532_v25 = vld [vmem:[%s8735_s1 + $0x10] sm:$0xff] }
   0x5   :  { %61 = vst [vmem:[#allocation1 + $0x20] ss:$2 sm:$0xff] %v29_v3  ;;  %v6514_v21 = vld [vmem:[%s8735_s1 + $0x8] sm:$0xff]  ;;  %v6541_v28 = vld [vmem:[%s8735_s1 + $0x18] sm:$0xff]  ;;  %s6420_s19 = smov 127   ;;  %v6558_v35 = vand.u32 127, %v35_v34 }
   0x6   :  { %v6421_v53 = vmov 0   ;;  %v52_v59 = vld [vmem:[%s8736_s2] sm:$0xff]  ;;  %s6423_s25 = smov 126   ;;  %s6424_s10 = smov 4  }
   0x7   :  { %v42_v37 = vadd.s32 768, %v6558_v35  ;;  %v38_v38 = vadd.s32 256, %v6558_v35  ;;  %v37_v39 = vadd.s32 128, %v6558_v35  ;;  %v39_v41 = vadd.s32 384, %v6558_v35  ;;  %6388 = vset.pattern.permute.xlu1 %v6421_v53  ;;  %6389 = vset.pattern.permute.xlu0 %v6421_v53  ;;  %s6425_s11 = smov 124   ;;  %s6427_s12 = smov 114  }
   0x8   :  { %vm96_vm2 = vcmp.lt.s32.totalorder %v6558_v35, 1  ;;  %v41_v48 = vadd.s32 640, %v6558_v35  ;;  %v43_v51 = vadd.s32 896, %v6558_v35  ;;  %v40_v52 = vadd.s32 512, %v6558_v35  ;;  %6390 = vset.pattern.permute.xlu2 %v6421_v53  ;;  %s6428_s16 = smov 121   ;;  %s6430_s23 = smov 119  }
   0x9   :  { %v67_v4 = vld.sshfl [vmem:[#allocation1 + $0x18] sm:$0xff pattern:$0x75316420]  ;;  %v66_v5 = vld.sshfl [vmem:[#allocation1 + $0x10] sm:$0xff pattern:$0x75316420] }
   0xa   :  { %86 = vrot.lane.b32.xlu1 %v67_v4, %s6419_s9  ;;  %v65_v6 = vld.sshfl [vmem:[#allocation1 + $0x8] sm:$0xff pattern:$0x75316420]  ;;  %141 = vst [vmem:[#allocation1 + $0x10] ss:$2 sm:$0xff] %v28_v0  ;;  %v6564_v43 = vand.u32 127, %v42_v37 }
   0xb   :  { %82 = vrot.lane.b32.xlu0 %v65_v6, %s6419_s9  ;;  %v64_v7 = vld.sshfl [vmem:[#allocation1] sm:$0xff pattern:$0x75316420]  ;;  %v71_v8 = vld.sshfl [vmem:[#allocation1 + $0x38] sm:$0xff pattern:$0x75316420] }
   0xc   :  { %139 = vst [vmem:[#allocation1] ss:$2 sm:$0xff] %v27_v1  ;;  %v68_v9 = vld.sshfl [vmem:[#allocation1 + $0x20] sm:$0xff pattern:$0x75316420]  ;;  %v6566_v44 = vand.u32 127, %v38_v38 }
   0xd   :  { %v69_v10 = vld.sshfl [vmem:[#allocation1 + $0x28] sm:$0xff pattern:$0x75316420]  ;;  %v70_v11 = vld.sshfl [vmem:[#allocation1 + $0x30] sm:$0xff pattern:$0x75316420] }
   0xe   :  { %90 = vrot.lane.b32.xlu2 %v69_v10, %s6419_s9  ;;  %143 = vst [vmem:[#allocation1 + $0x20] ss:$2 sm:$0xff] %v29_v3  ;;  %v6568_v45 = vand.u32 127, %v37_v39  ;;  %v6570_v46 = vand.u32 127, %v39_v41  ;;  %vm111_vm3 = vcmp.ge.s32.totalorder %v6564_v43, 1  ;;  %vm107_vm4 = vcmp.ge.s32.totalorder %v6566_v44, 1 }
   0xf   :  { %145 = vst [vmem:[#allocation1 + $0x30] ss:$2 sm:$0xff] %v30_v2  ;;  %v6600_v63 = vand.u32 127, %v41_v48  ;;  %vm563_vm7 = vcmp.lt.s32.totalorder %v6558_v35, 127  ;;  %vm105_vm9 = vcmp.ge.s32.totalorder %v6558_v35, 1  ;;  %vm574_vm13 = vcmp.lt.s32.totalorder %v6566_v44, 127 }
  0x10   :  { %8748 = vst [vmem:[#allocation5_spill] sm:$0xff] %v6564_v43  ;;  %vm106_vm5 = vcmp.ge.s32.totalorder %v6568_v45, 1  ;;  %vm108_vm6 = vcmp.ge.s32.totalorder %v6570_v46, 1  ;;  %vm573_vm12 = vcmp.lt.s32.totalorder %v6568_v45, 127  ;;  %vm575_vm14 = vcmp.lt.s32.totalorder %v6570_v46, 127  ;;  %s6431_s26 = smov 118  }
  0x11   :  { %v148_v12 = vld.sshfl [vmem:[#allocation1 + $0x10] sm:$0xff pattern:$0x75316420]  ;;  %v149_v13 = vld.sshfl [vmem:[#allocation1 + $0x18] sm:$0xff pattern:$0x75316420] }
  0x12   :  { %526 = vst [vmem:[#allocation1 + $0x10] ss:$2 sm:$0xff] %v28_v0  ;;  %80 = vrot.lane.b32.xlu1 %v64_v7, %s6419_s9  ;;  %6054 = vmatpush.msk.msra.mxu2 %vm158_vm0, %v148_v12  ;;  %v6604_v0 = vand.u32 127, %v43_v51  ;;  %vm110_vm8 = vcmp.ge.s32.totalorder %v6600_v63, 1  ;;  %vm578_vm15 = vcmp.lt.s32.totalorder %v6564_v43, 127  ;;  %s6432_s29 = smov 117  }
  0x13   :  { %84 = vrot.lane.b32.xlu0 %v66_v5, %s6419_s9  ;;  %v146_v14 = vld.sshfl [vmem:[#allocation1] sm:$0xff pattern:$0x75316420]  ;;  %v147_v15 = vld.sshfl [vmem:[#allocation1 + $0x8] sm:$0xff pattern:$0x75316420]  ;;  %6056 = vmatpush.msk.msra.mxu3 %vm158_vm0, %v149_v13 }
  0x14   :  { %524 = vst [vmem:[#allocation1] ss:$2 sm:$0xff] %v27_v1  ;;  %6052 = vmatpush.msk.msra.mxu1 %vm158_vm0, %v147_v15  ;;  %6055 = vmatmul.msk.f32.vlgmr.msra.gmra.mxu2 %vm154_vm1, %v6049_v16  ;;  %v6606_v1 = vand.u32 127, %v40_v52  ;;  %vm112_vm10 = vcmp.ge.s32.totalorder %v6604_v0, 1  ;;  %s6435_s0 = smov 113   ;;  %s6441_s13 = smov 96  }
  0x15   :  { %v150_v17 = vld.sshfl [vmem:[#allocation1 + $0x20] sm:$0xff pattern:$0x75316420]  ;;  %v151_v18 = vld.sshfl [vmem:[#allocation1 + $0x28] sm:$0xff pattern:$0x75316420]  ;;  %6053 = vmatmul.msk.f32.vlgmr.msra.gmra.mxu1 %vm154_vm1, %v6049_v16  ;;  %6057 = vmatmul.msk.f32.vlgmr.msra.gmra.mxu3 %vm154_vm1, %v6049_v16 }
  0x16   :  { %528 = vst [vmem:[#allocation1 + $0x20] ss:$2 sm:$0xff] %v29_v3  ;;  %v152_v19 = vld.sshfl [vmem:[#allocation1 + $0x30] sm:$0xff pattern:$0x75316420]  ;;  %92 = vrot.lane.b32.xlu2 %v70_v11, %s6419_s9  ;;  %6050 = vmatpush.msk.msra.mxu0 %vm158_vm0, %v146_v14  ;;  %vm109_vm11 = vcmp.ge.s32.totalorder %v6606_v1, 1 }
  0x17   :  { %v153_v20 = vld.sshfl [vmem:[#allocation1 + $0x38] sm:$0xff pattern:$0x75316420]  ;;  %6060 = vmatpush.msk.msrb.mxu1 %vm158_vm0, %v151_v18  ;;  %6062 = vmatpush.msk.msrb.mxu2 %vm158_vm0, %v152_v19  ;;  %8749 = vst [vmem:[#allocation6_spill] sm:$0xff] %v6600_v63  ;;  %s6442_s14 = smov 64   ;;  %s6443_s15 = smov 107  }
  0x18   :  { %530 = vst [vmem:[#allocation1 + $0x30] ss:$2 sm:$0xff] %v30_v2  ;;  %6064 = vmatpush.msk.msrb.mxu3 %vm158_vm0, %v153_v20  ;;  %6051 = vmatmul.msk.f32.vlgmr.msra.gmra.mxu0 %vm154_vm1, %v6049_v16  ;;  %v799_v2 = vld [vmem:[%s8738_s4] sm:$0xff]  ;;  %v6082_v20 = vld [vmem:[%s8736_s2 + $0x10] sm:$0xff]  ;;  %s6422_s2 = smov 2   ;;  %s6040_s20 = sshll.u32 %s8741_s7, 4  ;;  %s6041_s20 = int_to_ptr.hbm [resolvable:$true] %s6040_s20 }
  0x19   :  { %v534_v23 = vld.sshfl [vmem:[#allocation1 + $0x18] sm:$0xff pattern:$0x75316420]  ;;  %v533_v24 = vld.sshfl [vmem:[#allocation1 + $0x10] sm:$0xff pattern:$0x75316420]  ;;  %6058 = vmatpush.msk.msrb.mxu0 %vm158_vm0, %v150_v17 }
  0x1a   :  { %88 = vrot.lane.b32.xlu1 %v68_v9, %s6419_s9  ;;  %5088 = vst [vmem:[#allocation1 + $0x10] ss:$2 sm:$0xff] %v6514_v21 }
  0x1b   :  { %94 = vrot.lane.b32.xlu0 %v71_v8, %s6419_s9  ;;  %v531_v26 = vld.sshfl [vmem:[#allocation1] sm:$0xff pattern:$0x75316420]  ;;  %v532_v27 = vld.sshfl [vmem:[#allocation1 + $0x8] sm:$0xff pattern:$0x75316420] }
  0x1c   :  { %5086 = vst [vmem:[#allocation1] ss:$2 sm:$0xff] %v6521_v22  ;;  %6063 = vmatmul.msk.f32.vlgmr.msrb.gmra.mxu2 %vm154_vm1, %v6049_v16  ;;  %s6434_s9 = smov 115  }
  0x1d   :  { %v535_v29 = vld.sshfl [vmem:[#allocation1 + $0x20] sm:$0xff pattern:$0x75316420]  ;;  %v536_v30 = vld.sshfl [vmem:[#allocation1 + $0x28] sm:$0xff pattern:$0x75316420]  ;;  %6061 = vmatmul.msk.f32.vlgmr.msrb.gmra.mxu1 %vm154_vm1, %v6049_v16  ;;  %6065 = vmatmul.msk.f32.vlgmr.msrb.gmra.mxu3 %vm154_vm1, %v6049_v16 }
  0x1e   :  { %551 = vrot.lane.b32.xlu2 %v533_v24, %s6420_s19  ;;  %5090 = vst [vmem:[#allocation1 + $0x20] ss:$2 sm:$0xff] %v6532_v25 }
  0x1f   :  { %v537_v31 = vld.sshfl [vmem:[#allocation1 + $0x30] sm:$0xff pattern:$0x75316420]  ;;  %v538_v32 = vld.sshfl [vmem:[#allocation1 + $0x38] sm:$0xff pattern:$0x75316420] }
  0x20   :  { %5092 = vst [vmem:[#allocation1 + $0x30] ss:$2 sm:$0xff] %v6541_v28  ;;  %6059 = vmatmul.msk.f32.vlgmr.msrb.gmra.mxu0 %vm154_vm1, %v6049_v16 }
  0x21   :  { %8750 = vst [vmem:[#allocation7_spill] sm:$0xff] %v6604_v0 }
  0x22   :  { %555 = vrot.lane.b32.xlu1 %v535_v29, %s6420_s19 }
  0x23   :  { %553 = vrot.lane.b32.xlu0 %v534_v23, %s6420_s19 }
  0x26   :  { %549 = vrot.lane.b32.xlu2 %v532_v27, %s6420_s19 }
  0x2a   :  { %559 = vrot.lane.b32.xlu1 %v537_v31, %s6420_s19 }
  0x2b   :  { %547 = vrot.lane.b32.xlu0 %v531_v26, %s6420_s19 }
  0x2e   :  { %561 = vrot.lane.b32.xlu2 %v538_v32, %s6420_s19 }
  0x32   :  { %802 = vperm.xlu1 %6388, %v799_v2  }
  0x33   :  { %557 = vrot.lane.b32.xlu0 %v536_v30, %s6420_s19 }
  0x68   :  { %v91_v33 = vpop.permute.xlu2 %90 }
  0x70   :  { %v93_v36 = vpop.permute.xlu2 %92 }
  0x71   :  { %v98_v49 = vsel %vm96_vm2, %v91_v33, %v93_v36 }
  0x72   :  { %v135_v60 = vsel %vm111_vm3, %v98_v49, 0.0  ;;  %vm576_vm3 = vcmp.lt.s32.totalorder %v6606_v1, 127 }
  0x78   :  { %v6572_v47 = vpop.permute.xlu2 %551 }
  0x7c   :  { %v87_v40 = vpop.permute.xlu1 %86 }
  0x7d   :  { %v83_v42 = vpop.permute.xlu0 %82 }
  0x80   :  { %v550_v3 = vpop.permute.xlu2 %549 }
  0x81   :  { %v569_v8 = vsel %vm563_vm7, %v550_v3, %v6572_v47 }
  0x82   :  { %v597_v15 = vsel %vm573_vm12, %v569_v8, 0.0  ;;  %vm853_vm12 = vcmp.ge.s32.totalorder %v6564_v43, 2 }
  0x84   :  { %v81_v50 = vpop.permute.xlu1 %80 }
  0x85   :  { %v85_v54 = vpop.permute.xlu0 %84  ;;  %v103_v55 = vsel %vm96_vm2, %v81_v50, %v83_v42 }
  0x86   :  { %v101_v56 = vsel %vm96_vm2, %v85_v54, %v87_v40  ;;  %v102_v57 = vsel %vm96_vm2, %v83_v42, %v85_v54  ;;  %v130_v58 = vsel %vm106_vm5, %v103_v55, 0.0  ;;  %vm881_vm5 = vcmask 64512  }
  0x87   :  { %v131_v61 = vsel %vm107_vm4, %v102_v57, 0.0  ;;  %v132_v62 = vsel %vm108_vm6, %v101_v56, 0.0  ;;  %6068 = vmatpush.msk.msra.mxu1 %vm158_vm0, %v130_v58  ;;  %vm577_vm4 = vcmp.lt.s32.totalorder %v6600_v63, 127  ;;  %vm838_vm6 = vcmp.lt.s32.totalorder %v6558_v35, 2 }
  0x88   :  { %6070 = vmatpush.msk.msra.mxu2 %vm158_vm0, %v131_v61  ;;  %6072 = vmatpush.msk.msra.mxu3 %vm158_vm0, %v132_v62  ;;  %v562_v26 = vpop.permute.xlu2 %561 }
  0x89   :  { %6069 = vmatmul.msk.f32.vlgmr.msra.gmra.mxu1 %vm154_vm1, %v52_v59  ;;  %6071 = vmatmul.msk.f32.vlgmr.msra.gmra.mxu2 %vm154_vm1, %v52_v59 }
  0x8a   :  { %6073 = vmatmul.msk.f32.vlgmr.msra.gmra.mxu3 %vm154_vm1, %v52_v59  ;;  %6078 = vmatpush.msk.msrb.mxu2 %vm158_vm0, %v135_v60 }
  0x8c   :  { %v89_v4 = vpop.permute.xlu1 %88 }
  0x8d   :  { %v95_v5 = vpop.permute.xlu0 %94  ;;  %v99_v6 = vsel %vm96_vm2, %v89_v4, %v91_v33  ;;  %v100_v7 = vsel %vm96_vm2, %v87_v40, %v89_v4 }
  0x8e   :  { %v97_v9 = vsel %vm96_vm2, %v93_v36, %v95_v5  ;;  %v104_v10 = vsel %vm96_vm2, %v95_v5, %v81_v50  ;;  %v134_v11 = vsel %vm110_vm8, %v99_v6, 0.0  ;;  %v133_v14 = vsel %vm109_vm11, %v100_v7, 0.0 }
  0x8f   :  { %v129_v12 = vsel %vm105_vm9, %v104_v10, 0.0  ;;  %v136_v13 = vsel %vm112_vm10, %v97_v9, 0.0  ;;  %6076 = vmatpush.msk.msrb.mxu1 %vm158_vm0, %v134_v11  ;;  %vm579_vm2 = vcmp.lt.s32.totalorder %v6604_v0, 127  ;;  %vm848_vm8 = vcmp.ge.s32.totalorder %v6568_v45, 2 }
  0x90   :  { %6066 = vmatpush.msk.msra.mxu0 %vm158_vm0, %v129_v12  ;;  %6080 = vmatpush.msk.msrb.mxu3 %vm158_vm0, %v136_v13  ;;  %vm847_vm9 = vcmp.ge.s32.totalorder %v6558_v35, 2  ;;  %vm849_vm10 = vcmp.ge.s32.totalorder %v6566_v44, 2  ;;  %vm850_vm11 = vcmp.ge.s32.totalorder %v6570_v46, 2 }
  0x91   :  { %6067 = vmatmul.msk.f32.vlgmr.msra.gmra.mxu0 %vm154_vm1, %v52_v59  ;;  %6077 = vmatmul.msk.f32.vlgmr.msrb.gmra.mxu1 %vm154_vm1, %v52_v59 }
  0x92   :  { %6074 = vmatpush.msk.msrb.mxu0 %vm158_vm0, %v133_v14  ;;  %6079 = vmatmul.msk.f32.vlgmr.msrb.gmra.mxu2 %vm154_vm1, %v52_v59  ;;  %v212_v42 = vpop.f32.mrf.mxu1 }
  0x93   :  { %6081 = vmatmul.msk.f32.vlgmr.msrb.gmra.mxu3 %vm154_vm1, %v52_v59  ;;  %6085 = vmatpush.msk.msra.mxu1 %vm158_vm0, %v597_v15 }
  0x94   :  { %v556_v16 = vpop.permute.xlu1 %555 }
  0x95   :  { %v554_v17 = vpop.permute.xlu0 %553  ;;  %v192_v49 = vpop.f32.mrf.mxu0 }
  0x96   :  { %v568_v18 = vsel %vm563_vm7, %v6572_v47, %v554_v17  ;;  %v567_v19 = vsel %vm563_vm7, %v554_v17, %v556_v16 }
  0x97   :  { %v598_v23 = vsel %vm574_vm13, %v568_v18, 0.0  ;;  %v599_v24 = vsel %vm575_vm14, %v567_v19, 0.0  ;;  %v232_v47 = vpop.f32.mrf.mxu2  ;;  %vm854_vm13 = vcmp.ge.s32.totalorder %v6604_v0, 2  ;;  %vm1226_vm14 = vcmp.lt.s32.totalorder %v6558_v35, 126 }
  0x98   :  { %6087 = vmatpush.msk.msra.mxu2 %vm158_vm0, %v598_v23  ;;  %6089 = vmatpush.msk.msra.mxu3 %vm158_vm0, %v599_v24  ;;  %v252_v48 = vpop.f32.mrf.mxu3 }
  0x99   :  { %6075 = vmatmul.msk.f32.vlgmr.msrb.gmra.mxu0 %vm154_vm1, %v52_v59  ;;  %6086 = vmatmul.msk.f32.vlgmr.msra.gmra.mxu1 %vm154_vm1, %v6082_v20 }
  0x9a   :  { %6088 = vmatmul.msk.f32.vlgmr.msra.gmra.mxu2 %vm154_vm1, %v6082_v20  ;;  %v292_v50 = vpop.f32.mrf.mxu1 }
  0x9b   :  { %6090 = vmatmul.msk.f32.vlgmr.msra.gmra.mxu3 %vm154_vm1, %v6082_v20 }
  0x9c   :  { %v560_v27 = vpop.permute.xlu1 %559 }
  0x9d   :  { %v564_v29 = vsel %vm563_vm7, %v560_v27, %v562_v26  ;;  %v548_v30 = vpop.permute.xlu0 %547  ;;  %v272_v53 = vpop.f32.mrf.mxu0 }
  0x9e   :  { %v602_v31 = vsel %vm578_vm15, %v564_v29, 0.0  ;;  %v570_v32 = vsel %vm563_vm7, %v548_v30, %v550_v3  ;;  %v571_v33 = vsel %vm563_vm7, %v562_v26, %v548_v30  ;;  %vm1237_vm15 = vcmp.lt.s32.totalorder %v6566_v44, 126 }
  0x9f   :  { %v596_v34 = vsel %vm563_vm7, %v570_v32, 0.0  ;;  %v603_v36 = vsel %vm579_vm2, %v571_v33, 0.0  ;;  %6095 = vmatpush.msk.msrb.mxu2 %vm158_vm0, %v602_v31  ;;  %v312_v51 = vpop.f32.mrf.mxu2  ;;  %vm851_vm2 = vcmp.ge.s32.totalorder %v6606_v1, 2 }
  0xa0   :  { %6083 = vmatpush.msk.msra.mxu0 %vm158_vm0, %v596_v34  ;;  %6097 = vmatpush.msk.msrb.mxu3 %vm158_vm0, %v603_v36  ;;  %v332_v52 = vpop.f32.mrf.mxu3 }
  0xa1   :  { %6084 = vmatmul.msk.f32.vlgmr.msra.gmra.mxu0 %vm154_vm1, %v6082_v20 }
  0xa2   :  { %6096 = vmatmul.msk.f32.vlgmr.msrb.gmra.mxu2 %vm154_vm1, %v6082_v20 }
  0xa3   :  { %6098 = vmatmul.msk.f32.vlgmr.msrb.gmra.mxu3 %vm154_vm1, %v6082_v20 }
  0xa4   :  { %v803_v3 = vpop.permute.xlu1 %802 }
  0xa5   :  { %v558_v37 = vpop.permute.xlu0 %557 }
  0xa6   :  { %v565_v38 = vsel %vm563_vm7, %v558_v37, %v560_v27  ;;  %v566_v39 = vsel %vm563_vm7, %v556_v16, %v558_v37 }
  0xa7   :  { %v600_v40 = vsel %vm576_vm3, %v566_v39, 0.0  ;;  %v601_v41 = vsel %vm577_vm4, %v565_v38, 0.0  ;;  %vm852_vm3 = vcmp.ge.s32.totalorder %v6600_v63, 2  ;;  %vm1236_vm4 = vcmp.lt.s32.totalorder %v6568_v45, 126 }
  0xa8   :  { %6091 = vmatpush.msk.msrb.mxu0 %vm158_vm0, %v600_v40  ;;  %6093 = vmatpush.msk.msrb.mxu1 %vm158_vm0, %v601_v41 }
  0xa9   :  { %6092 = vmatmul.msk.f32.vlgmr.msrb.gmra.mxu0 %vm154_vm1, %v6082_v20  ;;  %6094 = vmatmul.msk.f32.vlgmr.msrb.gmra.mxu1 %vm154_vm1, %v6082_v20 }
 0x106   :  { %v399_v54 = vpop.f32.mrf.mxu1 }
 0x107   :  { %v400_v60 = vadd.f32 %v399_v54, %v212_v42  ;;  %v821_v54 = vld [vmem:[%s8737_s3] sm:$0xff] }
 0x10c   :  { %v419_v55 = vpop.f32.mrf.mxu2 }
 0x10d   :  { %v439_v56 = vpop.f32.mrf.mxu3  ;;  %v420_v6 = vadd.f32 %v419_v55, %v232_v47 }
 0x10e   :  { %v379_v57 = vpop.f32.mrf.mxu0  ;;  %v479_v58 = vpop.f32.mrf.mxu1  ;;  %v440_v8 = vadd.f32 %v439_v56, %v252_v48 }
 0x10f   :  { %v380_v9 = vadd.f32 %v379_v57, %v192_v49  ;;  %v480_v30 = vadd.f32 %v479_v58, %v292_v50 }
 0x115   :  { %v499_v59 = vpop.f32.mrf.mxu2 }
 0x116   :  { %v519_v61 = vpop.f32.mrf.mxu3  ;;  %v459_v62 = vpop.f32.mrf.mxu0  ;;  %v500_v24 = vadd.f32 %v499_v59, %v312_v51  ;;  %v6099_v51 = vld [vmem:[%s8737_s3 + $0x8] sm:$0xff] }
 0x117   :  { %v668_v2 = vpop.f32.mrf.mxu1  ;;  %v520_v26 = vadd.f32 %v519_v61, %v332_v52  ;;  %v460_v27 = vadd.f32 %v459_v62, %v272_v53 }
 0x118   :  { %v792_v4 = vadd.f32 %v668_v2, %v400_v60  ;;  %v6141_v2 = vld [vmem:[%s8738_s4 + $0x8] sm:$0xff] }
 0x11a   :  { %v806_v5 = vadd.f32 %v803_v3, %v792_v4 }
 0x11c   :  { %v6683_v7 = vmax.f32 %v806_v5, 0.0 }
 0x11d   :  { %v688_v10 = vpop.f32.mrf.mxu2 }
 0x11e   :  { %v793_v11 = vadd.f32 %v688_v10, %v420_v6  ;;  %v708_v12 = vpop.f32.mrf.mxu3  ;;  %824 = vrot.lane.b32.xlu2 %v6683_v7, %s6422_s2  ;;  %920 = vmatpush.msra.mxu1 %v6683_v7  ;;  %v648_v13 = vpop.f32.mrf.mxu0 }
 0x11f   :  { %v794_v14 = vadd.f32 %v708_v12, %v440_v8  ;;  %v791_v15 = vadd.f32 %v648_v13, %v380_v9  ;;  %6101 = vmatmul.msk.f32.vlgmr.msra.gmra.mxu1 %vm881_vm5, %v6099_v51 }
 0x120   :  { %v807_v16 = vadd.f32 %v803_v3, %v793_v11 }
 0x121   :  { %v808_v17 = vadd.f32 %v803_v3, %v794_v14  ;;  %v805_v18 = vadd.f32 %v803_v3, %v791_v15  ;;  %v6124_v15 = vld [vmem:[%s8737_s3 + $0x10] sm:$0xff] }
 0x122   :  { %v6688_v19 = vmax.f32 %v807_v16, 0.0 }
 0x123   :  { %v6690_v20 = vmax.f32 %v808_v17, 0.0  ;;  %v6692_v23 = vmax.f32 %v805_v18, 0.0 }
 0x124   :  { %940 = vmatpush.msra.mxu2 %v6688_v19  ;;  %826 = vrot.lane.b32.xlu0 %v6688_v19, %s6422_s2 }
 0x125   :  { %828 = vrot.lane.b32.xlu1 %v6690_v20, %s6422_s2  ;;  %960 = vmatpush.msra.mxu3 %v6690_v20  ;;  %v768_v29 = vpop.f32.mrf.mxu2 }
 0x126   :  { %v797_v31 = vadd.f32 %v768_v29, %v500_v24  ;;  %v788_v32 = vpop.f32.mrf.mxu3  ;;  %822 = vrot.lane.b32.xlu2 %v6692_v23, %s6422_s2  ;;  %900 = vmatpush.msra.mxu0 %v6692_v23  ;;  %v728_v33 = vpop.f32.mrf.mxu0 }
 0x127   :  { %v798_v34 = vadd.f32 %v788_v32, %v520_v26  ;;  %v795_v36 = vadd.f32 %v728_v33, %v460_v27  ;;  %v748_v37 = vpop.f32.mrf.mxu1  ;;  %6103 = vmatmul.msk.f32.vlgmr.msra.gmra.mxu3 %vm881_vm5, %v6099_v51  ;;  %6100 = vmatmul.msk.f32.vlgmr.msra.gmra.mxu0 %vm881_vm5, %v6099_v51 }
 0x128   :  { %v811_v38 = vadd.f32 %v803_v3, %v797_v31  ;;  %v796_v39 = vadd.f32 %v748_v37, %v480_v30  ;;  %6102 = vmatmul.msk.f32.vlgmr.msra.gmra.mxu2 %vm881_vm5, %v6099_v51 }
 0x129   :  { %v812_v40 = vadd.f32 %v803_v3, %v798_v34  ;;  %v809_v41 = vadd.f32 %v803_v3, %v795_v36 }
 0x12a   :  { %v6703_v42 = vmax.f32 %v811_v38, 0.0  ;;  %v810_v47 = vadd.f32 %v803_v3, %v796_v39 }
 0x12b   :  { %v6705_v48 = vmax.f32 %v812_v40, 0.0  ;;  %v6707_v49 = vmax.f32 %v809_v41, 0.0 }
 0x12c   :  { %v6709_v50 = vmax.f32 %v810_v47, 0.0  ;;  %1020 = vmatpush.msrb.mxu2 %v6703_v42 }
 0x12d   :  { %1214 = vrot.lane.b32.xlu1 %v6688_v19, %s6423_s25  ;;  %1040 = vmatpush.msrb.mxu3 %v6705_v48 }
 0x12e   :  { %832 = vrot.lane.b32.xlu0 %v6709_v50, %s6422_s2  ;;  %1000 = vmatpush.msrb.mxu1 %v6709_v50 }
 0x12f   :  { %836 = vrot.lane.b32.xlu2 %v6705_v48, %s6422_s2  ;;  %980 = vmatpush.msrb.mxu0 %v6707_v49 }
 0x130   :  { %6105 = vmatmul.msk.f32.vlgmr.msrb.gmra.mxu1 %vm881_vm5, %v6099_v51  ;;  %6107 = vmatmul.msk.f32.vlgmr.msrb.gmra.mxu3 %vm881_vm5, %v6099_v51 }
 0x131   :  { %6106 = vmatmul.msk.f32.vlgmr.msrb.gmra.mxu2 %vm881_vm5, %v6099_v51  ;;  %6104 = vmatmul.msk.f32.vlgmr.msrb.gmra.mxu0 %vm881_vm5, %v6099_v51 }
 0x135   :  { %834 = vrot.lane.b32.xlu1 %v6703_v42, %s6422_s2 }
 0x136   :  { %830 = vrot.lane.b32.xlu0 %v6707_v49, %s6422_s2 }
 0x137   :  { %1216 = vrot.lane.b32.xlu2 %v6690_v20, %s6423_s25 }
 0x13d   :  { %1212 = vrot.lane.b32.xlu1 %v6683_v7, %s6423_s25 }
 0x13e   :  { %1218 = vrot.lane.b32.xlu0 %v6707_v49, %s6423_s25 }
 0x13f   :  { %1210 = vrot.lane.b32.xlu2 %v6692_v23, %s6423_s25 }
 0x145   :  { %1224 = vrot.lane.b32.xlu1 %v6705_v48, %s6423_s25 }
 0x146   :  { %1222 = vrot.lane.b32.xlu0 %v6703_v42, %s6423_s25 }
 0x147   :  { %1220 = vrot.lane.b32.xlu2 %v6709_v50, %s6423_s25 }
 0x14e   :  { %1442 = vperm.xlu0 %6389, %v6141_v2  }
 0x178   :  { %v825_v52 = vpop.permute.xlu2 %824 }
 0x180   :  { %v823_v53 = vpop.permute.xlu2 %822 }
 0x181   :  { %v845_v55 = vsel %vm838_vm6, %v823_v53, %v825_v52 }
 0x182   :  { %6110 = vmatpush.msk.msra.mxu1 %vm848_vm8, %v845_v55  ;;  %vm1239_vm8 = vcmp.lt.s32.totalorder %v6606_v1, 126 }
 0x183   :  { %6111 = vmatmul.msk.f32.vlgmr.msra.gmra.mxu1 %vm881_vm5, %v821_v54 }
 0x189   :  { %v837_v56 = vpop.permute.xlu2 %836 }
 0x18a   :  { %v846_v57 = vsel %vm838_vm6, %v837_v56, %v823_v53 }
 0x18b   :  { %6108 = vmatpush.msk.msra.mxu0 %vm847_vm9, %v846_v57  ;;  %vm1242_vm9 = vcmp.lt.s32.totalorder %v6604_v0, 126 }
 0x18c   :  { %6109 = vmatmul.msk.f32.vlgmr.msra.gmra.mxu0 %vm881_vm5, %v821_v54 }
 0x191   :  { %v1217_v62 = vpop.permute.xlu2 %1216 }
 0x196   :  { %v827_v58 = vpop.permute.xlu0 %826 }
 0x197   :  { %v829_v59 = vpop.permute.xlu1 %828  ;;  %v844_v60 = vsel %vm838_vm6, %v825_v52, %v827_v58 }
 0x198   :  { %v843_v61 = vsel %vm838_vm6, %v827_v58, %v829_v59  ;;  %6112 = vmatpush.msk.msra.mxu2 %vm849_vm10, %v844_v60  ;;  %vm1240_vm10 = vcmp.lt.s32.totalorder %v6600_v63, 126 }
 0x199   :  { %6114 = vmatpush.msk.msra.mxu3 %vm850_vm11, %v843_v61  ;;  %6113 = vmatmul.msk.f32.vlgmr.msra.gmra.mxu2 %vm881_vm5, %v821_v54  ;;  %v1211_v5 = vpop.permute.xlu2 %1210  ;;  %vm1241_vm11 = vcmp.lt.s32.totalorder %v6564_v43, 126 }
 0x19a   :  { %6115 = vmatmul.msk.f32.vlgmr.msra.gmra.mxu3 %vm881_vm5, %v821_v54 }
 0x19c   :  { %v922_v36 = vpop.f32.mrf.mxu1 }
 0x19f   :  { %v1215_v3 = vpop.permute.xlu1 %1214 }
 0x1a0   :  { %v833_v4 = vpop.permute.xlu0 %832  ;;  %v1231_v13 = vsel %vm1226_vm14, %v1215_v3, %v1217_v62 }
 0x1a1   :  { %v1221_v16 = vpop.permute.xlu2 %1220 }
 0x1a4   :  { %v902_v34 = vpop.f32.mrf.mxu0 }
 0x1a7   :  { %v835_v6 = vpop.permute.xlu1 %834 }
 0x1a8   :  { %v839_v8 = vsel %vm838_vm6, %v835_v6, %v837_v56  ;;  %v840_v9 = vsel %vm838_vm6, %v833_v4, %v835_v6  ;;  %v831_v10 = vpop.permute.xlu0 %830 }
 0x1a9   :  { %6120 = vmatpush.msk.msrb.mxu2 %vm853_vm12, %v840_v9  ;;  %v841_v11 = vsel %vm838_vm6, %v831_v10, %v833_v4  ;;  %v842_v12 = vsel %vm838_vm6, %v829_v59, %v831_v10  ;;  %6122 = vmatpush.msk.msrb.mxu3 %vm854_vm13, %v839_v8  ;;  %vm1238_vm6 = vcmp.lt.s32.totalorder %v6570_v46, 126  ;;  %vm1487_vm12 = vcmp.lt.s32.totalorder %v6558_v35, 4 }
 0x1aa   :  { %6121 = vmatmul.msk.f32.vlgmr.msrb.gmra.mxu2 %vm881_vm5, %v821_v54  ;;  %6123 = vmatmul.msk.f32.vlgmr.msrb.gmra.mxu3 %vm881_vm5, %v821_v54  ;;  %v962_v38 = vpop.f32.mrf.mxu3  ;;  %vm1497_vm13 = vcmp.ge.s32.totalorder %v6568_v45, 4 }
 0x1ab   :  { %6129 = vmatpush.msk.msra.mxu2 %vm1237_vm15, %v1231_v13  ;;  %6116 = vmatpush.msk.msrb.mxu0 %vm851_vm2, %v842_v12  ;;  %v942_v37 = vpop.f32.mrf.mxu2  ;;  %vm1498_vm15 = vcmp.ge.s32.totalorder %v6566_v44, 4  ;;  %vm1499_vm2 = vcmp.ge.s32.totalorder %v6570_v46, 4 }
 0x1ac   :  { %6118 = vmatpush.msk.msrb.mxu1 %vm852_vm3, %v841_v11  ;;  %6117 = vmatmul.msk.f32.vlgmr.msrb.gmra.mxu0 %vm881_vm5, %v821_v54  ;;  %vm1502_vm3 = vcmp.ge.s32.totalorder %v6564_v43, 4 }
 0x1ad   :  { %6119 = vmatmul.msk.f32.vlgmr.msrb.gmra.mxu1 %vm881_vm5, %v821_v54  ;;  %v1002_v40 = vpop.f32.mrf.mxu1 }
 0x1ae   :  { %v982_v39 = vpop.f32.mrf.mxu0 }
 0x1af   :  { %v1213_v14 = vpop.permute.xlu1 %1212 }
 0x1b0   :  { %v1232_v17 = vsel %vm1226_vm14, %v1213_v14, %v1215_v3  ;;  %v1233_v18 = vsel %vm1226_vm14, %v1211_v5, %v1213_v14  ;;  %v1219_v24 = vpop.permute.xlu0 %1218 }
 0x1b1   :  { %v1229_v26 = vsel %vm1226_vm14, %v1219_v24, %v1221_v16  ;;  %v1230_v27 = vsel %vm1226_vm14, %v1217_v62, %v1219_v24  ;;  %6125 = vmatpush.msk.msra.mxu0 %vm1226_vm14, %v1233_v18  ;;  %6127 = vmatpush.msk.msra.mxu1 %vm1236_vm4, %v1232_v17  ;;  %vm1496_vm4 = vcmp.ge.s32.totalorder %v6558_v35, 4 }
 0x1b2   :  { %6130 = vmatmul.msk.f32.vlgmr.msra.gmra.mxu2 %vm881_vm5, %v6124_v15  ;;  %6131 = vmatpush.msk.msra.mxu3 %vm1238_vm6, %v1230_v27  ;;  %vm1503_vm6 = vcmp.ge.s32.totalorder %v6604_v0, 4 }
 0x1b3   :  { %6133 = vmatpush.msk.msrb.mxu0 %vm1239_vm8, %v1229_v26  ;;  %6132 = vmatmul.msk.f32.vlgmr.msra.gmra.mxu3 %vm881_vm5, %v6124_v15  ;;  %v1042_v47 = vpop.f32.mrf.mxu3  ;;  %vm1501_vm8 = vcmp.ge.s32.totalorder %v6600_v63, 4 }
 0x1b4   :  { %6126 = vmatmul.msk.f32.vlgmr.msra.gmra.mxu0 %vm881_vm5, %v6124_v15  ;;  %v1022_v41 = vpop.f32.mrf.mxu2 }
 0x1b5   :  { %6128 = vmatmul.msk.f32.vlgmr.msra.gmra.mxu1 %vm881_vm5, %v6124_v15 }
 0x1b7   :  { %v1225_v29 = vpop.permute.xlu1 %1224 }
 0x1b8   :  { %v1234_v30 = vsel %vm1226_vm14, %v1225_v29, %v1211_v5  ;;  %v1223_v31 = vpop.permute.xlu0 %1222 }
 0x1b9   :  { %v1227_v32 = vsel %vm1226_vm14, %v1223_v31, %v1225_v29  ;;  %v1228_v33 = vsel %vm1226_vm14, %v1221_v16, %v1223_v31  ;;  %6139 = vmatpush.msk.msrb.mxu3 %vm1242_vm9, %v1234_v30  ;;  %vm1500_vm9 = vcmp.ge.s32.totalorder %v6606_v1, 4 }
 0x1ba   :  { %6135 = vmatpush.msk.msrb.mxu1 %vm1240_vm10, %v1228_v33  ;;  %6137 = vmatpush.msk.msrb.mxu2 %vm1241_vm11, %v1227_v32  ;;  %vm1874_vm10 = vcmp.lt.s32.totalorder %v6558_v35, 124  ;;  %vm1885_vm11 = vcmp.lt.s32.totalorder %v6566_v44, 124 }
 0x1bb   :  { %6138 = vmatmul.msk.f32.vlgmr.msrb.gmra.mxu2 %vm881_vm5, %v6124_v15  ;;  %6140 = vmatmul.msk.f32.vlgmr.msrb.gmra.mxu3 %vm881_vm5, %v6124_v15 }
 0x1bc   :  { %6134 = vmatmul.msk.f32.vlgmr.msrb.gmra.mxu0 %vm881_vm5, %v6124_v15 }
 0x1bd   :  { %6136 = vmatmul.msk.f32.vlgmr.msrb.gmra.mxu1 %vm881_vm5, %v6124_v15 }
 0x1c0   :  { %v1443_v62 = vpop.permute.xlu0 %1442 }
 0x200   :  { %v1085_v52 = vpop.f32.mrf.mxu1 }
 0x201   :  { %v1086_v60 = vadd.f32 %v1085_v52, %v922_v36 }
 0x209   :  { %v1065_v51 = vpop.f32.mrf.mxu0 }
 0x20a   :  { %v1066_v59 = vadd.f32 %v1065_v51, %v902_v34 }
 0x21c   :  { %v1105_v53 = vpop.f32.mrf.mxu2 }
 0x21d   :  { %v1125_v54 = vpop.f32.mrf.mxu3  ;;  %v1106_v5 = vadd.f32 %v1105_v53, %v942_v37 }
 0x21e   :  { %v1126_v8 = vadd.f32 %v1125_v54, %v962_v38 }
 0x229   :  { %v1145_v55 = vpop.f32.mrf.mxu0 }
 0x22a   :  { %v1165_v56 = vpop.f32.mrf.mxu1  ;;  %v1146_v16 = vadd.f32 %v1145_v55, %v982_v39 }
 0x22b   :  { %v1166_v24 = vadd.f32 %v1165_v56, %v1002_v40 }
 0x22d   :  { %v1185_v57 = vpop.f32.mrf.mxu2  ;;  %v1205_v58 = vpop.f32.mrf.mxu3 }
 0x22e   :  { %v1186_v37 = vadd.f32 %v1185_v57, %v1022_v41 }
 0x231   :  { %v1287_v61 = vpop.f32.mrf.mxu0 }
 0x232   :  { %v1430_v2 = vadd.f32 %v1287_v61, %v1066_v59  ;;  %v1307_v3 = vpop.f32.mrf.mxu1 }
 0x233   :  { %v1431_v4 = vadd.f32 %v1307_v3, %v1086_v60 }
 0x234   :  { %v1445_v6 = vadd.f32 %v1443_v62, %v1430_v2 }
 0x235   :  { %v1327_v9 = vpop.f32.mrf.mxu2  ;;  %v1446_v10 = vadd.f32 %v1443_v62, %v1431_v4 }
 0x236   :  { %v1432_v11 = vadd.f32 %v1327_v9, %v1106_v5  ;;  %v1347_v12 = vpop.f32.mrf.mxu3  ;;  %v1453_v13 = vmax.f32 %v1445_v6, 0.0 }
 0x237   :  { %v1433_v14 = vadd.f32 %v1347_v12, %v1126_v8  ;;  %v1454_v15 = vmax.f32 %v1446_v10, 0.0 }
 0x238   :  { %v1447_v17 = vadd.f32 %v1443_v62, %v1432_v11  ;;  %v6827_v18 = vadd.f32 %v1453_v13, %v6692_v23 }
 0x239   :  { %v1448_v26 = vadd.f32 %v1443_v62, %v1433_v14  ;;  %v1367_v27 = vpop.f32.mrf.mxu0  ;;  %v6830_v29 = vadd.f32 %v1454_v15, %v6683_v7  ;;  %v1206_v7 = vadd.f32 %v1205_v58, %v1042_v47 }
 0x23a   :  { %v1455_v30 = vmax.f32 %v1447_v17, 0.0  ;;  %v1434_v31 = vadd.f32 %v1367_v27, %v1146_v16  ;;  %v1387_v32 = vpop.f32.mrf.mxu1  ;;  %1548 = vmatpush.msra.mxu0 %v6827_v18 }
 0x23b   :  { %v1456_v33 = vmax.f32 %v1448_v26, 0.0  ;;  %v1435_v34 = vadd.f32 %v1387_v32, %v1166_v24  ;;  %1473 = vrot.lane.b32.xlu1 %v6830_v29, %s6424_s10  ;;  %1568 = vmatpush.msra.mxu1 %v6830_v29  ;;  %v6168_v24 = vld [vmem:[%s8737_s3 + $0x28] sm:$0xff] }
 0x23c   :  { %v6837_v23 = vadd.f32 %v1455_v30, %v6688_v19  ;;  %v1449_v36 = vadd.f32 %v1443_v62, %v1434_v31 }
 0x23d   :  { %v6840_v38 = vadd.f32 %v1456_v33, %v6690_v20  ;;  %v1450_v39 = vadd.f32 %v1443_v62, %v1435_v34 }
 0x23e   :  { %v1457_v40 = vmax.f32 %v1449_v36, 0.0  ;;  %1862 = vrot.lane.b32.xlu0 %v6837_v23, %s6425_s11  ;;  %1588 = vmatpush.msra.mxu2 %v6837_v23  ;;  %v1407_v51 = vpop.f32.mrf.mxu2  ;;  %v1427_v52 = vpop.f32.mrf.mxu3 }
 0x23f   :  { %v1458_v53 = vmax.f32 %v1450_v39, 0.0  ;;  %v1436_v54 = vadd.f32 %v1407_v51, %v1186_v37  ;;  %v1437_v19 = vadd.f32 %v1427_v52, %v1206_v7  ;;  %1608 = vmatpush.msra.mxu3 %v6840_v38 }
 0x240   :  { %v6847_v41 = vadd.f32 %v1457_v40, %v6707_v49 }
 0x241   :  { %v6850_v20 = vadd.f32 %v1458_v53, %v6709_v50  ;;  %v1451_v47 = vadd.f32 %v1443_v62, %v1436_v54  ;;  %v1452_v55 = vadd.f32 %v1443_v62, %v1437_v19  ;;  %v6142_v62 = vld [vmem:[%s8737_s3 + $0x18] sm:$0xff] }
 0x242   :  { %1628 = vmatpush.msrb.mxu0 %v6847_v41 }
 0x243   :  { %v1459_v56 = vmax.f32 %v1451_v47, 0.0  ;;  %v1460_v57 = vmax.f32 %v1452_v55, 0.0  ;;  %1477 = vrot.lane.b32.xlu1 %v6840_v38, %s6424_s10  ;;  %1481 = vrot.lane.b32.xlu2 %v6850_v20, %s6424_s10 }
 0x244   :  { %1648 = vmatpush.msrb.mxu1 %v6850_v20 }
 0x245   :  { %v6859_v49 = vadd.f32 %v1459_v56, %v6703_v42  ;;  %v6862_v50 = vadd.f32 %v1460_v57, %v6705_v48  ;;  %v6185_v42 = vld [vmem:[%s8738_s4 + $0x10] sm:$0xff]  ;;  %v6143_v48 = vld [vmem:[%s8737_s3 + $0x20] sm:$0xff]  ;;  %s6429_s3 = smov 120   ;;  %s6445_s4 = smov 100  }
 0x246   :  { %6146 = vmatmul.msk.f32.vlgmr.msra.gmra.mxu2 %vm881_vm5, %v6143_v48  ;;  %6147 = vmatmul.msk.f32.vlgmr.msra.gmra.mxu3 %vm881_vm5, %v6143_v48 }
 0x247   :  { %1483 = vrot.lane.b32.xlu0 %v6859_v49, %s6424_s10  ;;  %1668 = vmatpush.msrb.mxu2 %v6859_v49 }
 0x248   :  { %1688 = vmatpush.msrb.mxu3 %v6862_v50  ;;  %6145 = vmatmul.msk.f32.vlgmr.msra.gmra.mxu1 %vm881_vm5, %v6143_v48 }
 0x249   :  { %6144 = vmatmul.msk.f32.vlgmr.msra.gmra.mxu0 %vm881_vm5, %v6143_v48 }
 0x24b   :  { %1485 = vrot.lane.b32.xlu1 %v6862_v50, %s6424_s10  ;;  %1475 = vrot.lane.b32.xlu2 %v6837_v23, %s6424_s10 }
 0x24e   :  { %6150 = vmatmul.msk.f32.vlgmr.msrb.gmra.mxu2 %vm881_vm5, %v6143_v48  ;;  %6151 = vmatmul.msk.f32.vlgmr.msrb.gmra.mxu3 %vm881_vm5, %v6143_v48 }
 0x24f   :  { %1479 = vrot.lane.b32.xlu0 %v6847_v41, %s6424_s10 }
 0x250   :  { %6149 = vmatmul.msk.f32.vlgmr.msrb.gmra.mxu1 %vm881_vm5, %v6143_v48 }
 0x251   :  { %6148 = vmatmul.msk.f32.vlgmr.msrb.gmra.mxu0 %vm881_vm5, %v6143_v48 }
 0x253   :  { %1864 = vrot.lane.b32.xlu1 %v6840_v38, %s6425_s11  ;;  %1471 = vrot.lane.b32.xlu2 %v6827_v18, %s6424_s10  ;;  %s6426_s10 = smov 123  }
 0x257   :  { %1872 = vrot.lane.b32.xlu0 %v6862_v50, %s6425_s11 }
 0x25b   :  { %1858 = vrot.lane.b32.xlu1 %v6827_v18, %s6425_s11  ;;  %1866 = vrot.lane.b32.xlu2 %v6847_v41, %s6425_s11 }
 0x25f   :  { %2090 = vperm.xlu0 %6389, %v6185_v42  }
 0x263   :  { %1860 = vrot.lane.b32.xlu1 %v6830_v29, %s6425_s11  ;;  %1870 = vrot.lane.b32.xlu2 %v6859_v49, %s6425_s11 }
 0x26b   :  { %1868 = vrot.lane.b32.xlu2 %v6850_v20, %s6425_s11 }
 0x29d   :  { %v1482_v58 = vpop.permute.xlu2 %1481 }
 0x2a5   :  { %v1476_v59 = vpop.permute.xlu2 %1475 }
 0x2ad   :  { %v1474_v60 = vpop.permute.xlu1 %1473  ;;  %v1472_v61 = vpop.permute.xlu2 %1471 }
 0x2ae   :  { %v1493_v2 = vsel %vm1487_vm12, %v1474_v60, %v1476_v59  ;;  %v1494_v3 = vsel %vm1487_vm12, %v1472_v61, %v1474_v60 }
 0x2af   :  { %6154 = vmatpush.msk.msra.mxu1 %vm1497_vm13, %v1494_v3  ;;  %6156 = vmatpush.msk.msra.mxu2 %vm1498_vm15, %v1493_v2  ;;  %vm1886_vm13 = vcmp.lt.s32.totalorder %v6570_v46, 124  ;;  %vm1890_vm15 = vcmp.lt.s32.totalorder %v6604_v0, 124 }
 0x2b0   :  { %6157 = vmatmul.msk.f32.vlgmr.msra.gmra.mxu2 %vm881_vm5, %v6142_v62  ;;  %6155 = vmatmul.msk.f32.vlgmr.msra.gmra.mxu1 %vm881_vm5, %v6142_v62  ;;  %v1863_v4 = vpop.permute.xlu0 %1862 }
 0x2b5   :  { %v1478_v5 = vpop.permute.xlu1 %1477  ;;  %v1867_v13 = vpop.permute.xlu2 %1866 }
 0x2b6   :  { %v1492_v6 = vsel %vm1487_vm12, %v1476_v59, %v1478_v5 }
 0x2b7   :  { %6158 = vmatpush.msk.msra.mxu3 %vm1499_vm2, %v1492_v6  ;;  %vm1884_vm2 = vcmp.lt.s32.totalorder %v6568_v45, 124 }
 0x2b8   :  { %6159 = vmatmul.msk.f32.vlgmr.msra.gmra.mxu3 %vm881_vm5, %v6142_v62 }
 0x2b9   :  { %v1484_v8 = vpop.permute.xlu0 %1483 }
 0x2ba   :  { %v1489_v9 = vsel %vm1487_vm12, %v1482_v58, %v1484_v8 }
 0x2bb   :  { %6164 = vmatpush.msk.msrb.mxu2 %vm1502_vm3, %v1489_v9  ;;  %vm1887_vm3 = vcmp.lt.s32.totalorder %v6606_v1, 124 }
 0x2bc   :  { %6165 = vmatmul.msk.f32.vlgmr.msrb.gmra.mxu2 %vm881_vm5, %v6142_v62 }
 0x2bd   :  { %v1486_v10 = vpop.permute.xlu1 %1485  ;;  %v1871_v30 = vpop.permute.xlu2 %1870 }
 0x2be   :  { %v1488_v11 = vsel %vm1487_vm12, %v1484_v8, %v1486_v10  ;;  %v1495_v12 = vsel %vm1487_vm12, %v1486_v10, %v1472_v61 }
 0x2bf   :  { %6152 = vmatpush.msk.msra.mxu0 %vm1496_vm4, %v1495_v12  ;;  %6166 = vmatpush.msk.msrb.mxu3 %vm1503_vm6, %v1488_v11  ;;  %vm1888_vm4 = vcmp.lt.s32.totalorder %v6600_v63, 124  ;;  %vm2298_vm6 = vcmp.lt.s32.totalorder %v6558_v35, 121 }
 0x2c0   :  { %6153 = vmatmul.msk.f32.vlgmr.msra.gmra.mxu0 %vm881_vm5, %v6142_v62  ;;  %6167 = vmatmul.msk.f32.vlgmr.msrb.gmra.mxu3 %vm881_vm5, %v6142_v62 }
 0x2c1   :  { %v1480_v14 = vpop.permute.xlu0 %1479 }
 0x2c2   :  { %v1490_v15 = vsel %vm1487_vm12, %v1480_v14, %v1482_v58  ;;  %v1491_v16 = vsel %vm1487_vm12, %v1478_v5, %v1480_v14  ;;  %vm1889_vm12 = vcmp.lt.s32.totalorder %v6564_v43, 124 }
 0x2c3   :  { %6162 = vmatpush.msk.msrb.mxu1 %vm1501_vm8, %v1490_v15  ;;  %6160 = vmatpush.msk.msrb.mxu0 %vm1500_vm9, %v1491_v16  ;;  %vm2884_vm8 = vcmp.lt.s32.totalorder %v6558_v35, 118  ;;  %vm3280_vm9 = vcmp.lt.s32.totalorder %v6558_v35, 116 }
 0x2c4   :  { %6163 = vmatmul.msk.f32.vlgmr.msrb.gmra.mxu1 %vm881_vm5, %v6142_v62 }
 0x2c5   :  { %v1865_v17 = vpop.permute.xlu1 %1864  ;;  %v1869_v36 = vpop.permute.xlu2 %1868 }
 0x2c6   :  { %v1878_v26 = vsel %vm1874_vm10, %v1865_v17, %v1867_v13  ;;  %v1879_v27 = vsel %vm1874_vm10, %v1863_v4, %v1865_v17  ;;  %v1876_v40 = vsel %vm1874_vm10, %v1869_v36, %v1871_v30  ;;  %v1877_v51 = vsel %vm1874_vm10, %v1867_v13, %v1869_v36  ;;  %v1570_v54 = vpop.f32.mrf.mxu1  ;;  %v1550_v19 = vpop.f32.mrf.mxu0  ;;  %v6983_v17 = vld [vmem:[%s8739_s5] sm:$0xf] }
 0x2c7   :  { %6173 = vmatpush.msk.msra.mxu2 %vm1885_vm11, %v1879_v27  ;;  %6175 = vmatpush.msk.msra.mxu3 %vm1886_vm13, %v1878_v26  ;;  %vm3082_vm11 = vcmp.lt.s32.totalorder %v6558_v35, 117  ;;  %vm3478_vm13 = vcmp.lt.s32.totalorder %v6558_v35, 115 }
 0x2c8   :  { %6161 = vmatmul.msk.f32.vlgmr.msrb.gmra.mxu0 %vm881_vm5, %v6142_v62  ;;  %6174 = vmatmul.msk.f32.vlgmr.msra.gmra.mxu2 %vm881_vm5, %v6168_v24 }
 0x2c9   :  { %6176 = vmatmul.msk.f32.vlgmr.msra.gmra.mxu3 %vm881_vm5, %v6168_v24  ;;  %v1873_v31 = vpop.permute.xlu0 %1872  ;;  %v1590_v52 = vpop.f32.mrf.mxu2 }
 0x2ca   :  { %v1875_v32 = vsel %vm1874_vm10, %v1871_v30, %v1873_v31  ;;  %v1610_v53 = vpop.f32.mrf.mxu3 }
 0x2cb   :  { %6181 = vmatpush.msk.msrb.mxu2 %vm1889_vm12, %v1875_v32  ;;  %vm3676_vm12 = vcmp.lt.s32.totalorder %v6558_v35, 114 }
 0x2cd   :  { %v1859_v33 = vpop.permute.xlu1 %1858 }
 0x2ce   :  { %v1882_v34 = vsel %vm1874_vm10, %v1873_v31, %v1859_v33  ;;  %v1650_v56 = vpop.f32.mrf.mxu1  ;;  %v1630_v57 = vpop.f32.mrf.mxu0 }
 0x2cf   :  { %6183 = vmatpush.msk.msrb.mxu3 %vm1890_vm15, %v1882_v34  ;;  %vm5465_vm15 = vcmp.ge.s32.totalorder %v6566_v44, 7 }
 0x2d0   :  { %6182 = vmatmul.msk.f32.vlgmr.msrb.gmra.mxu2 %vm881_vm5, %v6168_v24 }
 0x2d1   :  { %6184 = vmatmul.msk.f32.vlgmr.msrb.gmra.mxu3 %vm881_vm5, %v6168_v24  ;;  %v1670_v47 = vpop.f32.mrf.mxu2 }
 0x2d2   :  { %v1690_v55 = vpop.f32.mrf.mxu3 }
 0x2d5   :  { %v1861_v37 = vpop.permute.xlu1 %1860 }
 0x2d6   :  { %v1880_v7 = vsel %vm1874_vm10, %v1861_v37, %v1863_v4  ;;  %v1881_v39 = vsel %vm1874_vm10, %v1859_v33, %v1861_v37  ;;  %v2091_v4 = vpop.permute.xlu0 %2090 }
 0x2d7   :  { %6169 = vmatpush.msk.msra.mxu0 %vm1874_vm10, %v1881_v39  ;;  %6171 = vmatpush.msk.msra.mxu1 %vm1884_vm2, %v1880_v7  ;;  %vm5473_vm2 = vcmp.lt.s32.totalorder %v6566_v44, 121 }
 0x2d8   :  { %6170 = vmatmul.msk.f32.vlgmr.msra.gmra.mxu0 %vm881_vm5, %v6168_v24  ;;  %6172 = vmatmul.msk.f32.vlgmr.msra.gmra.mxu1 %vm881_vm5, %v6168_v24 }
 0x2d9   :  { %6177 = vmatpush.msk.msrb.mxu0 %vm1887_vm3, %v1877_v51  ;;  %6179 = vmatpush.msk.msrb.mxu1 %vm1888_vm4, %v1876_v40  ;;  %vm5481_vm3 = vmand %vm5465_vm15, %vm5473_vm2  ;;  %vm5463_vm4 = vcmp.ge.s32.totalorder %v6558_v35, 7  ;;  %vm5467_vm15 = vcmp.ge.s32.totalorder %v6606_v1, 7  ;;  %vm5475_vm2 = vcmp.lt.s32.totalorder %v6606_v1, 121 }
 0x2e0   :  { %6178 = vmatmul.msk.f32.vlgmr.msrb.gmra.mxu0 %vm881_vm5, %v6168_v24  ;;  %6180 = vmatmul.msk.f32.vlgmr.msrb.gmra.mxu1 %vm881_vm5, %v6168_v24 }
 0x32d   :  { %v1733_v58 = vpop.f32.mrf.mxu1 }
 0x32e   :  { %v1734_v30 = vadd.f32 %v1733_v58, %v1570_v54 }
 0x333   :  { %v1753_v42 = vpop.f32.mrf.mxu2 }
 0x334   :  { %v1754_v62 = vadd.f32 %v1753_v42, %v1590_v52 }
 0x33b   :  { %v1773_v48 = vpop.f32.mrf.mxu3 }
 0x33c   :  { %v1774_v2 = vadd.f32 %v1773_v48, %v1610_v53 }
 0x33d   :  { %v1713_v59 = vpop.f32.mrf.mxu0 }
 0x33e   :  { %v1714_v31 = vadd.f32 %v1713_v59, %v1550_v19 }
 0x33f   :  { %v1833_v60 = vpop.f32.mrf.mxu2 }
 0x340   :  { %v1834_v15 = vadd.f32 %v1833_v60, %v1670_v47 }
 0x341   :  { %v1813_v8 = vpop.f32.mrf.mxu1 }
 0x342   :  { %v1814_v42 = vadd.f32 %v1813_v8, %v1650_v56  ;;  %v2117_v8 = vld [vmem:[%s8740_s6] sm:$0xf] }
 0x343   :  { %v1853_v61 = vpop.f32.mrf.mxu3  ;;  %5299 = vrot.lane.b32.xlu1 %v2117_v8, %s6426_s10  ;;  %5080 = vrot.lane.b32.xlu2 %v2117_v8, %s6420_s19  ;;  %s6436_s10 = smov 112  }
 0x344   :  { %v1854_v24 = vadd.f32 %v1853_v61, %v1690_v55  ;;  %5511 = vrot.lane.b32.xlu0 %v2117_v8, %s6427_s12 }
 0x345   :  { %v1793_v9 = vpop.f32.mrf.mxu0 }
 0x346   :  { %v1794_v48 = vadd.f32 %v1793_v9, %v1630_v57  ;;  %v6248_v9 = vld [vmem:[%s8739_s5 + $0x1c] sm:$0xf] }
 0x34b   :  { %v1975_v3 = vpop.f32.mrf.mxu2 }
 0x34c   :  { %v2080_v5 = vadd.f32 %v1975_v3, %v1754_v62  ;;  %v1995_v6 = vpop.f32.mrf.mxu3  ;;  %v6194_v62 = vld [vmem:[%s8739_s5 + $0x4] sm:$0xf] }
 0x34d   :  { %v2081_v10 = vadd.f32 %v1995_v6, %v1774_v2  ;;  %v6239_v6 = vld [vmem:[%s8739_s5 + $0x18] sm:$0xf] }
 0x34e   :  { %v2095_v11 = vadd.f32 %v2091_v4, %v2080_v5  ;;  %v6230_v5 = vld [vmem:[%s8739_s5 + $0x14] sm:$0xf] }
 0x34f   :  { %v2096_v12 = vadd.f32 %v2091_v4, %v2081_v10  ;;  %v6257_v10 = vld [vmem:[%s8739_s5 + $0x20] sm:$0xf] }
 0x350   :  { %v2103_v13 = vmax.f32 %v2095_v11, 0.0 }
 0x351   :  { %v2104_v14 = vmax.f32 %v2096_v12, 0.0 }
 0x352   :  { %v6978_v16 = vadd.f32 %v2103_v13, %v6837_v23 }
 0x353   :  { %v6986_v26 = vadd.f32 %v2104_v14, %v6840_v38  ;;  %v2055_v27 = vpop.f32.mrf.mxu2 }
 0x354   :  { %v2084_v32 = vadd.f32 %v2055_v27, %v1834_v15  ;;  %v2075_v33 = vpop.f32.mrf.mxu3  ;;  %2177 = vmatpush.msra.mxu2 %v6978_v16 }
 0x355   :  { %v2085_v34 = vadd.f32 %v2075_v33, %v1854_v24  ;;  %2197 = vmatpush.msra.mxu3 %v6986_v26  ;;  %v1935_v23 = vpop.f32.mrf.mxu0  ;;  %v1955_v36 = vpop.f32.mrf.mxu1  ;;  %6188 = vmatmul.msk.f32.vlgmr.msra.gmra.mxu2 %vm881_vm5, %v6983_v17  ;;  %v6266_v24 = vld [vmem:[%s8739_s5 + $0x24] sm:$0xf] }
 0x356   :  { %v2099_v37 = vadd.f32 %v2091_v4, %v2084_v32  ;;  %v2078_v7 = vadd.f32 %v1935_v23, %v1714_v31  ;;  %v2079_v39 = vadd.f32 %v1955_v36, %v1734_v30  ;;  %6189 = vmatmul.msk.f32.vlgmr.msra.gmra.mxu3 %vm881_vm5, %v6983_v17 }
 0x357   :  { %v2100_v38 = vadd.f32 %v2091_v4, %v2085_v34 }
 0x358   :  { %v2107_v40 = vmax.f32 %v2099_v37, 0.0  ;;  %v2093_v51 = vadd.f32 %v2091_v4, %v2078_v7  ;;  %v2094_v52 = vadd.f32 %v2091_v4, %v2079_v39  ;;  %v6275_v37 = vld [vmem:[%s8739_s5 + $0x28] sm:$0xf] }
 0x359   :  { %v2108_v53 = vmax.f32 %v2100_v38, 0.0 }
 0x35a   :  { %v6995_v54 = vadd.f32 %v2107_v40, %v6859_v49  ;;  %v2101_v19 = vmax.f32 %v2093_v51, 0.0  ;;  %v2102_v47 = vmax.f32 %v2094_v52, 0.0 }
 0x35b   :  { %v6998_v55 = vadd.f32 %v2108_v53, %v6862_v50 }
 0x35c   :  { %v7001_v58 = vadd.f32 %v2101_v19, %v6827_v18  ;;  %v7004_v59 = vadd.f32 %v2102_v47, %v6830_v29  ;;  %2257 = vmatpush.msrb.mxu2 %v6995_v54  ;;  %v6284_v47 = vld [vmem:[%s8739_s5 + $0x2c] sm:$0xf] }
 0x35d   :  { %2277 = vmatpush.msrb.mxu3 %v6998_v55  ;;  %v2015_v60 = vpop.f32.mrf.mxu0  ;;  %v2035_v49 = vpop.f32.mrf.mxu1  ;;  %6192 = vmatmul.msk.f32.vlgmr.msrb.gmra.mxu2 %vm881_vm5, %v6983_v17 }
 0x35e   :  { %v2082_v61 = vadd.f32 %v2015_v60, %v1794_v48  ;;  %v2083_v50 = vadd.f32 %v2035_v49, %v1814_v42  ;;  %6193 = vmatmul.msk.f32.vlgmr.msrb.gmra.mxu3 %vm881_vm5, %v6983_v17  ;;  %2367 = vmatpush.msra.mxu2 %v6978_v16 }
 0x35f   :  { %2387 = vmatpush.msra.mxu3 %v6986_v26  ;;  %2137 = vmatpush.msra.mxu0 %v7001_v58 }
 0x360   :  { %v2097_v18 = vadd.f32 %v2091_v4, %v2082_v61  ;;  %v2098_v29 = vadd.f32 %v2091_v4, %v2083_v50  ;;  %2157 = vmatpush.msra.mxu1 %v7004_v59  ;;  %2447 = vmatpush.msrb.mxu2 %v6995_v54  ;;  %v6221_v4 = vld [vmem:[%s8739_s5 + $0x10] sm:$0xf] }
 0x361   :  { %2467 = vmatpush.msrb.mxu3 %v6998_v55  ;;  %6186 = vmatmul.msk.f32.vlgmr.msra.gmra.mxu0 %vm881_vm5, %v6983_v17 }
 0x362   :  { %v2105_v56 = vmax.f32 %v2097_v18, 0.0  ;;  %v2106_v57 = vmax.f32 %v2098_v29, 0.0  ;;  %6187 = vmatmul.msk.f32.vlgmr.msra.gmra.mxu1 %vm881_vm5, %v6983_v17 }
 0x364   :  { %v7026_v2 = vadd.f32 %v2105_v56, %v6847_v41  ;;  %v7029_v3 = vadd.f32 %v2106_v57, %v6850_v20  ;;  %v6203_v41 = vld [vmem:[%s8739_s5 + $0x8] sm:$0xf]  ;;  %v6212_v20 = vld [vmem:[%s8739_s5 + $0xc] sm:$0xf]  ;;  %v6293_v56 = vld [vmem:[%s8739_s5 + $0x30] sm:$0xf] }
 0x365   :  { %6197 = vmatmul.msk.f32.vlgmr.msra.gmra.mxu2 %vm881_vm5, %v6194_v62 }
 0x366   :  { %6198 = vmatmul.msk.f32.vlgmr.msra.gmra.mxu3 %vm881_vm5, %v6194_v62  ;;  %2565 = vmatpush.msra.mxu2 %v6978_v16 }
 0x367   :  { %2585 = vmatpush.msra.mxu3 %v6986_v26  ;;  %2217 = vmatpush.msrb.mxu0 %v7026_v2 }
 0x368   :  { %2237 = vmatpush.msrb.mxu1 %v7029_v3 }
 0x369   :  { %2327 = vmatpush.msra.mxu0 %v7001_v58 }
 0x36a   :  { %6190 = vmatmul.msk.f32.vlgmr.msrb.gmra.mxu0 %vm881_vm5, %v6983_v17  ;;  %2347 = vmatpush.msra.mxu1 %v7004_v59 }
 0x36b   :  { %6191 = vmatmul.msk.f32.vlgmr.msrb.gmra.mxu1 %vm881_vm5, %v6983_v17  ;;  %2407 = vmatpush.msrb.mxu0 %v7026_v2 }
 0x36c   :  { %2427 = vmatpush.msrb.mxu1 %v7029_v3 }
 0x36d   :  { %6201 = vmatmul.msk.f32.vlgmr.msrb.gmra.mxu2 %vm881_vm5, %v6194_v62 }
 0x36e   :  { %6202 = vmatmul.msk.f32.vlgmr.msrb.gmra.mxu3 %vm881_vm5, %v6194_v62  ;;  %2645 = vmatpush.msrb.mxu2 %v6995_v54 }
 0x36f   :  { %2665 = vmatpush.msrb.mxu3 %v6998_v55 }
 0x372   :  { %6195 = vmatmul.msk.f32.vlgmr.msra.gmra.mxu0 %vm881_vm5, %v6194_v62 }
 0x373   :  { %6196 = vmatmul.msk.f32.vlgmr.msra.gmra.mxu1 %vm881_vm5, %v6194_v62  ;;  %2525 = vmatpush.msra.mxu0 %v7001_v58 }
 0x374   :  { %2545 = vmatpush.msra.mxu1 %v7004_v59 }
 0x375   :  { %6206 = vmatmul.msk.f32.vlgmr.msra.gmra.mxu2 %vm881_vm5, %v6203_v41 }
 0x376   :  { %6207 = vmatmul.msk.f32.vlgmr.msra.gmra.mxu3 %vm881_vm5, %v6203_v41  ;;  %2763 = vmatpush.msra.mxu2 %v6978_v16 }
 0x377   :  { %2783 = vmatpush.msra.mxu3 %v6986_v26 }
 0x37a   :  { %6199 = vmatmul.msk.f32.vlgmr.msrb.gmra.mxu0 %vm881_vm5, %v6194_v62 }
 0x37b   :  { %6200 = vmatmul.msk.f32.vlgmr.msrb.gmra.mxu1 %vm881_vm5, %v6194_v62  ;;  %2605 = vmatpush.msrb.mxu0 %v7026_v2 }
 0x37c   :  { %2625 = vmatpush.msrb.mxu1 %v7029_v3 }
 0x37d   :  { %6210 = vmatmul.msk.f32.vlgmr.msrb.gmra.mxu2 %vm881_vm5, %v6203_v41 }
 0x37e   :  { %6211 = vmatmul.msk.f32.vlgmr.msrb.gmra.mxu3 %vm881_vm5, %v6203_v41  ;;  %2843 = vmatpush.msrb.mxu2 %v6995_v54 }
 0x37f   :  { %2863 = vmatpush.msrb.mxu3 %v6998_v55 }
 0x382   :  { %6204 = vmatmul.msk.f32.vlgmr.msra.gmra.mxu0 %vm881_vm5, %v6203_v41 }
 0x383   :  { %6205 = vmatmul.msk.f32.vlgmr.msra.gmra.mxu1 %vm881_vm5, %v6203_v41  ;;  %2723 = vmatpush.msra.mxu0 %v7001_v58 }
 0x384   :  { %2743 = vmatpush.msra.mxu1 %v7004_v59 }
 0x385   :  { %6215 = vmatmul.msk.f32.vlgmr.msra.gmra.mxu2 %vm881_vm5, %v6212_v20 }
 0x386   :  { %6216 = vmatmul.msk.f32.vlgmr.msra.gmra.mxu3 %vm881_vm5, %v6212_v20  ;;  %2961 = vmatpush.msra.mxu2 %v6978_v16 }
 0x387   :  { %2981 = vmatpush.msra.mxu3 %v6986_v26 }
 0x38a   :  { %6208 = vmatmul.msk.f32.vlgmr.msrb.gmra.mxu0 %vm881_vm5, %v6203_v41 }
 0x38b   :  { %6209 = vmatmul.msk.f32.vlgmr.msrb.gmra.mxu1 %vm881_vm5, %v6203_v41  ;;  %2803 = vmatpush.msrb.mxu0 %v7026_v2 }
 0x38c   :  { %2823 = vmatpush.msrb.mxu1 %v7029_v3 }
 0x38d   :  { %6219 = vmatmul.msk.f32.vlgmr.msrb.gmra.mxu2 %vm881_vm5, %v6212_v20 }
 0x38e   :  { %6220 = vmatmul.msk.f32.vlgmr.msrb.gmra.mxu3 %vm881_vm5, %v6212_v20  ;;  %3041 = vmatpush.msrb.mxu2 %v6995_v54 }
 0x38f   :  { %3061 = vmatpush.msrb.mxu3 %v6998_v55 }
 0x392   :  { %6213 = vmatmul.msk.f32.vlgmr.msra.gmra.mxu0 %vm881_vm5, %v6212_v20 }
 0x393   :  { %6214 = vmatmul.msk.f32.vlgmr.msra.gmra.mxu1 %vm881_vm5, %v6212_v20  ;;  %2921 = vmatpush.msra.mxu0 %v7001_v58 }
 0x394   :  { %2941 = vmatpush.msra.mxu1 %v7004_v59 }
 0x395   :  { %6224 = vmatmul.msk.f32.vlgmr.msra.gmra.mxu2 %vm881_vm5, %v6221_v4 }
 0x396   :  { %6225 = vmatmul.msk.f32.vlgmr.msra.gmra.mxu3 %vm881_vm5, %v6221_v4  ;;  %3159 = vmatpush.msra.mxu2 %v6978_v16 }
 0x397   :  { %3179 = vmatpush.msra.mxu3 %v6986_v26 }
 0x39a   :  { %6217 = vmatmul.msk.f32.vlgmr.msrb.gmra.mxu0 %vm881_vm5, %v6212_v20 }
 0x39b   :  { %6218 = vmatmul.msk.f32.vlgmr.msrb.gmra.mxu1 %vm881_vm5, %v6212_v20  ;;  %3001 = vmatpush.msrb.mxu0 %v7026_v2 }
 0x39c   :  { %3021 = vmatpush.msrb.mxu1 %v7029_v3 }
 0x39d   :  { %6228 = vmatmul.msk.f32.vlgmr.msrb.gmra.mxu2 %vm881_vm5, %v6221_v4 }
 0x39e   :  { %6229 = vmatmul.msk.f32.vlgmr.msrb.gmra.mxu3 %vm881_vm5, %v6221_v4  ;;  %3239 = vmatpush.msrb.mxu2 %v6995_v54 }
 0x39f   :  { %3259 = vmatpush.msrb.mxu3 %v6998_v55 }
 0x3a2   :  { %6222 = vmatmul.msk.f32.vlgmr.msra.gmra.mxu0 %vm881_vm5, %v6221_v4 }
 0x3a3   :  { %6223 = vmatmul.msk.f32.vlgmr.msra.gmra.mxu1 %vm881_vm5, %v6221_v4  ;;  %3119 = vmatpush.msra.mxu0 %v7001_v58 }
 0x3a4   :  { %3139 = vmatpush.msra.mxu1 %v7004_v59 }
 0x3a5   :  { %6233 = vmatmul.msk.f32.vlgmr.msra.gmra.mxu2 %vm881_vm5, %v6230_v5 }
 0x3a6   :  { %6234 = vmatmul.msk.f32.vlgmr.msra.gmra.mxu3 %vm881_vm5, %v6230_v5  ;;  %3357 = vmatpush.msra.mxu2 %v6978_v16 }
 0x3a7   :  { %3377 = vmatpush.msra.mxu3 %v6986_v26 }
 0x3aa   :  { %6226 = vmatmul.msk.f32.vlgmr.msrb.gmra.mxu0 %vm881_vm5, %v6221_v4 }
 0x3ab   :  { %6227 = vmatmul.msk.f32.vlgmr.msrb.gmra.mxu1 %vm881_vm5, %v6221_v4  ;;  %3199 = vmatpush.msrb.mxu0 %v7026_v2 }
 0x3ac   :  { %3219 = vmatpush.msrb.mxu1 %v7029_v3 }
 0x3ad   :  { %6237 = vmatmul.msk.f32.vlgmr.msrb.gmra.mxu2 %vm881_vm5, %v6230_v5 }
 0x3ae   :  { %6238 = vmatmul.msk.f32.vlgmr.msrb.gmra.mxu3 %vm881_vm5, %v6230_v5  ;;  %3437 = vmatpush.msrb.mxu2 %v6995_v54 }
 0x3af   :  { %3457 = vmatpush.msrb.mxu3 %v6998_v55 }
 0x3b2   :  { %6231 = vmatmul.msk.f32.vlgmr.msra.gmra.mxu0 %vm881_vm5, %v6230_v5 }
 0x3b3   :  { %6232 = vmatmul.msk.f32.vlgmr.msra.gmra.mxu1 %vm881_vm5, %v6230_v5  ;;  %3317 = vmatpush.msra.mxu0 %v7001_v58 }
 0x3b4   :  { %3337 = vmatpush.msra.mxu1 %v7004_v59 }
 0x3b5   :  { %6242 = vmatmul.msk.f32.vlgmr.msra.gmra.mxu2 %vm881_vm5, %v6239_v6 }
 0x3b6   :  { %6243 = vmatmul.msk.f32.vlgmr.msra.gmra.mxu3 %vm881_vm5, %v6239_v6  ;;  %3555 = vmatpush.msra.mxu2 %v6978_v16 }
 0x3b7   :  { %3575 = vmatpush.msra.mxu3 %v6986_v26 }
 0x3ba   :  { %6235 = vmatmul.msk.f32.vlgmr.msrb.gmra.mxu0 %vm881_vm5, %v6230_v5 }
 0x3bb   :  { %6236 = vmatmul.msk.f32.vlgmr.msrb.gmra.mxu1 %vm881_vm5, %v6230_v5  ;;  %3397 = vmatpush.msrb.mxu0 %v7026_v2 }
 0x3bc   :  { %3417 = vmatpush.msrb.mxu1 %v7029_v3 }
 0x3bd   :  { %6246 = vmatmul.msk.f32.vlgmr.msrb.gmra.mxu2 %vm881_vm5, %v6239_v6 }
 0x3be   :  { %6247 = vmatmul.msk.f32.vlgmr.msrb.gmra.mxu3 %vm881_vm5, %v6239_v6  ;;  %3635 = vmatpush.msrb.mxu2 %v6995_v54 }
 0x3bf   :  { %3655 = vmatpush.msrb.mxu3 %v6998_v55 }
 0x3c2   :  { %6240 = vmatmul.msk.f32.vlgmr.msra.gmra.mxu0 %vm881_vm5, %v6239_v6 }
 0x3c3   :  { %6241 = vmatmul.msk.f32.vlgmr.msra.gmra.mxu1 %vm881_vm5, %v6239_v6  ;;  %3515 = vmatpush.msra.mxu0 %v7001_v58 }
 0x3c4   :  { %3535 = vmatpush.msra.mxu1 %v7004_v59 }
 0x3c5   :  { %6251 = vmatmul.msk.f32.vlgmr.msra.gmra.mxu2 %vm881_vm5, %v6248_v9 }
 0x3c6   :  { %6252 = vmatmul.msk.f32.vlgmr.msra.gmra.mxu3 %vm881_vm5, %v6248_v9  ;;  %3753 = vmatpush.msra.mxu2 %v6978_v16 }
 0x3c7   :  { %3773 = vmatpush.msra.mxu3 %v6986_v26 }
 0x3ca   :  { %6244 = vmatmul.msk.f32.vlgmr.msrb.gmra.mxu0 %vm881_vm5, %v6239_v6 }
 0x3cb   :  { %6245 = vmatmul.msk.f32.vlgmr.msrb.gmra.mxu1 %vm881_vm5, %v6239_v6  ;;  %3595 = vmatpush.msrb.mxu0 %v7026_v2 }
 0x3cc   :  { %3615 = vmatpush.msrb.mxu1 %v7029_v3 }
 0x3cd   :  { %6255 = vmatmul.msk.f32.vlgmr.msrb.gmra.mxu2 %vm881_vm5, %v6248_v9 }
 0x3ce   :  { %6256 = vmatmul.msk.f32.vlgmr.msrb.gmra.mxu3 %vm881_vm5, %v6248_v9  ;;  %3833 = vmatpush.msrb.mxu2 %v6995_v54 }
 0x3cf   :  { %3853 = vmatpush.msrb.mxu3 %v6998_v55 }
 0x3d2   :  { %6249 = vmatmul.msk.f32.vlgmr.msra.gmra.mxu0 %vm881_vm5, %v6248_v9 }
 0x3d3   :  { %6250 = vmatmul.msk.f32.vlgmr.msra.gmra.mxu1 %vm881_vm5, %v6248_v9  ;;  %3713 = vmatpush.msra.mxu0 %v7001_v58 }
 0x3d4   :  { %3733 = vmatpush.msra.mxu1 %v7004_v59 }
 0x3d5   :  { %6260 = vmatmul.msk.f32.vlgmr.msra.gmra.mxu2 %vm881_vm5, %v6257_v10 }
 0x3d6   :  { %6261 = vmatmul.msk.f32.vlgmr.msra.gmra.mxu3 %vm881_vm5, %v6257_v10  ;;  %3951 = vmatpush.msra.mxu2 %v6978_v16 }
 0x3d7   :  { %3971 = vmatpush.msra.mxu3 %v6986_v26 }
 0x3d8   :  { %v2179_v11 = vpop.f32.mrf.mxu2 }
 0x3d9   :  { %v2199_v12 = vpop.f32.mrf.mxu3 }
 0x3da   :  { %6253 = vmatmul.msk.f32.vlgmr.msrb.gmra.mxu0 %vm881_vm5, %v6248_v9 }
 0x3db   :  { %6254 = vmatmul.msk.f32.vlgmr.msrb.gmra.mxu1 %vm881_vm5, %v6248_v9  ;;  %3793 = vmatpush.msrb.mxu0 %v7026_v2  ;;  %v6302_v9 = vld [vmem:[%s8739_s5 + $0x34] sm:$0xf] }
 0x3dc   :  { %3813 = vmatpush.msrb.mxu1 %v7029_v3 }
 0x3dd   :  { %6264 = vmatmul.msk.f32.vlgmr.msrb.gmra.mxu2 %vm881_vm5, %v6257_v10 }
 0x3de   :  { %v2139_v13 = vpop.f32.mrf.mxu0  ;;  %6265 = vmatmul.msk.f32.vlgmr.msrb.gmra.mxu3 %vm881_vm5, %v6257_v10  ;;  %4031 = vmatpush.msrb.mxu2 %v6995_v54 }
 0x3df   :  { %v2159_v14 = vpop.f32.mrf.mxu1  ;;  %4051 = vmatpush.msrb.mxu3 %v6998_v55  ;;  %2282 = vrot.lane.b32.xlu1 %v2139_v13, %s6428_s16 }
 0x3e0   :  { %2284 = vrot.lane.b32.xlu2 %v2159_v14, %s6428_s16  ;;  %v2259_v15 = vpop.f32.mrf.mxu2  ;;  %v5099_v14 = vld.sshfl [vmem:[#allocation1 + $0x30] sm:$0xff pattern:$0x75316420] }
 0x3e1   :  { %v2279_v17 = vpop.f32.mrf.mxu3 }
 0x3e2   :  { %6258 = vmatmul.msk.f32.vlgmr.msra.gmra.mxu0 %vm881_vm5, %v6257_v10 }
 0x3e3   :  { %6259 = vmatmul.msk.f32.vlgmr.msra.gmra.mxu1 %vm881_vm5, %v6257_v10  ;;  %3911 = vmatpush.msra.mxu0 %v7001_v58 }
 0x3e4   :  { %3931 = vmatpush.msra.mxu1 %v7004_v59 }
 0x3e5   :  { %6269 = vmatmul.msk.f32.vlgmr.msra.gmra.mxu2 %vm881_vm5, %v6266_v24 }
 0x3e6   :  { %6270 = vmatmul.msk.f32.vlgmr.msra.gmra.mxu3 %vm881_vm5, %v6266_v24  ;;  %4149 = vmatpush.msra.mxu2 %v6978_v16 }
 0x3e7   :  { %v2219_v27 = vpop.f32.mrf.mxu0  ;;  %4169 = vmatpush.msra.mxu3 %v6986_v26  ;;  %2288 = vrot.lane.b32.xlu1 %v2199_v12, %s6428_s16 }
 0x3e8   :  { %v2239_v30 = vpop.f32.mrf.mxu1  ;;  %2290 = vrot.lane.b32.xlu2 %v2219_v27, %s6428_s16  ;;  %v2369_v31 = vpop.f32.mrf.mxu2 }
 0x3e9   :  { %2292 = vrot.lane.b32.xlu0 %v2239_v30, %s6428_s16  ;;  %v2389_v32 = vpop.f32.mrf.mxu3  ;;  %v5094_v30 = vld.sshfl [vmem:[#allocation1 + $0x8] sm:$0xff pattern:$0x75316420] }
 0x3ea   :  { %6262 = vmatmul.msk.f32.vlgmr.msrb.gmra.mxu0 %vm881_vm5, %v6257_v10 }
 0x3eb   :  { %6263 = vmatmul.msk.f32.vlgmr.msrb.gmra.mxu1 %vm881_vm5, %v6257_v10  ;;  %3991 = vmatpush.msrb.mxu0 %v7026_v2  ;;  %v5095_v10 = vld.sshfl [vmem:[#allocation1 + $0x10] sm:$0xff pattern:$0x75316420] }
 0x3ec   :  { %4011 = vmatpush.msrb.mxu1 %v7029_v3 }
 0x3ed   :  { %6273 = vmatmul.msk.f32.vlgmr.msrb.gmra.mxu2 %vm881_vm5, %v6266_v24 }
 0x3ee   :  { %6274 = vmatmul.msk.f32.vlgmr.msrb.gmra.mxu3 %vm881_vm5, %v6266_v24  ;;  %4229 = vmatpush.msrb.mxu2 %v6995_v54 }
 0x3ef   :  { %v2329_v33 = vpop.f32.mrf.mxu0  ;;  %4249 = vmatpush.msrb.mxu3 %v6998_v55  ;;  %2294 = vrot.lane.b32.xlu1 %v2259_v15, %s6428_s16  ;;  %v5100_v15 = vld.sshfl [vmem:[#allocation1 + $0x38] sm:$0xff pattern:$0x75316420] }
 0x3f0   :  { %v2349_v34 = vpop.f32.mrf.mxu1  ;;  %v2449_v23 = vpop.f32.mrf.mxu2  ;;  %5519 = vst [vmem:[#allocation1 + $0x30] ss:$2 sm:$0xff] %v6541_v28  ;;  %v5093_v28 = vld.sshfl [vmem:[#allocation1] sm:$0xff pattern:$0x75316420] }
 0x3f1   :  { %2286 = vrot.lane.b32.xlu0 %v2179_v11, %s6428_s16  ;;  %2474 = vrot.lane.b32.xlu2 %v2349_v34, %s6429_s3  ;;  %v2469_v36 = vpop.f32.mrf.mxu3  ;;  %v5096_v11 = vld.sshfl [vmem:[#allocation1 + $0x18] sm:$0xff pattern:$0x75316420]  ;;  %5513 = vst [vmem:[#allocation1] ss:$2 sm:$0xff] %v6521_v22 }
 0x3f2   :  { %6267 = vmatmul.msk.f32.vlgmr.msra.gmra.mxu0 %vm881_vm5, %v6266_v24  ;;  %5515 = vst [vmem:[#allocation1 + $0x10] ss:$2 sm:$0xff] %v6514_v21  ;;  %v5097_v34 = vld.sshfl [vmem:[#allocation1 + $0x20] sm:$0xff pattern:$0x75316420] }
 0x3f3   :  { %6268 = vmatmul.msk.f32.vlgmr.msra.gmra.mxu1 %vm881_vm5, %v6266_v24  ;;  %4109 = vmatpush.msra.mxu0 %v7001_v58 }
 0x3f4   :  { %4129 = vmatpush.msra.mxu1 %v7004_v59 }
 0x3f5   :  { %6278 = vmatmul.msk.f32.vlgmr.msra.gmra.mxu2 %vm881_vm5, %v6275_v37 }
 0x3f6   :  { %6279 = vmatmul.msk.f32.vlgmr.msra.gmra.mxu3 %vm881_vm5, %v6275_v37  ;;  %4347 = vmatpush.msra.mxu2 %v6978_v16 }
 0x3f7   :  { %v2409_v7 = vpop.f32.mrf.mxu0  ;;  %4367 = vmatpush.msra.mxu3 %v6986_v26  ;;  %2472 = vrot.lane.b32.xlu1 %v2329_v33, %s6429_s3 }
 0x3f8   :  { %v2429_v39 = vpop.f32.mrf.mxu1  ;;  %v2567_v38 = vpop.f32.mrf.mxu2 }
 0x3f9   :  { %2296 = vrot.lane.b32.xlu0 %v2279_v17, %s6428_s16  ;;  %2478 = vrot.lane.b32.xlu2 %v2389_v32, %s6429_s3  ;;  %v2587_v40 = vpop.f32.mrf.mxu3 }
 0x3fa   :  { %6271 = vmatmul.msk.f32.vlgmr.msrb.gmra.mxu0 %vm881_vm5, %v6266_v24 }
 0x3fb   :  { %6272 = vmatmul.msk.f32.vlgmr.msrb.gmra.mxu1 %vm881_vm5, %v6266_v24  ;;  %4189 = vmatpush.msrb.mxu0 %v7026_v2 }
 0x3fc   :  { %4209 = vmatpush.msrb.mxu1 %v7029_v3 }
 0x3fd   :  { %6282 = vmatmul.msk.f32.vlgmr.msrb.gmra.mxu2 %vm881_vm5, %v6275_v37 }
 0x3fe   :  { %6283 = vmatmul.msk.f32.vlgmr.msrb.gmra.mxu3 %vm881_vm5, %v6275_v37  ;;  %4427 = vmatpush.msrb.mxu2 %v6995_v54 }
 0x3ff   :  { %v2527_v51 = vpop.f32.mrf.mxu0  ;;  %4447 = vmatpush.msrb.mxu3 %v6998_v55  ;;  %2482 = vrot.lane.b32.xlu1 %v2429_v39, %s6429_s3 }
 0x400   :  { %v2547_v52 = vpop.f32.mrf.mxu1  ;;  %v2647_v53 = vpop.f32.mrf.mxu2 }
 0x401   :  { %2476 = vrot.lane.b32.xlu0 %v2369_v31, %s6429_s3  ;;  %2484 = vrot.lane.b32.xlu2 %v2449_v23, %s6429_s3  ;;  %v2667_v19 = vpop.f32.mrf.mxu3  ;;  %v7340_v31 = vpop.permute.xlu2 %5080  ;;  %v5098_v23 = vld.sshfl [vmem:[#allocation1 + $0x28] sm:$0xff pattern:$0x75316420] }
 0x402   :  { %6276 = vmatmul.msk.f32.vlgmr.msra.gmra.mxu0 %vm881_vm5, %v6275_v37  ;;  %5517 = vst [vmem:[#allocation1 + $0x20] ss:$2 sm:$0xff] %v6532_v25 }
 0x403   :  { %6277 = vmatmul.msk.f32.vlgmr.msra.gmra.mxu1 %vm881_vm5, %v6275_v37  ;;  %4307 = vmatpush.msra.mxu0 %v7001_v58 }
 0x404   :  { %4327 = vmatpush.msra.mxu1 %v7004_v59 }
 0x405   :  { %6287 = vmatmul.msk.f32.vlgmr.msra.gmra.mxu2 %vm881_vm5, %v6284_v47 }
 0x406   :  { %6288 = vmatmul.msk.f32.vlgmr.msra.gmra.mxu3 %vm881_vm5, %v6284_v47  ;;  %4545 = vmatpush.msra.mxu2 %v6978_v16 }
 0x407   :  { %v2607_v42 = vpop.f32.mrf.mxu0  ;;  %4565 = vmatpush.msra.mxu3 %v6986_v26  ;;  %2486 = vrot.lane.b32.xlu1 %v2469_v36, %s6429_s3  ;;  %v6311_v36 = vld [vmem:[%s8739_s5 + $0x38] sm:$0xf]  ;;  %s6433_s5 = smov 116  }
 0x408   :  { %v2627_v48 = vpop.f32.mrf.mxu1  ;;  %v7253_v60 = vpop.f32.mrf.mxu2 }
 0x409   :  { %2480 = vrot.lane.b32.xlu0 %v2409_v7, %s6429_s3  ;;  %2670 = vrot.lane.b32.xlu2 %v2527_v51, %s6430_s23  ;;  %v2785_v49 = vpop.f32.mrf.mxu3 }
 0x40a   :  { %6280 = vmatmul.msk.f32.vlgmr.msrb.gmra.mxu0 %vm881_vm5, %v6275_v37 }
 0x40b   :  { %6281 = vmatmul.msk.f32.vlgmr.msrb.gmra.mxu1 %vm881_vm5, %v6275_v37  ;;  %4387 = vmatpush.msrb.mxu0 %v7026_v2 }
 0x40c   :  { %4407 = vmatpush.msrb.mxu1 %v7029_v3 }
 0x40d   :  { %6291 = vmatmul.msk.f32.vlgmr.msrb.gmra.mxu2 %vm881_vm5, %v6284_v47 }
 0x40e   :  { %6292 = vmatmul.msk.f32.vlgmr.msrb.gmra.mxu3 %vm881_vm5, %v6284_v47  ;;  %4625 = vmatpush.msrb.mxu2 %v6995_v54 }
 0x40f   :  { %v2725_v61 = vpop.f32.mrf.mxu0  ;;  %4645 = vmatpush.msrb.mxu3 %v6998_v55  ;;  %2680 = vrot.lane.b32.xlu1 %v2627_v48, %s6430_s23 }
 0x410   :  { %v2745_v50 = vpop.f32.mrf.mxu1  ;;  %v7266_v18 = vpop.f32.mrf.mxu2 }
 0x411   :  { %2672 = vrot.lane.b32.xlu0 %v2547_v52, %s6430_s23  ;;  %2676 = vrot.lane.b32.xlu2 %v2587_v40, %s6430_s23  ;;  %v7269_v29 = vpop.f32.mrf.mxu3 }
 0x412   :  { %6285 = vmatmul.msk.f32.vlgmr.msra.gmra.mxu0 %vm881_vm5, %v6284_v47 }
 0x413   :  { %6286 = vmatmul.msk.f32.vlgmr.msra.gmra.mxu1 %vm881_vm5, %v6284_v47  ;;  %4505 = vmatpush.msra.mxu0 %v7001_v58 }
 0x414   :  { %4525 = vmatpush.msra.mxu1 %v7004_v59 }
 0x415   :  { %6296 = vmatmul.msk.f32.vlgmr.msra.gmra.mxu2 %vm881_vm5, %v6293_v56 }
 0x416   :  { %6297 = vmatmul.msk.f32.vlgmr.msra.gmra.mxu3 %vm881_vm5, %v6293_v56  ;;  %4743 = vmatpush.msra.mxu2 %v6978_v16 }
 0x417   :  { %v2805_v57 = vpop.f32.mrf.mxu0  ;;  %4763 = vmatpush.msra.mxu3 %v6986_v26  ;;  %2674 = vrot.lane.b32.xlu1 %v2567_v38, %s6430_s23 }
 0x418   :  { %v2825_v62 = vpop.f32.mrf.mxu1  ;;  %v7284_v41 = vpop.f32.mrf.mxu2 }
 0x419   :  { %2870 = vrot.lane.b32.xlu2 %v2745_v50, %s6431_s26  ;;  %2678 = vrot.lane.b32.xlu0 %v2607_v42, %s6430_s23  ;;  %v7287_v20 = vpop.f32.mrf.mxu3  ;;  %v7409_v42 = vpop.permute.xlu1 %5299 }
 0x41a   :  { %6289 = vmatmul.msk.f32.vlgmr.msrb.gmra.mxu0 %vm881_vm5, %v6284_v47 }
 0x41b   :  { %6290 = vmatmul.msk.f32.vlgmr.msrb.gmra.mxu1 %vm881_vm5, %v6284_v47  ;;  %4585 = vmatpush.msrb.mxu0 %v7026_v2 }
 0x41c   :  { %4605 = vmatpush.msrb.mxu1 %v7029_v3 }
 0x41d   :  { %6300 = vmatmul.msk.f32.vlgmr.msrb.gmra.mxu2 %vm881_vm5, %v6293_v56 }
 0x41e   :  { %6301 = vmatmul.msk.f32.vlgmr.msrb.gmra.mxu3 %vm881_vm5, %v6293_v56  ;;  %4823 = vmatpush.msrb.mxu2 %v6995_v54 }
 0x41f   :  { %v7293_v4 = vpop.f32.mrf.mxu0  ;;  %4843 = vmatpush.msrb.mxu3 %v6998_v55  ;;  %2868 = vrot.lane.b32.xlu1 %v2725_v61, %s6431_s26  ;;  %v7439_v61 = vpop.permute.xlu0 %5511 }
 0x420   :  { %v2943_v5 = vpop.f32.mrf.mxu1  ;;  %v7301_v6 = vpop.f32.mrf.mxu2 }
 0x421   :  { %2682 = vrot.lane.b32.xlu2 %v2647_v53, %s6430_s23  ;;  %2684 = vrot.lane.b32.xlu0 %v2667_v19, %s6430_s23  ;;  %v7304_v8 = vpop.f32.mrf.mxu3 }
 0x422   :  { %6294 = vmatmul.msk.f32.vlgmr.msra.gmra.mxu0 %vm881_vm5, %v6293_v56 }
 0x423   :  { %6295 = vmatmul.msk.f32.vlgmr.msra.gmra.mxu1 %vm881_vm5, %v6293_v56  ;;  %4703 = vmatpush.msra.mxu0 %v7001_v58 }
 0x424   :  { %4723 = vmatpush.msra.mxu1 %v7004_v59 }
 0x425   :  { %6305 = vmatmul.msk.f32.vlgmr.msra.gmra.mxu2 %vm881_vm5, %v6302_v9 }
 0x426   :  { %6306 = vmatmul.msk.f32.vlgmr.msra.gmra.mxu3 %vm881_vm5, %v6302_v9  ;;  %4941 = vmatpush.msra.mxu2 %v6978_v16 }
 0x427   :  { %v3003_v12 = vpop.f32.mrf.mxu0  ;;  %4961 = vmatpush.msra.mxu3 %v6986_v26  ;;  %2874 = vrot.lane.b32.xlu1 %v2785_v49, %s6431_s26 }
 0x428   :  { %v3023_v13 = vpop.f32.mrf.mxu1  ;;  %v7320_v17 = vpop.f32.mrf.mxu2 }
 0x429   :  { %2878 = vrot.lane.b32.xlu0 %v2825_v62, %s6431_s26  ;;  %2876 = vrot.lane.b32.xlu2 %v2805_v57, %s6431_s26  ;;  %v7324_v21 = vpop.f32.mrf.mxu3 }
 0x42a   :  { %6298 = vmatmul.msk.f32.vlgmr.msrb.gmra.mxu0 %vm881_vm5, %v6293_v56 }
 0x42b   :  { %6299 = vmatmul.msk.f32.vlgmr.msrb.gmra.mxu1 %vm881_vm5, %v6293_v56  ;;  %4783 = vmatpush.msrb.mxu0 %v7026_v2  ;;  %v5523_v56 = vld.sshfl [vmem:[#allocation1 + $0x18] sm:$0xff pattern:$0x75316420] }
 0x42c   :  { %4803 = vmatpush.msrb.mxu1 %v7029_v3 }
 0x42d   :  { %6309 = vmatmul.msk.f32.vlgmr.msrb.gmra.mxu2 %vm881_vm5, %v6302_v9 }
 0x42e   :  { %6310 = vmatmul.msk.f32.vlgmr.msrb.gmra.mxu3 %vm881_vm5, %v6302_v9  ;;  %5021 = vmatpush.msrb.mxu2 %v6995_v54 }
 0x42f   :  { %v7330_v24 = vpop.f32.mrf.mxu0  ;;  %5041 = vmatpush.msrb.mxu3 %v6998_v55  ;;  %3068 = vrot.lane.b32.xlu1 %v2943_v5, %s6432_s29  ;;  %v5526_v5 = vld.sshfl [vmem:[#allocation1 + $0x30] sm:$0xff pattern:$0x75316420] }
 0x430   :  { %v3141_v27 = vpop.f32.mrf.mxu1  ;;  %v7342_v32 = vpop.f32.mrf.mxu2 }
 0x431   :  { %2872 = vrot.lane.b32.xlu0 %v7253_v60, %s6431_s26  ;;  %2882 = vrot.lane.b32.xlu2 %v7269_v29, %s6431_s26  ;;  %v7346_v33 = vpop.f32.mrf.mxu3  ;;  %v5522_v29 = vld.sshfl [vmem:[#allocation1 + $0x10] sm:$0xff pattern:$0x75316420] }
 0x432   :  { %6303 = vmatmul.msk.f32.vlgmr.msra.gmra.mxu0 %vm881_vm5, %v6302_v9 }
 0x433   :  { %6304 = vmatmul.msk.f32.vlgmr.msra.gmra.mxu1 %vm881_vm5, %v6302_v9  ;;  %4901 = vmatpush.msra.mxu0 %v7001_v58 }
 0x434   :  { %4921 = vmatpush.msra.mxu1 %v7004_v59 }
 0x435   :  { %6314 = vmatmul.msk.f32.vlgmr.msra.gmra.mxu2 %vm881_vm5, %v6311_v36 }
 0x436   :  { %6315 = vmatmul.msk.f32.vlgmr.msra.gmra.mxu3 %vm881_vm5, %v6311_v36  ;;  %6324 = vmatpush.msk.msra.mxu2 %vm158_vm0, %v5095_v10  ;;  %v5521_v10 = vld.sshfl [vmem:[#allocation1 + $0x8] sm:$0xff pattern:$0x75316420] }
 0x437   :  { %v7356_v22 = vpop.f32.mrf.mxu0  ;;  %2880 = vrot.lane.b32.xlu1 %v7266_v18, %s6431_s26  ;;  %6326 = vmatpush.msk.msra.mxu3 %vm158_vm0, %v5096_v11 }
 0x438   :  { %v3221_v37 = vpop.f32.mrf.mxu1  ;;  %v7366_v25 = vpop.f32.mrf.mxu2 }
 0x439   :  { %3076 = vrot.lane.b32.xlu2 %v3023_v13, %s6432_s29  ;;  %3066 = vrot.lane.b32.xlu0 %v7293_v4, %s6432_s29  ;;  %v7369_v7 = vpop.f32.mrf.mxu3 }
 0x43a   :  { %6307 = vmatmul.msk.f32.vlgmr.msrb.gmra.mxu0 %vm881_vm5, %v6302_v9  ;;  %v7372_v39 = vpop.permute.xlu2 %2284 }
 0x43b   :  { %6308 = vmatmul.msk.f32.vlgmr.msrb.gmra.mxu1 %vm881_vm5, %v6302_v9  ;;  %4981 = vmatpush.msrb.mxu0 %v7026_v2 }
 0x43c   :  { %5001 = vmatpush.msrb.mxu1 %v7029_v3 }
 0x43d   :  { %6318 = vmatmul.msk.f32.vlgmr.msrb.gmra.mxu2 %vm881_vm5, %v6311_v36 }
 0x43e   :  { %6319 = vmatmul.msk.f32.vlgmr.msrb.gmra.mxu3 %vm881_vm5, %v6311_v36  ;;  %6332 = vmatpush.msk.msrb.mxu2 %vm158_vm0, %v5099_v14 }
 0x43f   :  { %v7377_v38 = vpop.f32.mrf.mxu0  ;;  %3074 = vrot.lane.b32.xlu1 %v3003_v12, %s6432_s29  ;;  %6334 = vmatpush.msk.msrb.mxu3 %vm158_vm0, %v5100_v15 }
 0x440   :  { %v3339_v40 = vpop.f32.mrf.mxu1  ;;  %v7387_v51 = vpop.f32.mrf.mxu2 }
 0x441   :  { %3070 = vrot.lane.b32.xlu2 %v7284_v41, %s6432_s29  ;;  %3072 = vrot.lane.b32.xlu0 %v7287_v20, %s6432_s29  ;;  %v7390_v52 = vpop.f32.mrf.mxu3 }
 0x442   :  { %6312 = vmatmul.msk.f32.vlgmr.msra.gmra.mxu0 %vm881_vm5, %v6311_v36  ;;  %v7393_v53 = vpop.permute.xlu2 %2290 }
 0x443   :  { %6313 = vmatmul.msk.f32.vlgmr.msra.gmra.mxu1 %vm881_vm5, %v6311_v36  ;;  %6320 = vmatpush.msk.msra.mxu0 %vm158_vm0, %v5093_v28 }
 0x444   :  { %6322 = vmatpush.msk.msra.mxu1 %vm158_vm0, %v5094_v30 }
 0x445   :  { %6325 = vmatmul.msk.f32.vlgmr.msra.gmra.mxu2 %vm154_vm1, %v7340_v31 }
 0x446   :  { %6327 = vmatmul.msk.f32.vlgmr.msra.gmra.mxu3 %vm154_vm1, %v7340_v31  ;;  %5358 = vmatpush.msra.mxu2 %v6978_v16 }
 0x447   :  { %v7399_v19 = vpop.f32.mrf.mxu0  ;;  %5378 = vmatpush.msra.mxu3 %v6986_v26  ;;  %3080 = vrot.lane.b32.xlu1 %v7304_v8, %s6432_s29 }
 0x448   :  { %v7404_v47 = vpop.f32.mrf.mxu1  ;;  %v7414_v48 = vpop.f32.mrf.mxu2 }
 0x449   :  { %3266 = vrot.lane.b32.xlu0 %v3141_v27, %s6433_s5  ;;  %3264 = vrot.lane.b32.xlu2 %v7330_v24, %s6433_s5  ;;  %v7417_v16 = vpop.f32.mrf.mxu3  ;;  %v5525_v27 = vld.sshfl [vmem:[#allocation1 + $0x28] sm:$0xff pattern:$0x75316420] }
 0x44a   :  { %6316 = vmatmul.msk.f32.vlgmr.msrb.gmra.mxu0 %vm881_vm5, %v6311_v36 }
 0x44b   :  { %6317 = vmatmul.msk.f32.vlgmr.msrb.gmra.mxu1 %vm881_vm5, %v6311_v36  ;;  %v7420_v26 = vpop.permute.xlu2 %2474  ;;  %6328 = vmatpush.msk.msrb.mxu0 %vm158_vm0, %v5097_v34 }
 0x44c   :  { %6330 = vmatpush.msk.msrb.mxu1 %vm158_vm0, %v5098_v23 }
 0x44d   :  { %6333 = vmatmul.msk.f32.vlgmr.msrb.gmra.mxu2 %vm154_vm1, %v7340_v31 }
 0x44e   :  { %6335 = vmatmul.msk.f32.vlgmr.msrb.gmra.mxu3 %vm154_vm1, %v7340_v31  ;;  %5438 = vmatpush.msrb.mxu2 %v6995_v54 }
 0x44f   :  { %v7426_v60 = vpop.f32.mrf.mxu0  ;;  %5458 = vmatpush.msrb.mxu3 %v6998_v55  ;;  %3274 = vrot.lane.b32.xlu1 %v3221_v37, %s6433_s5 }
 0x450   :  { %v7431_v49 = vpop.f32.mrf.mxu1  ;;  %v7441_v50 = vpop.f32.mrf.mxu2 }
 0x451   :  { %3078 = vrot.lane.b32.xlu0 %v7301_v6, %s6432_s29  ;;  %3270 = vrot.lane.b32.xlu2 %v7324_v21, %s6433_s5  ;;  %v7443_v18 = vpop.permute.xlu1 %2282  ;;  %v7447_v54 = vpop.f32.mrf.mxu3  ;;  %v5527_v6 = vld.sshfl [vmem:[#allocation1 + $0x38] sm:$0xff pattern:$0x75316420]  ;;  %v5524_v21 = vld.sshfl [vmem:[#allocation1 + $0x20] sm:$0xff pattern:$0x75316420] }
 0x452   :  { %6321 = vmatmul.msk.f32.vlgmr.msra.gmra.mxu0 %vm154_vm1, %v7340_v31 }
 0x453   :  { %6323 = vmatmul.msk.f32.vlgmr.msra.gmra.mxu1 %vm154_vm1, %v7340_v31  ;;  %v7451_v55 = vpop.permute.xlu2 %2478  ;;  %5318 = vmatpush.msra.mxu0 %v7001_v58 }
 0x454   :  { %5338 = vmatpush.msra.mxu1 %v7004_v59 }
 0x455   :  { %6338 = vmatmul.msk.f32.vlgmr.msra.gmra.mxu2 %vm881_vm5, %v7409_v42 }
 0x456   :  { %6339 = vmatmul.msk.f32.vlgmr.msra.gmra.mxu3 %vm881_vm5, %v7409_v42  ;;  %6348 = vmatpush.msk.msra.mxu2 %vm158_vm0, %v5522_v29 }
 0x457   :  { %v7457_v57 = vpop.f32.mrf.mxu0  ;;  %3268 = vrot.lane.b32.xlu1 %v7320_v17, %s6433_s5  ;;  %6350 = vmatpush.msk.msra.mxu3 %vm158_vm0, %v5523_v56 }
 0x458   :  { %v7462_v62 = vpop.f32.mrf.mxu1  ;;  %v7470_v58 = vpop.f32.mrf.mxu2 }
 0x459   :  { %3464 = vrot.lane.b32.xlu2 %v3339_v40, %s6434_s9  ;;  %3272 = vrot.lane.b32.xlu0 %v7356_v22, %s6433_s5  ;;  %v7472_v59 = vpop.permute.xlu1 %2288  ;;  %v7476_v41 = vpop.f32.mrf.mxu3 }
 0x45a   :  { %6329 = vmatmul.msk.f32.vlgmr.msrb.gmra.mxu0 %vm154_vm1, %v7340_v31 }
 0x45b   :  { %v7478_v20 = vpop.permute.xlu0 %2292  ;;  %6331 = vmatmul.msk.f32.vlgmr.msrb.gmra.mxu1 %vm154_vm1, %v7340_v31  ;;  %v7482_v4 = vpop.permute.xlu2 %2484  ;;  %5398 = vmatpush.msrb.mxu0 %v7026_v2  ;;  %v5520_v2 = vld.sshfl [vmem:[#allocation1] sm:$0xff pattern:$0x75316420] }
 0x45c   :  { %5418 = vmatpush.msrb.mxu1 %v7029_v3 }
 0x45d   :  { %6342 = vmatmul.msk.f32.vlgmr.msrb.gmra.mxu2 %vm881_vm5, %v7409_v42 }
 0x45e   :  { %6343 = vmatmul.msk.f32.vlgmr.msrb.gmra.mxu3 %vm881_vm5, %v7409_v42  ;;  %6356 = vmatpush.msk.msrb.mxu2 %vm158_vm0, %v5526_v5 }
 0x45f   :  { %v7488_v8 = vpop.f32.mrf.mxu0  ;;  %3462 = vrot.lane.b32.xlu1 %v7377_v38, %s6434_s9  ;;  %6358 = vmatpush.msk.msrb.mxu3 %vm158_vm0, %v5527_v6 }
 0x460   :  { %v7493_v9 = vpop.f32.mrf.mxu1  ;;  %v7502_v3 = vpop.f32.mrf.mxu2 }
 0x461   :  { %3276 = vrot.lane.b32.xlu2 %v7342_v32, %s6433_s5  ;;  %3278 = vrot.lane.b32.xlu0 %v7346_v33, %s6433_s5  ;;  %v7504_v11 = vpop.permute.xlu1 %2294  ;;  %v7508_v12 = vpop.f32.mrf.mxu3 }
 0x462   :  { %6336 = vmatmul.msk.f32.vlgmr.msra.gmra.mxu0 %vm881_vm5, %v7409_v42 }
 0x463   :  { %v7510_v13 = vpop.permute.xlu0 %2286  ;;  %6337 = vmatmul.msk.f32.vlgmr.msra.gmra.mxu1 %vm881_vm5, %v7409_v42  ;;  %v7514_v14 = vpop.permute.xlu2 %2670  ;;  %6344 = vmatpush.msk.msra.mxu0 %vm158_vm0, %v5520_v2 }
 0x464   :  { %6346 = vmatpush.msk.msra.mxu1 %vm158_vm0, %v5521_v10 }
 0x465   :  { %6349 = vmatmul.msk.f32.vlgmr.msra.gmra.mxu2 %vm154_vm1, %v7439_v61 }
 0x466   :  { %6351 = vmatmul.msk.f32.vlgmr.msra.gmra.mxu3 %vm154_vm1, %v7439_v61 }
 0x467   :  { %v7520_v15 = vpop.f32.mrf.mxu0  ;;  %3468 = vrot.lane.b32.xlu1 %v7369_v7, %s6434_s9 }
 0x468   :  { %v7524_v17 = vpop.f32.mrf.mxu1  ;;  %v7532_v24 = vpop.f32.mrf.mxu2 }
 0x469   :  { %3472 = vrot.lane.b32.xlu0 %v7404_v47, %s6434_s9  ;;  %3470 = vrot.lane.b32.xlu2 %v7399_v19, %s6434_s9  ;;  %v7534_v28 = vpop.permute.xlu1 %2472  ;;  %v7538_v30 = vpop.f32.mrf.mxu3 }
 0x46a   :  { %6340 = vmatmul.msk.f32.vlgmr.msrb.gmra.mxu0 %vm881_vm5, %v7409_v42  ;;  %8751 = vst [vmem:[#allocation8_spill] sm:$0xff] %v7538_v30 }
 0x46b   :  { %v7540_v31 = vpop.permute.xlu0 %2296  ;;  %6341 = vmatmul.msk.f32.vlgmr.msrb.gmra.mxu1 %vm881_vm5, %v7409_v42  ;;  %v7544_v32 = vpop.permute.xlu2 %2676  ;;  %6352 = vmatpush.msk.msrb.mxu0 %vm158_vm0, %v5524_v21  ;;  %vm2686_vm5 = vcmp.lt.s32.totalorder %v6558_v35, 119 }
 0x46c   :  { %6354 = vmatpush.msk.msrb.mxu1 %vm158_vm0, %v5525_v27 }
 0x46d   :  { %6357 = vmatmul.msk.f32.vlgmr.msrb.gmra.mxu2 %vm154_vm1, %v7439_v61 }
 0x46e   :  { %6359 = vmatmul.msk.f32.vlgmr.msrb.gmra.mxu3 %vm154_vm1, %v7439_v61 }
 0x46f   :  { %v7550_v33 = vpop.f32.mrf.mxu0  ;;  %3662 = vrot.lane.b32.xlu1 %v7431_v49, %s6427_s12 }
 0x470   :  { %v3933_v34 = vpop.f32.mrf.mxu1  ;;  %v7560_v23 = vpop.f32.mrf.mxu2 }
 0x471   :  { %3466 = vrot.lane.b32.xlu0 %v7366_v25, %s6434_s9  ;;  %3476 = vrot.lane.b32.xlu2 %v7390_v52, %s6434_s9  ;;  %8752 = vst [vmem:[#allocation9_spill] sm:$0xff] %v7560_v23  ;;  %v7562_v36 = vpop.permute.xlu1 %2482  ;;  %v7566_v22 = vpop.f32.mrf.mxu3 }
 0x472   :  { %6345 = vmatmul.msk.f32.vlgmr.msra.gmra.mxu0 %vm154_vm1, %v7439_v61  ;;  %8753 = vst [vmem:[#allocation10_spill] sm:$0xff] %v7566_v22 }
 0x473   :  { %v7568_v37 = vpop.permute.xlu0 %2476  ;;  %6347 = vmatmul.msk.f32.vlgmr.msra.gmra.mxu1 %vm154_vm1, %v7439_v61  ;;  %v7572_v7 = vpop.permute.xlu2 %2870 }
 0x477   :  { %v7574_v25 = vpop.f32.mrf.mxu0  ;;  %3474 = vrot.lane.b32.xlu1 %v7387_v51, %s6434_s9 }
 0x478   :  { %8754 = vst [vmem:[#allocation11_spill] sm:$0xff] %v7574_v25  ;;  %v7576_v38 = vpop.f32.mrf.mxu1  ;;  %v7584_v40 = vpop.f32.mrf.mxu2 }
 0x479   :  { %8755 = vst [vmem:[#allocation12_spill] sm:$0xff] %v7576_v38  ;;  %3670 = vrot.lane.b32.xlu2 %v7462_v62, %s6427_s12  ;;  %3660 = vrot.lane.b32.xlu0 %v7426_v60, %s6427_s12  ;;  %v7586_v52 = vpop.permute.xlu1 %2486  ;;  %v7590_v19 = vpop.f32.mrf.mxu3 }
 0x47a   :  { %8756 = vst [vmem:[#allocation13_spill] sm:$0xff] %v7584_v40  ;;  %6353 = vmatmul.msk.f32.vlgmr.msrb.gmra.mxu0 %vm154_vm1, %v7439_v61 }
 0x47b   :  { %8757 = vst [vmem:[#allocation14_spill] sm:$0xff] %v7590_v19  ;;  %6355 = vmatmul.msk.f32.vlgmr.msrb.gmra.mxu1 %vm154_vm1, %v7439_v61  ;;  %v7594_v47 = vpop.permute.xlu0 %2480  ;;  %v7596_v51 = vpop.permute.xlu2 %2682  ;;  %vm2488_vm1 = vcmp.lt.s32.totalorder %v6558_v35, 120 }
 0x47f   :  { %v7598_v42 = vpop.f32.mrf.mxu0  ;;  %3668 = vrot.lane.b32.xlu1 %v7457_v57, %s6427_s12 }
 0x480   :  { %8758 = vst [vmem:[#allocation15_spill] sm:$0xff] %v7598_v42  ;;  %v7600_v49 = vpop.f32.mrf.mxu1  ;;  %v7608_v60 = vpop.f32.mrf.mxu2 }
 0x481   :  { %8759 = vst [vmem:[#allocation16_spill] sm:$0xff] %v7600_v49  ;;  %3664 = vrot.lane.b32.xlu2 %v7414_v48, %s6427_s12  ;;  %3666 = vrot.lane.b32.xlu0 %v7417_v16, %s6427_s12  ;;  %v7610_v61 = vpop.permute.xlu1 %2680  ;;  %v7612_v29 = vpop.f32.mrf.mxu3 }
 0x482   :  { %8760 = vst [vmem:[#allocation17_spill] sm:$0xff] %v7608_v60 }
 0x483   :  { %8761 = vst [vmem:[#allocation18_spill] sm:$0xff] %v7612_v29  ;;  %v7614_v56 = vpop.permute.xlu0 %2672  ;;  %v7616_v62 = vpop.permute.xlu2 %2876 }
 0x487   :  { %v7618_v5 = vpop.f32.mrf.mxu0  ;;  %3674 = vrot.lane.b32.xlu1 %v7447_v54, %s6427_s12 }
 0x488   :  { %8762 = vst [vmem:[#allocation19_spill] sm:$0xff] %v7618_v5  ;;  %v7620_v6 = vpop.f32.mrf.mxu1  ;;  %v7628_v48 = vpop.f32.mrf.mxu2 }
 0x489   :  { %8763 = vst [vmem:[#allocation20_spill] sm:$0xff] %v7620_v6  ;;  %3860 = vrot.lane.b32.xlu0 %v7493_v9, %s6435_s0  ;;  %3858 = vrot.lane.b32.xlu2 %v7488_v8, %s6435_s0  ;;  %v7630_v16 = vpop.permute.xlu1 %2674  ;;  %v7632_v57 = vpop.f32.mrf.mxu3 }
 0x48a   :  { %8764 = vst [vmem:[#allocation21_spill] sm:$0xff] %v7628_v48 }
 0x48b   :  { %8765 = vst [vmem:[#allocation22_spill] sm:$0xff] %v7632_v57  ;;  %v7634_v2 = vpop.permute.xlu0 %2678  ;;  %v7636_v10 = vpop.permute.xlu2 %2882 }
 0x48f   :  { %v7638_v21 = vpop.f32.mrf.mxu0  ;;  %3868 = vrot.lane.b32.xlu1 %v7524_v17, %s6435_s0 }
 0x490   :  { %8766 = vst [vmem:[#allocation23_spill] sm:$0xff] %v7638_v21  ;;  %v7640_v54 = vpop.f32.mrf.mxu1  ;;  %v7648_v8 = vpop.f32.mrf.mxu2 }
 0x491   :  { %8767 = vst [vmem:[#allocation24_spill] sm:$0xff] %v7640_v54  ;;  %3672 = vrot.lane.b32.xlu0 %v7441_v50, %s6427_s12  ;;  %3864 = vrot.lane.b32.xlu2 %v7476_v41, %s6435_s0  ;;  %v7650_v9 = vpop.permute.xlu1 %2868  ;;  %v7652_v27 = vpop.f32.mrf.mxu3  ;;  %s6440_s12 = smov 108  }
 0x492   :  { %8768 = vst [vmem:[#allocation25_spill] sm:$0xff] %v7648_v8 }
 0x493   :  { %8769 = vst [vmem:[#allocation26_spill] sm:$0xff] %v7652_v27  ;;  %v7654_v57 = vpop.permute.xlu0 %2684  ;;  %v7656_v48 = vpop.permute.xlu2 %3076 }
 0x497   :  { %v7658_v54 = vpop.f32.mrf.mxu0  ;;  %3862 = vrot.lane.b32.xlu1 %v7470_v58, %s6435_s0 }
 0x498   :  { %8770 = vst [vmem:[#allocation27_spill] sm:$0xff] %v7658_v54  ;;  %v7660_v21 = vpop.f32.mrf.mxu1  ;;  %v7667_v50 = vpop.f32.mrf.mxu2 }
 0x499   :  { %8771 = vst [vmem:[#allocation28_spill] sm:$0xff] %v7660_v21  ;;  %4058 = vrot.lane.b32.xlu2 %v3933_v34, %s6436_s10  ;;  %3866 = vrot.lane.b32.xlu0 %v7520_v15, %s6435_s0  ;;  %v7669_v41 = vpop.permute.xlu1 %2874  ;;  %v7671_v17 = vpop.f32.mrf.mxu3 }
 0x49a   :  { %8772 = vst [vmem:[#allocation29_spill] sm:$0xff] %v7667_v50 }
 0x49b   :  { %8773 = vst [vmem:[#allocation30_spill] sm:$0xff] %v7671_v17  ;;  %v7673_v27 = vpop.permute.xlu0 %2878  ;;  %v7675_v8 = vpop.permute.xlu2 %3070 }
 0x49f   :  { %v7677_v21 = vpop.f32.mrf.mxu0  ;;  %4056 = vrot.lane.b32.xlu1 %v7550_v33, %s6436_s10 }
 0x4a0   :  { %8774 = vst [vmem:[#allocation31_spill] sm:$0xff] %v7677_v21  ;;  %v7679_v54 = vpop.f32.mrf.mxu1  ;;  %v7687_v58 = vpop.f32.mrf.mxu2 }
 0x4a1   :  { %8775 = vst [vmem:[#allocation32_spill] sm:$0xff] %v7679_v54  ;;  %3870 = vrot.lane.b32.xlu2 %v7502_v3, %s6435_s0  ;;  %3872 = vrot.lane.b32.xlu0 %v7508_v12, %s6435_s0  ;;  %v7689_v15 = vpop.permute.xlu1 %3068  ;;  %v7691_v34 = vpop.f32.mrf.mxu3 }
 0x4a2   :  { %8776 = vst [vmem:[#allocation33_spill] sm:$0xff] %v7687_v58 }
 0x4a3   :  { %8777 = vst [vmem:[#allocation34_spill] sm:$0xff] %v7691_v34  ;;  %v7693_v17 = vpop.permute.xlu0 %2872  ;;  %v7695_v50 = vpop.permute.xlu2 %3264 }
 0x4a7   :  { %v7697_v54 = vpop.f32.mrf.mxu0 }
 0x4a8   :  { %8778 = vst [vmem:[#allocation35_spill] sm:$0xff] %v7697_v54  ;;  %v7699_v21 = vpop.f32.mrf.mxu1  ;;  %v7703_v3 = vpop.f32.mrf.mxu2 }
 0x4a9   :  { %8779 = vst [vmem:[#allocation36_spill] sm:$0xff] %v7699_v21  ;;  %4060 = vrot.lane.b32.xlu0 %v7532_v24, %s6436_s10  ;;  %v7705_v12 = vpop.permute.xlu1 %2880  ;;  %v7707_v33 = vpop.f32.mrf.mxu3 }
 0x4aa   :  { %8780 = vst [vmem:[#allocation37_spill] sm:$0xff] %v7703_v3  ;;  %v2886_v49 = vsel %vm2884_vm8, %v7673_v27, %v7705_v12 }
 0x4ab   :  { %8781 = vst [vmem:[#allocation38_spill] sm:$0xff] %v7707_v33  ;;  %v7709_v58 = vpop.permute.xlu0 %3066  ;;  %v7711_v34 = vpop.permute.xlu2 %3270 }
 0x4af   :  { %v7713_v29 = vpop.f32.mrf.mxu0 }
 0x4b0   :  { %8782 = vst [vmem:[#allocation39_spill] sm:$0xff] %v7713_v29  ;;  %v7715_v60 = vpop.f32.mrf.mxu1  ;;  %v7717_v54 = vpop.f32.mrf.mxu2 }
 0x4b1   :  { %8783 = vst [vmem:[#allocation40_spill] sm:$0xff] %v7715_v60  ;;  %v7719_v21 = vpop.permute.xlu1 %3074  ;;  %v7721_v6 = vpop.f32.mrf.mxu3 }
 0x4b2   :  { %8784 = vst [vmem:[#allocation41_spill] sm:$0xff] %v7717_v54 }
 0x4b3   :  { %8785 = vst [vmem:[#allocation42_spill] sm:$0xff] %v7721_v6  ;;  %v7723_v24 = vpop.permute.xlu0 %3072  ;;  %v7725_v3 = vpop.permute.xlu2 %3464 }
 0x4b7   :  { %v7727_v5 = vpop.f32.mrf.mxu0 }
 0x4b8   :  { %8786 = vst [vmem:[#allocation43_spill] sm:$0xff] %v7727_v5  ;;  %v7729_v33 = vpop.f32.mrf.mxu1  ;;  %v7731_v19 = vpop.f32.mrf.mxu2  ;;  %v2490_v5 = vsel %vm2488_vm1, %v7562_v36, %v7482_v4 }
 0x4b9   :  { %8787 = vst [vmem:[#allocation44_spill] sm:$0xff] %v7729_v33  ;;  %v7733_v40 = vpop.permute.xlu1 %3080  ;;  %v7735_v29 = vpop.f32.mrf.mxu3 }
 0x4ba   :  { %8788 = vst [vmem:[#allocation45_spill] sm:$0xff] %v7731_v19  ;;  %v2688_v19 = vsel %vm2686_vm5, %v7610_v61, %v7596_v51 }
 0x4bb   :  { %8789 = vst [vmem:[#allocation46_spill] sm:$0xff] %v7735_v29  ;;  %v7739_v54 = vpop.permute.xlu0 %3266  ;;  %v7741_v6 = vpop.permute.xlu2 %3276  ;;  %v2300_v29 = vsel %vm2298_vm6, %v7478_v20, %v7504_v11 }
 0x4bc   :  { %v2502_v33 = vadd.f32 %v2490_v5, %v2300_v29 }
 0x4be   :  { %v2700_v22 = vadd.f32 %v2688_v19, %v2502_v33 }
 0x4bf   :  { %v7757_v60 = vpop.f32.mrf.mxu0 }
 0x4c0   :  { %8790 = vst [vmem:[#allocation47_spill] sm:$0xff] %v7757_v60  ;;  %v7763_v42 = vpop.f32.mrf.mxu1  ;;  %v7765_v38 = vpop.f32.mrf.mxu2  ;;  %v2898_v29 = vadd.f32 %v2886_v49, %v2700_v22  ;;  %v2495_v22 = vsel %vm2488_vm1, %v7534_v28, %v7420_v26 }
 0x4c1   :  { %8791 = vst [vmem:[#allocation48_spill] sm:$0xff] %v7763_v42  ;;  %v3275_v23 = vpop.permute.xlu1 %3274  ;;  %v7768_v25 = vpop.f32.mrf.mxu3  ;;  %v2496_v42 = vsel %vm2488_vm1, %v7586_v52, %v7534_v28  ;;  %v2306_v28 = vsel %vm2298_vm6, %v7540_v31, %v7443_v18 }
 0x4c2   :  { %8792 = vst [vmem:[#allocation49_spill] sm:$0xff] %v7765_v38  ;;  %v3282_v60 = vsel %vm3280_vm9, %v3275_v23, %v7741_v6  ;;  %v2504_v43 = vadd.f32 %v2496_v42, %v2306_v28  ;;  %v2687_v42 = vsel %vm2686_vm5, %v7596_v51, %v7654_v57  ;;  %v3089_v51 = vsel %vm3082_vm11, %v7709_v58, %v7689_v15 }
 0x4c3   :  { %8793 = vst [vmem:[#allocation50_spill] sm:$0xff] %v7768_v25  ;;  %v3079_v5 = vpop.permute.xlu0 %3078  ;;  %v7774_v30 = vpop.permute.xlu2 %3470 }
 0x4c4   :  { %v3083_v19 = vsel %vm3082_vm11, %v3079_v5, %v7733_v40  ;;  %v3084_v33 = vsel %vm3082_vm11, %v7656_v48, %v3079_v5 }
 0x4c5   :  { %v3096_v38 = vadd.f32 %v3084_v33, %v2898_v29  ;;  %v2305_v29 = vsel %vm2298_vm6, %v7443_v18, %v7372_v39  ;;  %v2891_v18 = vsel %vm2884_vm8, %v7650_v9, %v7572_v7 }
 0x4c6   :  { %v2497_v33 = vadd.f32 %v2495_v22, %v2305_v29 }
 0x4c7   :  { %v7786_v49 = vadd.f32 %v3282_v60, %v3096_v38  ;;  %v7788_v25 = vpop.f32.mrf.mxu0  ;;  %v2299_v38 = vsel %vm2298_vm6, %v7504_v11, %v7540_v31  ;;  %v2693_v60 = vsel %vm2686_vm5, %v7514_v14, %v7614_v56  ;;  %v2694_v11 = vsel %vm2686_vm5, %v7654_v57, %v7514_v14 }
 0x4c8   :  { %8794 = vst [vmem:[#allocation51_spill] sm:$0xff] %v7788_v25  ;;  %v7794_v0 = vpop.f32.mrf.mxu1  ;;  %v7808_v5 = vpop.f32.mrf.mxu2  ;;  %v2489_v25 = vsel %vm2488_vm1, %v7482_v4, %v7586_v52  ;;  %v2695_v52 = vadd.f32 %v2693_v60, %v2497_v33  ;;  %v2302_v60 = vsel %vm2298_vm6, %v7472_v59, %v7393_v53  ;;  %v2702_v63 = vadd.f32 %v2694_v11, %v2504_v43 }
 0x4c9   :  { %8795 = vst [vmem:[#allocation52_spill] sm:$0xff] %v7794_v0  ;;  %v7822_v0 = vpop.permute.xlu1 %3268  ;;  %v7851_v28 = vpop.f32.mrf.mxu3  ;;  %v2503_v33 = vadd.f32 %v2489_v25, %v2299_v38  ;;  %v2491_v57 = vsel %vm2488_vm1, %v7594_v47, %v7562_v36  ;;  %v2885_v43 = vsel %vm2884_vm8, %v7705_v12, %v7636_v10  ;;  %v2690_v38 = vsel %vm2686_vm5, %v7544_v32, %v7634_v2 }
 0x4ca   :  { %8796 = vst [vmem:[#allocation53_spill] sm:$0xff] %v7808_v5  ;;  %v2492_v5 = vsel %vm2488_vm1, %v7451_v55, %v7594_v47  ;;  %v7836_v4 = vsel %vm3280_vm9, %v7822_v0, %v7711_v34  ;;  %v2892_v36 = vsel %vm2884_vm8, %v7636_v10, %v7650_v9  ;;  %v3090_v12 = vsel %vm3082_vm11, %v7733_v40, %v7709_v58 }
 0x4cb   :  { %v3273_v14 = vpop.permute.xlu0 %3272  ;;  %v7838_v31 = vpop.permute.xlu2 %3476  ;;  %v2500_v25 = vadd.f32 %v2492_v5, %v2302_v60  ;;  %v2701_v11 = vadd.f32 %v2687_v42, %v2503_v33  ;;  %v2689_v10 = vsel %vm2686_vm5, %v7634_v2, %v7610_v61  ;;  %v2888_v40 = vsel %vm2884_vm8, %v7669_v41, %v7616_v62 }
 0x4cc   :  { %v7846_v22 = vsel %vm3280_vm9, %v3273_v14, %v3275_v23  ;;  %v3284_v29 = vsel %vm3280_vm9, %v7711_v34, %v3273_v14  ;;  %v2301_v23 = vsel %vm2298_vm6, %v7393_v53, %v7478_v20  ;;  %v2893_v34 = vadd.f32 %v2891_v18, %v2695_v52 }
 0x4cd   :  { %v3287_v53 = vsel %vm3280_vm9, %v7695_v50, %v7739_v54  ;;  %v2501_v18 = vadd.f32 %v2491_v57, %v2301_v23  ;;  %v2900_v14 = vadd.f32 %v2892_v36, %v2702_v63  ;;  %v2899_v52 = vadd.f32 %v2885_v43, %v2701_v11 }
 0x4ce   :  { %v3091_v47 = vadd.f32 %v3089_v51, %v2893_v34  ;;  %v2698_v9 = vadd.f32 %v2690_v38, %v2500_v25  ;;  %v2887_v2 = vsel %vm2884_vm8, %v7616_v62, %v7673_v27  ;;  %v3086_v38 = vsel %vm3082_vm11, %v7723_v24, %v7719_v21 }
 0x4cf   :  { %v7881_v20 = vpop.f32.mrf.mxu0  ;;  %v3098_v33 = vadd.f32 %v3090_v12, %v2900_v14  ;;  %v3097_v51 = vadd.f32 %v3083_v19, %v2899_v52  ;;  %v2699_v25 = vadd.f32 %v2689_v10, %v2501_v18  ;;  %v2494_v62 = vsel %vm2488_vm1, %v7420_v26, %v7568_v37 }
 0x4d0   :  { %v7891_v5 = vpop.f32.mrf.mxu1  ;;  %v7894_v42 = vpop.f32.mrf.mxu2  ;;  %v3289_v58 = vadd.f32 %v3287_v53, %v3091_v47  ;;  %v3085_v27 = vsel %vm3082_vm11, %v7719_v21, %v7656_v48  ;;  %v2304_v18 = vsel %vm2298_vm6, %v7372_v39, %v7510_v13  ;;  %v2493_v26 = vsel %vm2488_vm1, %v7568_v37, %v7451_v55 }
 0x4d1   :  { %v3463_v60 = vpop.permute.xlu1 %3462  ;;  %v2897_v36 = vadd.f32 %v2887_v2, %v2699_v25  ;;  %v2692_v48 = vsel %vm2686_vm5, %v7614_v56, %v7630_v16  ;;  %v2498_v52 = vadd.f32 %v2494_v62, %v2304_v18  ;;  %v2303_v39 = vsel %vm2298_vm6, %v7510_v13, %v7472_v59 }
 0x4d2   :  { %v3485_v63 = vsel %vm3478_vm13, %v3463_v60, %v7725_v3  ;;  %v3486_v57 = vsel %vm3478_vm13, %v7838_v31, %v3463_v60  ;;  %v2691_v55 = vsel %vm2686_vm5, %v7630_v16, %v7544_v32  ;;  %v2890_v37 = vsel %vm2884_vm8, %v7572_v7, %v7693_v17 }
 0x4d3   :  { %v3279_v23 = vpop.permute.xlu0 %3278  ;;  %v7910_v61 = vpop.permute.xlu2 %3670  ;;  %v7922_v43 = vadd.f32 %v3485_v63, %v3289_v58  ;;  %v3095_v10 = vadd.f32 %v3085_v27, %v2897_v36  ;;  %v2499_v58 = vadd.f32 %v2493_v26, %v2303_v39  ;;  %v2696_v60 = vadd.f32 %v2692_v48, %v2498_v52 }
 0x4d4   :  { %v3281_v19 = vsel %vm3280_vm9, %v7741_v6, %v3279_v23  ;;  %v3288_v34 = vsel %vm3280_vm9, %v3279_v23, %v7695_v50  ;;  %v2896_v6 = vadd.f32 %v2888_v40, %v2698_v9  ;;  %v7938_v50 = vpop.f32.mrf.mxu3  ;;  %v2889_v13 = vsel %vm2884_vm8, %v7693_v17, %v7669_v41 }
 0x4d5   :  { %v7928_v11 = vadd.f32 %v3281_v19, %v3097_v51  ;;  %v3296_v53 = vadd.f32 %v3288_v34, %v3098_v33  ;;  %v3293_v33 = vadd.f32 %v7846_v22, %v3095_v10  ;;  %v2697_v16 = vadd.f32 %v2691_v55, %v2499_v58 }
 0x4d6   :  { %v3094_v21 = vadd.f32 %v3086_v38, %v2896_v6  ;;  %v3087_v63 = vsel %vm3082_vm11, %v7675_v8, %v7723_v24  ;;  %v3286_v41 = vsel %vm3280_vm9, %v7739_v54, %v7822_v0  ;;  %vm5464_vm5 = vcmp.ge.s32.totalorder %v6568_v45, 7  ;;  %vm5479_vm9 = vmand %vm5463_vm4, %vm2298_vm6 }
 0x4d7   :  { %v7940_v47 = vadd.f32 %v3486_v57, %v3296_v53  ;;  %v7942_v12 = vpop.f32.mrf.mxu0  ;;  %v2895_v57 = vadd.f32 %v2889_v13, %v2697_v16  ;;  %vm5472_vm8 = vcmp.lt.s32.totalorder %v6568_v45, 121  ;;  %vm5474_vm6 = vcmp.lt.s32.totalorder %v6570_v46, 121  ;;  %v8797_v13 = vld [vmem:[#allocation6_spill] sm:$0xff] }
 0x4d8   :  { %v7956_v14 = vpop.f32.mrf.mxu1  ;;  %v5360_v9 = vpop.f32.mrf.mxu2  ;;  %v3292_v56 = vadd.f32 %v3284_v29, %v3094_v21  ;;  %v2894_v29 = vadd.f32 %v2890_v37, %v2696_v60  ;;  %vm5476_vm4 = vcmp.lt.s32.totalorder %v8797_v13, 121 }
 0x4d9   :  { %v3469_v40 = vpop.permute.xlu1 %3468  ;;  %v3093_v25 = vadd.f32 %v3087_v63, %v2895_v57  ;;  %v5505_v48 = vsel %vm5481_vm3, %v5360_v9, 0.0  ;;  %vm5468_vm3 = vcmp.ge.s32.totalorder %v8797_v13, 7 }
 0x4da   :  { %v3482_v59 = vsel %vm3478_vm13, %v3469_v40, %v7774_v30 }
 0x4db   :  { %v3473_v51 = vpop.permute.xlu0 %3472  ;;  %v7981_v7 = vadd.f32 %v3482_v59, %v3292_v56  ;;  %v7985_v22 = vpop.permute.xlu2 %3664 }
 0x4dc   :  { %v3481_v32 = vsel %vm3478_vm13, %v7774_v30, %v3473_v51  ;;  %v3088_v30 = vsel %vm3082_vm11, %v7689_v15, %v7675_v8  ;;  %v7999_v17 = vpop.f32.mrf.mxu3  ;;  %v3291_v8 = vadd.f32 %v7836_v4, %v3093_v25  ;;  %vm5480_vm11 = vmand %vm5464_vm5, %vm5472_vm8 }
 0x4dd   :  { %v7983_v23 = vadd.f32 %v3481_v32, %v3293_v33  ;;  %v3092_v34 = vadd.f32 %v3088_v30, %v2894_v29  ;;  %vm5483_vm8 = vmand %vm5467_vm15, %vm5475_vm2 }
 0x4df   :  { %v5320_v2 = vpop.f32.mrf.mxu0  ;;  %v3290_v53 = vadd.f32 %v3286_v41, %v3092_v34 }
 0x4e0   :  { %v5340_v19 = vpop.f32.mrf.mxu1  ;;  %v8002_v24 = vpop.f32.mrf.mxu2  ;;  %v5503_v58 = vsel %vm5479_vm9, %v5320_v2, 0.0  ;;  %vm5484_vm9 = vmand %vm5468_vm3, %vm5476_vm4 }
 0x4e1   :  { %v3663_v38 = vpop.permute.xlu1 %3662 }
 0x4e2   :  { %v3682_v0 = vsel %vm3676_vm12, %v3663_v38, %v7985_v22 }
 0x4e3   :  { %v3467_v15 = vpop.permute.xlu0 %3466  ;;  %v8017_v4 = vpop.permute.xlu2 %3858 }
 0x4e4   :  { %v3483_v54 = vsel %vm3478_vm13, %v3467_v15, %v3469_v40  ;;  %v3484_v62 = vsel %vm3478_vm13, %v7725_v3, %v3467_v15  ;;  %v8022_v52 = vpop.f32.mrf.mxu3 }
 0x4e5   :  { %v3488_v6 = vadd.f32 %v3484_v62, %v3290_v53  ;;  %v3489_v27 = vadd.f32 %v3483_v54, %v3291_v8 }
 0x4e7   :  { %v8015_v36 = vadd.f32 %v3682_v0, %v3488_v6  ;;  %v5400_v18 = vpop.f32.mrf.mxu0  ;;  %v8800_v0 = vld [vmem:[#allocation5_spill] sm:$0xff] }
 0x4e8   :  { %v5420_v26 = vpop.f32.mrf.mxu1  ;;  %v5603_v21 = vpop.f32.mrf.mxu2  ;;  %v5507_v25 = vsel %vm5483_vm8, %v5400_v18, 0.0  ;;  %vm5923_vm8 = vcmp.lt.s32.totalorder %v6558_v35, 64 }
 0x4e9   :  { %v3475_v3 = vpop.permute.xlu1 %3474  ;;  %v8024_v10 = vadd.f32 %v5603_v21, %v5505_v48  ;;  %v5508_v53 = vsel %vm5484_vm9, %v5420_v26, 0.0  ;;  %vm5062_vm9 = vcmp.lt.s32.totalorder %v6558_v35, 107 }
 0x4ea   :  { %v3479_v39 = vsel %vm3478_vm13, %v3475_v3, %v7838_v31  ;;  %v3480_v55 = vsel %vm3478_vm13, %v3473_v51, %v3475_v3  ;;  %vm5466_vm13 = vcmp.ge.s32.totalorder %v6570_v46, 7 }
 0x4eb   :  { %v3661_v9 = vpop.permute.xlu0 %3660  ;;  %v8034_v37 = vadd.f32 %v3480_v55, %v7786_v49  ;;  %v8037_v56 = vadd.f32 %v3479_v39, %v7928_v11  ;;  %5718 = vrot.lane.b32.xlu0 %v8024_v10, %s6420_s19  ;;  %v5504_v49 = vsel %vm5480_vm11, %v5340_v19, 0.0  ;;  %v8050_v51 = vpop.permute.xlu2 %3864  ;;  %vm8058_vm5 = vmand %vm5466_vm13, %vm5474_vm6  ;;  %vm5469_vm11 = vcmp.ge.s32.totalorder %v8800_v0, 7 }
 0x4ec   :  { %v3683_v40 = vsel %vm3676_vm12, %v3661_v9, %v3663_v38  ;;  %v5623_v63 = vpop.f32.mrf.mxu3  ;;  %v5506_v34 = vsel %vm8058_vm5, %v7999_v17, 0.0  ;;  %vm5477_vm13 = vcmp.lt.s32.totalorder %v8800_v0, 121  ;;  %vm3874_vm6 = vcmp.lt.s32.totalorder %v6558_v35, 113 }
 0x4ed   :  { %v3685_v31 = vadd.f32 %v3683_v40, %v7922_v43  ;;  %v8077_v8 = vadd.f32 %v5623_v63, %v5506_v34  ;;  %vm5485_vm3 = vmand %vm5469_vm11, %vm5477_vm13  ;;  %v8805_v63 = vld [vmem:[#allocation12_spill] sm:$0xff]  ;;  %vm4864_vm5 = vcmp.lt.s32.totalorder %v6558_v35, 108  ;;  %vm5956_vm11 = vcmp.lt.s32.totalorder %v6558_v35, 100 }
 0x4ee   :  { %v5509_v3 = vsel %vm5485_vm3, %v8002_v24, 0.0  ;;  %vm5978_vm13 = vcmp.lt.s32.totalorder %v6568_v45, 100  ;;  %vm5982_vm3 = vcmp.lt.s32.totalorder %v8797_v13, 100 }
 0x4ef   :  { %v5563_v60 = vpop.f32.mrf.mxu0 }
 0x4f0   :  { %v8046_v33 = vadd.f32 %v5563_v60, %v5503_v58  ;;  %v5583_v11 = vpop.f32.mrf.mxu1  ;;  %v5683_v26 = vpop.f32.mrf.mxu2  ;;  %v8802_v60 = vld [vmem:[#allocation8_spill] sm:$0xff] }
 0x4f1   :  { %v8052_v59 = vadd.f32 %v5583_v11, %v5504_v49  ;;  %v3669_v43 = vpop.permute.xlu1 %3668  ;;  %v8102_v55 = vadd.f32 %v5683_v26, %v5509_v3 }
 0x4f2   :  { %5714 = vrot.lane.b32.xlu1 %v8046_v33, %s6420_s19  ;;  %v3679_v29 = vsel %vm3676_vm12, %v3669_v43, %v7910_v61 }
 0x4f3   :  { %v3667_v16 = vpop.permute.xlu0 %3666  ;;  %5716 = vrot.lane.b32.xlu2 %v8052_v59, %s6420_s19  ;;  %v3689_v30 = vadd.f32 %v3679_v29, %v7983_v23  ;;  %v4059_v54 = vpop.permute.xlu2 %4058 }
 0x4f4   :  { %v3681_v57 = vsel %vm3676_vm12, %v7985_v22, %v3667_v16  ;;  %v3680_v2 = vsel %vm3676_vm12, %v3667_v16, %v3669_v43  ;;  %v5703_v21 = vpop.f32.mrf.mxu3  ;;  %v8803_v16 = vld [vmem:[#allocation11_spill] sm:$0xff] }
 0x4f5   :  { %v3687_v41 = vadd.f32 %v3681_v57, %v3489_v27  ;;  %v3688_v19 = vadd.f32 %v3680_v2, %v7981_v7  ;;  %v8801_v7 = vld [vmem:[#allocation7_spill] sm:$0xff] }
 0x4f6   :  { %vm5470_vm15 = vcmp.ge.s32.totalorder %v8801_v7, 7  ;;  %vm5478_vm2 = vcmp.lt.s32.totalorder %v8801_v7, 121 }
 0x4f7   :  { %v5643_v38 = vpop.f32.mrf.mxu0  ;;  %vm5486_vm4 = vmand %vm5470_vm15, %vm5478_vm2  ;;  %vm5980_vm15 = vcmp.lt.s32.totalorder %v6570_v46, 100  ;;  %vm5981_vm2 = vcmp.lt.s32.totalorder %v6606_v1, 100 }
 0x4f8   :  { %v8079_v15 = vadd.f32 %v5643_v38, %v5507_v25  ;;  %v5663_v22 = vpop.f32.mrf.mxu1  ;;  %v5510_v39 = vsel %vm5486_vm4, %v8022_v52, 0.0  ;;  %vm5983_vm4 = vcmp.lt.s32.totalorder %v8800_v0, 100 }
 0x4f9   :  { %v8083_v23 = vadd.f32 %v5663_v22, %v5508_v53  ;;  %v3675_v17 = vpop.permute.xlu1 %3674 }
 0x4fa   :  { %5720 = vrot.lane.b32.xlu1 %v8077_v8, %s6420_s19  ;;  %v3684_v6 = vsel %vm3676_vm12, %v3675_v17, %v3661_v9  ;;  %v8104_v9 = vadd.f32 %v5703_v21, %v5510_v39 }
 0x4fb   :  { %v3861_v62 = vpop.permute.xlu0 %3860  ;;  %5724 = vrot.lane.b32.xlu0 %v8083_v23, %s6420_s19  ;;  %5722 = vrot.lane.b32.xlu2 %v8079_v15, %s6420_s19  ;;  %v3692_v18 = vadd.f32 %v3684_v6, %v7940_v47  ;;  %v3871_v52 = vpop.permute.xlu2 %3870 }
 0x4fc   :  { %v3881_v27 = vsel %vm3874_vm6, %v8017_v4, %v3861_v62 }
 0x4fd   :  { %v3883_v48 = vadd.f32 %v3881_v27, %v3685_v31 }
 0x501   :  { %v3869_v40 = vpop.permute.xlu1 %3868 }
 0x502   :  { %5726 = vrot.lane.b32.xlu1 %v8102_v55, %s6420_s19  ;;  %v3876_v11 = vsel %vm3874_vm6, %v3869_v40, %v3871_v52 }
 0x503   :  { %v3673_v58 = vpop.permute.xlu0 %3672  ;;  %4062 = vrot.lane.b32.xlu0 %v8802_v60, %s6436_s10  ;;  %5728 = vrot.lane.b32.xlu2 %v8104_v9, %s6420_s19  ;;  %s6437_s19 = smov 111  }
 0x504   :  { %v3677_v47 = vsel %vm3676_vm12, %v3673_v58, %v3675_v17  ;;  %v3678_v24 = vsel %vm3676_vm12, %v7910_v61, %v3673_v58  ;;  %vm4072_vm12 = vcmp.lt.s32.totalorder %v6558_v35, 112  ;;  %v8806_v17 = vld [vmem:[#allocation10_spill] sm:$0xff] }
 0x505   :  { %v3690_v31 = vadd.f32 %v3678_v24, %v8034_v37  ;;  %v3691_v49 = vadd.f32 %v3677_v47, %v8037_v56  ;;  %v8804_v37 = vld [vmem:[#allocation9_spill] sm:$0xff] }
 0x507   :  { %v8121_v43 = vadd.f32 %v3876_v11, %v3690_v31 }
 0x509   :  { %v3863_v32 = vpop.permute.xlu1 %3862 }
 0x50a   :  { %4064 = vrot.lane.b32.xlu1 %v8803_v16, %s6436_s10  ;;  %v3879_v29 = vsel %vm3874_vm6, %v3863_v32, %v8050_v51  ;;  %v3880_v61 = vsel %vm3874_vm6, %v3861_v62, %v3863_v32 }
 0x50b   :  { %4068 = vrot.lane.b32.xlu0 %v8804_v37, %s6436_s10  ;;  %v3867_v56 = vpop.permute.xlu0 %3866  ;;  %4066 = vrot.lane.b32.xlu2 %v8805_v63, %s6436_s10  ;;  %v3884_v57 = vadd.f32 %v3880_v61, %v8015_v36  ;;  %v3885_v2 = vadd.f32 %v3879_v29, %v3687_v41  ;;  %v8807_v41 = vld [vmem:[#allocation15_spill] sm:$0xff] }
 0x50c   :  { %v3877_v34 = vsel %vm3874_vm6, %v3867_v56, %v3869_v40  ;;  %v3878_v25 = vsel %vm3874_vm6, %v8050_v51, %v3867_v56 }
 0x50d   :  { %v3886_v38 = vadd.f32 %v3878_v25, %v3688_v19  ;;  %v3887_v53 = vadd.f32 %v3877_v34, %v3689_v30 }
 0x511   :  { %v8141_v22 = vpop.permute.xlu1 %4056 }
 0x512   :  { %4070 = vrot.lane.b32.xlu1 %v8806_v17, %s6436_s10  ;;  %v4079_v36 = vsel %vm4072_vm12, %v8141_v22, %v4059_v54 }
 0x513   :  { %v3873_v62 = vpop.permute.xlu0 %3872  ;;  %4254 = vrot.lane.b32.xlu2 %v8807_v41, %s6437_s19  ;;  %v8155_v19 = vadd.f32 %v4079_v36, %v3883_v48  ;;  %v8808_v41 = vld [vmem:[#allocation16_spill] sm:$0xff] }
 0x514   :  { %v3875_v51 = vsel %vm3874_vm6, %v3871_v52, %v3873_v62  ;;  %v3882_v30 = vsel %vm3874_vm6, %v3873_v62, %v8017_v4  ;;  %vm5979_vm6 = vcmp.lt.s32.totalorder %v6566_v44, 100 }
 0x515   :  { %v8157_v6 = vadd.f32 %v3875_v51, %v3691_v49  ;;  %v8159_v27 = vadd.f32 %v3882_v30, %v3692_v18  ;;  %v8809_v51 = vld [vmem:[#allocation13_spill] sm:$0xff]  ;;  %v8810_v30 = vld [vmem:[#allocation14_spill] sm:$0xff] }
 0x51b   :  { %v4061_v26 = vpop.permute.xlu0 %4060 }
 0x51c   :  { %v4078_v21 = vsel %vm4072_vm12, %v4059_v54, %v4061_v26 }
 0x51d   :  { %v8163_v3 = vadd.f32 %v4078_v21, %v3884_v57  ;;  %v8812_v21 = vld [vmem:[#allocation20_spill] sm:$0xff] }
 0x54d   :  { %v5717_v39 = vpop.permute.xlu2 %5716 }
 0x555   :  { %v5723_v47 = vpop.permute.xlu2 %5722 }
 0x55d   :  { %v5719_v40 = vpop.permute.xlu0 %5718  ;;  %v5729_v32 = vpop.permute.xlu2 %5728 }
 0x55e   :  { %v5735_v58 = vsel %vm563_vm7, %v5717_v39, %v5719_v40 }
 0x55f   :  { %v5739_v60 = vadd.f32 %v5735_v58, %v8052_v59 }
 0x561   :  { %5748 = vrot.lane.b32.xlu1 %v5739_v60, %s6423_s25 }
 0x564   :  { %v5715_v4 = vpop.permute.xlu1 %5714 }
 0x565   :  { %v5736_v18 = vsel %vm563_vm7, %v5715_v4, %v5717_v39  ;;  %v5737_v16 = vsel %vm563_vm7, %v5729_v32, %v5715_v4  ;;  %v4067_v34 = vpop.permute.xlu2 %4066 }
 0x566   :  { %v5738_v48 = vadd.f32 %v5736_v18, %v8046_v33  ;;  %v5745_v63 = vadd.f32 %v5737_v16, %v8104_v9 }
 0x568   :  { %5746 = vrot.lane.b32.xlu0 %v5738_v48, %s6423_s25 }
 0x56c   :  { %v5721_v54 = vpop.permute.xlu1 %5720 }
 0x56d   :  { %v5725_v24 = vpop.permute.xlu0 %5724  ;;  %v5733_v52 = vsel %vm563_vm7, %v5721_v54, %v5723_v47  ;;  %v5734_v31 = vsel %vm563_vm7, %v5719_v40, %v5721_v54 }
 0x56e   :  { %v5732_v59 = vsel %vm563_vm7, %v5723_v47, %v5725_v24  ;;  %v5740_v49 = vadd.f32 %v5734_v31, %v8024_v10  ;;  %v5741_v11 = vadd.f32 %v5733_v52, %v8077_v8 }
 0x56f   :  { %v5742_v33 = vadd.f32 %v5732_v59, %v8079_v15 }
 0x570   :  { %5750 = vrot.lane.b32.xlu2 %v5740_v49, %s6423_s25  ;;  %5752 = vrot.lane.b32.xlu0 %v5741_v11, %s6423_s25 }
 0x571   :  { %5754 = vrot.lane.b32.xlu1 %v5742_v33, %s6423_s25 }
 0x574   :  { %v5727_v29 = vpop.permute.xlu1 %5726 }
 0x575   :  { %v4063_v61 = vpop.permute.xlu0 %4062  ;;  %v5730_v37 = vsel %vm563_vm7, %v5727_v29, %v5729_v32  ;;  %v5731_v10 = vsel %vm563_vm7, %v5725_v24, %v5727_v29  ;;  %vm4270_vm7 = vcmp.lt.s32.totalorder %v6558_v35, 111 }
 0x576   :  { %v4077_v8 = vsel %vm4072_vm12, %v4061_v26, %v4063_v61  ;;  %v5743_v15 = vadd.f32 %v5731_v10, %v8083_v23  ;;  %v5744_v56 = vadd.f32 %v5730_v37, %v8102_v55  ;;  %v8811_v26 = vld [vmem:[#allocation19_spill] sm:$0xff] }
 0x577   :  { %v8196_v57 = vadd.f32 %v4077_v8, %v3885_v2 }
 0x578   :  { %5756 = vrot.lane.b32.xlu2 %v5743_v15, %s6423_s25  ;;  %5758 = vrot.lane.b32.xlu0 %v5744_v56, %s6423_s25 }
 0x579   :  { %5760 = vrot.lane.b32.xlu1 %v5745_v63, %s6423_s25  ;;  %s6438_s25 = smov 110  }
 0x57c   :  { %v4065_v25 = vpop.permute.xlu1 %4064 }
 0x57d   :  { %v8201_v17 = vpop.permute.xlu0 %4068  ;;  %v4075_v62 = vsel %vm4072_vm12, %v4065_v25, %v4067_v34  ;;  %v4076_v23 = vsel %vm4072_vm12, %v4063_v61, %v4065_v25 }
 0x57e   :  { %v4074_v55 = vsel %vm4072_vm12, %v4067_v34, %v8201_v17  ;;  %v4084_v9 = vadd.f32 %v4076_v23, %v3886_v38  ;;  %v8210_v2 = vadd.f32 %v4075_v62, %v3887_v53  ;;  %v8813_v38 = vld [vmem:[#allocation17_spill] sm:$0xff] }
 0x57f   :  { %v8213_v36 = vadd.f32 %v4074_v55, %v8121_v43  ;;  %v8227_v43 = vpop.permute.xlu2 %4254 }
 0x580   :  { %4256 = vrot.lane.b32.xlu2 %v8808_v41, %s6437_s19  ;;  %4258 = vrot.lane.b32.xlu0 %v8809_v51, %s6437_s19 }
 0x581   :  { %4260 = vrot.lane.b32.xlu1 %v8810_v30, %s6437_s19 }
 0x584   :  { %v8229_v39 = vpop.permute.xlu1 %4070 }
 0x588   :  { %4262 = vrot.lane.b32.xlu2 %v8811_v26, %s6437_s19  ;;  %4264 = vrot.lane.b32.xlu0 %v8812_v21, %s6437_s19  ;;  %v8814_v21 = vld [vmem:[#allocation18_spill] sm:$0xff] }
 0x589   :  { %4266 = vrot.lane.b32.xlu1 %v8813_v38, %s6437_s19  ;;  %v8815_v38 = vld [vmem:[#allocation23_spill] sm:$0xff] }
 0x5ca   :  { %v5751_v53 = vpop.permute.xlu2 %5750 }
 0x5d2   :  { %v5757_v40 = vpop.permute.xlu2 %5756 }
 0x5d3   :  { %v5749_v58 = vpop.permute.xlu1 %5748 }
 0x5d4   :  { %v5767_v4 = vsel %vm1226_vm14, %v5749_v58, %v5751_v53 }
 0x5d5   :  { %v5771_v18 = vadd.f32 %v5767_v4, %v5739_v60 }
 0x5d7   :  { %5780 = vrot.lane.b32.xlu0 %v5771_v18, %s6425_s11 }
 0x5da   :  { %v5747_v47 = vpop.permute.xlu0 %5746  ;;  %v4257_v54 = vpop.permute.xlu2 %4256 }
 0x5db   :  { %v5768_v24 = vsel %vm1226_vm14, %v5747_v47, %v5749_v58  ;;  %v4277_v52 = vsel %vm4270_vm7, %v8227_v43, %v4257_v54 }
 0x5dc   :  { %v5770_v31 = vadd.f32 %v5768_v24, %v5738_v48  ;;  %v8241_v59 = vadd.f32 %v4277_v52, %v8155_v19 }
 0x5de   :  { %5778 = vrot.lane.b32.xlu2 %v5770_v31, %s6425_s11 }
 0x5e2   :  { %v5753_v60 = vpop.permute.xlu0 %5752  ;;  %v8265_v55 = vpop.permute.xlu2 %4262 }
 0x5e3   :  { %v5766_v32 = vsel %vm1226_vm14, %v5751_v53, %v5753_v60  ;;  %v5755_v16 = vpop.permute.xlu1 %5754  ;;  %v8816_v53 = vld [vmem:[#allocation24_spill] sm:$0xff] }
 0x5e4   :  { %v5772_v29 = vadd.f32 %v5766_v32, %v5740_v49  ;;  %v5764_v61 = vsel %vm1226_vm14, %v5755_v16, %v5757_v40  ;;  %v5765_v37 = vsel %vm1226_vm14, %v5753_v60, %v5755_v16 }
 0x5e5   :  { %v5773_v10 = vadd.f32 %v5765_v37, %v5741_v11  ;;  %v5774_v8 = vadd.f32 %v5764_v61, %v5742_v33 }
 0x5e6   :  { %5782 = vrot.lane.b32.xlu1 %v5772_v29, %s6425_s11 }
 0x5e7   :  { %5784 = vrot.lane.b32.xlu2 %v5773_v10, %s6425_s11  ;;  %5786 = vrot.lane.b32.xlu0 %v5774_v8, %s6425_s11 }
 0x5ea   :  { %v5759_v19 = vpop.permute.xlu0 %5758 }
 0x5eb   :  { %v5761_v48 = vpop.permute.xlu1 %5760  ;;  %v5763_v34 = vsel %vm1226_vm14, %v5757_v40, %v5759_v19  ;;  %v8817_v40 = vld [vmem:[#allocation21_spill] sm:$0xff] }
 0x5ec   :  { %v5769_v49 = vsel %vm1226_vm14, %v5761_v48, %v5747_v47  ;;  %v5762_v25 = vsel %vm1226_vm14, %v5759_v19, %v5761_v48  ;;  %v5775_v62 = vadd.f32 %v5763_v34, %v5743_v15  ;;  %vm4468_vm14 = vcmp.lt.s32.totalorder %v6558_v35, 110 }
 0x5ed   :  { %v8259_v11 = vadd.f32 %v5769_v49, %v5745_v63  ;;  %v5776_v33 = vadd.f32 %v5762_v25, %v5744_v56 }
 0x5ee   :  { %5788 = vrot.lane.b32.xlu1 %v5775_v62, %s6425_s11 }
 0x5ef   :  { %5790 = vrot.lane.b32.xlu2 %v5776_v33, %s6425_s11  ;;  %5792 = vrot.lane.b32.xlu0 %v8259_v11, %s6425_s11  ;;  %s6439_s11 = smov 109  }
 0x5f2   :  { %v4259_v23 = vpop.permute.xlu0 %4258 }
 0x5f3   :  { %v4261_v41 = vpop.permute.xlu1 %4260  ;;  %v4276_v51 = vsel %vm4270_vm7, %v4257_v54, %v4259_v23 }
 0x5f4   :  { %v4274_v15 = vsel %vm4270_vm7, %v4261_v41, %v8265_v55  ;;  %v4275_v56 = vsel %vm4270_vm7, %v4259_v23, %v4261_v41  ;;  %v8275_v63 = vadd.f32 %v4276_v51, %v8163_v3  ;;  %v8818_v3 = vld [vmem:[#allocation22_spill] sm:$0xff] }
 0x5f5   :  { %v8277_v30 = vadd.f32 %v4274_v15, %v4084_v9  ;;  %v8280_v26 = vadd.f32 %v4275_v56, %v8196_v57  ;;  %v8819_v9 = vld [vmem:[#allocation27_spill] sm:$0xff]  ;;  %v4073_v15 = vsel %vm4072_vm12, %v8201_v17, %v8229_v39  ;;  %v4080_v56 = vsel %vm4072_vm12, %v8229_v39, %v8141_v22 }
 0x5f6   :  { %4268 = vrot.lane.b32.xlu1 %v8814_v21, %s6437_s19 }
 0x5f7   :  { %4452 = vrot.lane.b32.xlu2 %v8815_v38, %s6438_s25  ;;  %4454 = vrot.lane.b32.xlu0 %v8816_v53, %s6438_s25 }
 0x5fa   :  { %v8294_v57 = vpop.permute.xlu0 %4264 }
 0x5fb   :  { %v8299_v24 = vpop.permute.xlu1 %4266 }
 0x5fe   :  { %4456 = vrot.lane.b32.xlu1 %v8817_v40, %s6438_s25 }
 0x5ff   :  { %4458 = vrot.lane.b32.xlu2 %v8818_v3, %s6438_s25  ;;  %4460 = vrot.lane.b32.xlu0 %v8819_v9, %s6438_s25  ;;  %v8820_v9 = vld [vmem:[#allocation28_spill] sm:$0xff] }
 0x638   :  { %v5779_v58 = vpop.permute.xlu2 %5778 }
 0x641   :  { %v5785_v52 = vpop.permute.xlu2 %5784 }
 0x649   :  { %v5781_v4 = vpop.permute.xlu0 %5780  ;;  %v5791_v34 = vpop.permute.xlu2 %5790 }
 0x64a   :  { %v5800_v47 = vsel %vm1874_vm10, %v5779_v58, %v5781_v4 }
 0x64b   :  { %v5802_v54 = vadd.f32 %v5800_v47, %v5770_v31  ;;  %v8823_v47 = vld [vmem:[#allocation31_spill] sm:$0xff] }
 0x64d   :  { %5810 = vrot.lane.b32.xlu1 %v5802_v54, %s6429_s3 }
 0x651   :  { %v4453_v38 = vpop.permute.xlu2 %4452 }
 0x658   :  { %v5783_v60 = vpop.permute.xlu1 %5782 }
 0x659   :  { %v5798_v32 = vsel %vm1874_vm10, %v5783_v60, %v5785_v52  ;;  %v5799_v16 = vsel %vm1874_vm10, %v5781_v4, %v5783_v60  ;;  %v5787_v61 = vpop.permute.xlu0 %5786  ;;  %v8825_v60 = vld [vmem:[#allocation29_spill] sm:$0xff] }
 0x65a   :  { %v5803_v37 = vadd.f32 %v5799_v16, %v5771_v18  ;;  %v8305_v19 = vadd.f32 %v5798_v32, %v5772_v29  ;;  %v5797_v48 = vsel %vm1874_vm10, %v5785_v52, %v5787_v61  ;;  %v8824_v52 = vld [vmem:[#allocation32_spill] sm:$0xff]  ;;  %v8368_v32 = vpop.permute.xlu2 %4458 }
 0x65b   :  { %v5805_v31 = vadd.f32 %v5797_v48, %v5773_v10 }
 0x65c   :  { %5812 = vrot.lane.b32.xlu2 %v5803_v37, %s6429_s3  ;;  %5814 = vrot.lane.b32.xlu0 %v8305_v19, %s6429_s3 }
 0x65d   :  { %5816 = vrot.lane.b32.xlu1 %v5805_v31, %s6429_s3 }
 0x660   :  { %v5789_v49 = vpop.permute.xlu1 %5788 }
 0x661   :  { %v5793_v25 = vpop.permute.xlu0 %5792  ;;  %v5795_v23 = vsel %vm1874_vm10, %v5789_v49, %v5791_v34  ;;  %v5796_v18 = vsel %vm1874_vm10, %v5787_v61, %v5789_v49 }
 0x662   :  { %v5794_v29 = vsel %vm1874_vm10, %v5791_v34, %v5793_v25  ;;  %v5806_v10 = vadd.f32 %v5796_v18, %v5774_v8  ;;  %v5807_v41 = vadd.f32 %v5795_v23, %v5775_v62  ;;  %v5801_v8 = vsel %vm1874_vm10, %v5793_v25, %v5779_v58  ;;  %v8821_v58 = vld [vmem:[#allocation25_spill] sm:$0xff] }
 0x663   :  { %v5808_v51 = vadd.f32 %v5794_v29, %v5776_v33  ;;  %v4087_v62 = vadd.f32 %v4073_v15, %v8157_v6  ;;  %v4088_v33 = vadd.f32 %v4080_v56, %v8159_v27  ;;  %v5809_v39 = vadd.f32 %v5801_v8, %v8259_v11 }
 0x664   :  { %5818 = vrot.lane.b32.xlu2 %v5806_v10, %s6429_s3  ;;  %5820 = vrot.lane.b32.xlu0 %v5807_v41, %s6429_s3  ;;  %vm4666_vm10 = vcmp.lt.s32.totalorder %v6558_v35, 109 }
 0x665   :  { %5822 = vrot.lane.b32.xlu1 %v5808_v51, %s6429_s3 }
 0x668   :  { %v4269_v21 = vpop.permute.xlu1 %4268 }
 0x669   :  { %v4455_v53 = vpop.permute.xlu0 %4454  ;;  %v4271_v17 = vsel %vm4270_vm7, %v8299_v24, %v4269_v21  ;;  %v4278_v22 = vsel %vm4270_vm7, %v4269_v21, %v8227_v43 }
 0x66a   :  { %v4475_v40 = vsel %vm4468_vm14, %v4453_v38, %v4455_v53  ;;  %v4285_v3 = vadd.f32 %v4271_v17, %v4087_v62  ;;  %v4286_v6 = vadd.f32 %v4278_v22, %v4088_v33 }
 0x66b   :  { %v8345_v27 = vadd.f32 %v4475_v40, %v8241_v59  ;;  %v8822_v59 = vld [vmem:[#allocation26_spill] sm:$0xff] }
 0x66c   :  { %5824 = vrot.lane.b32.xlu2 %v5809_v39, %s6429_s3  ;;  %4462 = vrot.lane.b32.xlu0 %v8820_v9, %s6438_s25  ;;  %v4273_v9 = vsel %vm4270_vm7, %v8265_v55, %v8294_v57 }
 0x66d   :  { %4464 = vrot.lane.b32.xlu1 %v8821_v58, %s6438_s25 }
 0x670   :  { %v8352_v4 = vpop.permute.xlu1 %4456 }
 0x671   :  { %v4474_v43 = vsel %vm4468_vm14, %v4455_v53, %v8352_v4  ;;  %v8376_v49 = vpop.permute.xlu0 %4460 }
 0x672   :  { %v8358_v11 = vadd.f32 %v4474_v43, %v8275_v63 }
 0x674   :  { %4466 = vrot.lane.b32.xlu2 %v8822_v59, %s6438_s25  ;;  %4650 = vrot.lane.b32.xlu0 %v8823_v47, %s6439_s11 }
 0x675   :  { %4652 = vrot.lane.b32.xlu1 %v8824_v52, %s6439_s11 }
 0x67c   :  { %4654 = vrot.lane.b32.xlu2 %v8825_v60, %s6439_s11 }
 0x6b6   :  { %v5813_v16 = vpop.permute.xlu2 %5812 }
 0x6be   :  { %v5819_v61 = vpop.permute.xlu2 %5818 }
 0x6bf   :  { %v5811_v48 = vpop.permute.xlu1 %5810 }
 0x6c0   :  { %v5832_v63 = vsel %vm2488_vm1, %v5811_v48, %v5813_v16 }
 0x6c1   :  { %v8372_v34 = vadd.f32 %v5832_v63, %v5802_v54 }
 0x6c3   :  { %5842 = vrot.lane.b32.xlu0 %v8372_v34, %s6436_s10 }
 0x6c6   :  { %v5825_v25 = vpop.permute.xlu2 %5824 }
 0x6ce   :  { %v5815_v23 = vpop.permute.xlu0 %5814  ;;  %v4467_v18 = vpop.permute.xlu2 %4466 }
 0x6cf   :  { %v5831_v29 = vsel %vm2488_vm1, %v5813_v16, %v5815_v23  ;;  %v5817_v15 = vpop.permute.xlu1 %5816  ;;  %v4476_v56 = vsel %vm4468_vm14, %v4467_v18, %v4453_v38  ;;  %v8827_v16 = vld [vmem:[#allocation35_spill] sm:$0xff] }
 0x6d0   :  { %v5835_v8 = vadd.f32 %v5831_v29, %v5803_v37  ;;  %v5829_v54 = vsel %vm2488_vm1, %v5817_v15, %v5819_v61  ;;  %v5830_v62 = vsel %vm2488_vm1, %v5815_v23, %v5817_v15  ;;  %v8386_v33 = vadd.f32 %v4476_v56, %v4286_v6 }
 0x6d1   :  { %v5836_v21 = vadd.f32 %v5830_v62, %v8305_v19  ;;  %v8389_v53 = vadd.f32 %v5829_v54, %v5805_v31  ;;  %v4473_v29 = vsel %vm4468_vm14, %v8352_v4, %v8368_v32 }
 0x6d2   :  { %5844 = vrot.lane.b32.xlu1 %v5835_v8, %s6436_s10  ;;  %v4479_v56 = vadd.f32 %v4473_v29, %v8280_v26  ;;  %v8834_v29 = vld [vmem:[#allocation38_spill] sm:$0xff] }
 0x6d3   :  { %5846 = vrot.lane.b32.xlu2 %v5836_v21, %s6436_s10  ;;  %5848 = vrot.lane.b32.xlu0 %v8389_v53, %s6436_s10 }
 0x6d6   :  { %v5821_v37 = vpop.permute.xlu0 %5820  ;;  %v8445_v63 = vpop.permute.xlu2 %4654 }
 0x6d7   :  { %v5828_v38 = vsel %vm2488_vm1, %v5819_v61, %v5821_v37  ;;  %v5823_v17 = vpop.permute.xlu1 %5822  ;;  %v8829_v61 = vld [vmem:[#allocation33_spill] sm:$0xff] }
 0x6d8   :  { %v5838_v22 = vadd.f32 %v5828_v38, %v5806_v10  ;;  %v5826_v40 = vsel %vm2488_vm1, %v5823_v17, %v5825_v25  ;;  %v5827_v19 = vsel %vm2488_vm1, %v5821_v37, %v5823_v17  ;;  %v4272_v10 = vsel %vm4270_vm7, %v8294_v57, %v8299_v24 }
 0x6d9   :  { %v5839_v31 = vadd.f32 %v5827_v19, %v5807_v41  ;;  %v8401_v6 = vadd.f32 %v5826_v40, %v5808_v51  ;;  %v5833_v41 = vsel %vm2488_vm1, %v5825_v25, %v5811_v48  ;;  %v4283_v51 = vadd.f32 %v4273_v9, %v8210_v2  ;;  %v8830_v48 = vld [vmem:[#allocation34_spill] sm:$0xff] }
 0x6da   :  { %5850 = vrot.lane.b32.xlu1 %v5838_v22, %s6436_s10  ;;  %v4284_v43 = vadd.f32 %v4272_v10, %v8213_v36  ;;  %v5841_v47 = vadd.f32 %v5833_v41, %v5809_v39  ;;  %v8826_v36 = vld [vmem:[#allocation30_spill] sm:$0xff]  ;;  %v8828_v39 = vld [vmem:[#allocation36_spill] sm:$0xff]  ;;  %vm5890_vm1 = vcmp.lt.s32.totalorder %v6558_v35, 96 }
 0x6db   :  { %5852 = vrot.lane.b32.xlu2 %v5839_v31, %s6436_s10  ;;  %5854 = vrot.lane.b32.xlu0 %v8401_v6, %s6436_s10 }
 0x6de   :  { %v4463_v58 = vpop.permute.xlu0 %4462 }
 0x6df   :  { %v4471_v55 = vsel %vm4468_vm14, %v8376_v49, %v4463_v58  ;;  %v4465_v59 = vpop.permute.xlu1 %4464 }
 0x6e0   :  { %v8422_v52 = vadd.f32 %v4471_v55, %v4283_v51  ;;  %v4469_v60 = vsel %vm4468_vm14, %v4465_v59, %v4467_v18  ;;  %v4470_v57 = vsel %vm4468_vm14, %v4463_v58, %v4465_v59 }
 0x6e1   :  { %v8428_v24 = vadd.f32 %v4470_v57, %v4284_v43  ;;  %v8430_v2 = vadd.f32 %v4469_v60, %v4285_v3  ;;  %v8831_v3 = vld [vmem:[#allocation39_spill] sm:$0xff] }
 0x6e2   :  { %5856 = vrot.lane.b32.xlu1 %v5841_v47, %s6436_s10 }
 0x6e3   :  { %4656 = vrot.lane.b32.xlu2 %v8826_v36, %s6439_s11  ;;  %4658 = vrot.lane.b32.xlu0 %v8827_v16, %s6439_s11 }
 0x6e6   :  { %v8447_v23 = vpop.permute.xlu0 %4650 }
 0x6e7   :  { %v8453_v15 = vpop.permute.xlu1 %4652 }
 0x6ea   :  { %4660 = vrot.lane.b32.xlu1 %v8828_v39, %s6439_s11 }
 0x6eb   :  { %4662 = vrot.lane.b32.xlu2 %v8829_v61, %s6439_s11  ;;  %4664 = vrot.lane.b32.xlu0 %v8830_v48, %s6439_s11 }
 0x6f2   :  { %4848 = vrot.lane.b32.xlu1 %v8831_v3, %s6440_s12 }
 0x72d   :  { %v5847_v25 = vpop.permute.xlu2 %5846 }
 0x735   :  { %v5853_v18 = vpop.permute.xlu2 %5852  ;;  %v5843_v54 = vpop.permute.xlu0 %5842 }
 0x73d   :  { %v4657_v62 = vpop.permute.xlu2 %4656 }
 0x73e   :  { %v4671_v37 = vsel %vm4666_vm10, %v8445_v63, %v4657_v62 }
 0x73f   :  { %v8460_v38 = vadd.f32 %v4671_v37, %v4479_v56  ;;  %v8835_v56 = vld [vmem:[#allocation43_spill] sm:$0xff] }
 0x744   :  { %v5845_v17 = vpop.permute.xlu1 %5844 }
 0x745   :  { %v5863_v40 = vsel %vm4072_vm12, %v5845_v17, %v5847_v25  ;;  %v5864_v4 = vsel %vm4072_vm12, %v5843_v54, %v5845_v17  ;;  %v5849_v19 = vpop.permute.xlu0 %5848 }
 0x746   :  { %v5866_v26 = vadd.f32 %v5864_v4, %v8372_v34  ;;  %v5867_v9 = vadd.f32 %v5863_v40, %v5835_v8  ;;  %v5862_v10 = vsel %vm4072_vm12, %v5847_v25, %v5849_v19 }
 0x747   :  { %v5868_v41 = vadd.f32 %v5862_v10, %v5836_v21  ;;  %v4472_v21 = vsel %vm4468_vm14, %v8368_v32, %v8376_v49  ;;  %v8832_v32 = vld [vmem:[#allocation40_spill] sm:$0xff] }
 0x748   :  { %5874 = vrot.lane.b32.xlu2 %v5866_v26, %s6441_s13  ;;  %5876 = vrot.lane.b32.xlu0 %v5867_v9, %s6441_s13  ;;  %v4480_v36 = vadd.f32 %v4472_v21, %v8277_v30  ;;  %v8492_v30 = vpop.permute.xlu2 %4662 }
 0x749   :  { %5878 = vrot.lane.b32.xlu1 %v5868_v41, %s6441_s13 }
 0x74c   :  { %v5851_v51 = vpop.permute.xlu1 %5850 }
 0x74d   :  { %v5860_v58 = vsel %vm4072_vm12, %v5851_v51, %v5853_v18  ;;  %v5861_v43 = vsel %vm4072_vm12, %v5849_v19, %v5851_v51  ;;  %v5855_v55 = vpop.permute.xlu0 %5854 }
 0x74e   :  { %v5869_v59 = vadd.f32 %v5861_v43, %v8389_v53  ;;  %v5870_v34 = vadd.f32 %v5860_v58, %v5838_v22  ;;  %v5859_v8 = vsel %vm4072_vm12, %v5853_v18, %v5855_v55  ;;  %v8833_v18 = vld [vmem:[#allocation37_spill] sm:$0xff] }
 0x74f   :  { %v5871_v60 = vadd.f32 %v5859_v8, %v5839_v31 }
 0x750   :  { %5880 = vrot.lane.b32.xlu2 %v5869_v59, %s6441_s13  ;;  %5882 = vrot.lane.b32.xlu0 %v5870_v34, %s6441_s13 }
 0x751   :  { %5884 = vrot.lane.b32.xlu1 %v5871_v60, %s6441_s13 }
 0x754   :  { %v5857_v57 = vpop.permute.xlu1 %5856 }
 0x755   :  { %v5858_v16 = vsel %vm4072_vm12, %v5855_v55, %v5857_v57  ;;  %v5865_v53 = vsel %vm4072_vm12, %v5857_v57, %v5843_v54  ;;  %v4659_v22 = vpop.permute.xlu0 %4658  ;;  %v8836_v54 = vld [vmem:[#allocation44_spill] sm:$0xff]  ;;  %vm5984_vm12 = vcmp.lt.s32.totalorder %v8801_v7, 100 }
 0x756   :  { %v5872_v31 = vadd.f32 %v5858_v16, %v8401_v6  ;;  %v5873_v39 = vadd.f32 %v5865_v53, %v5841_v47  ;;  %v4670_v61 = vsel %vm4666_vm10, %v4657_v62, %v4659_v22  ;;  %v8837_v62 = vld [vmem:[#allocation41_spill] sm:$0xff] }
 0x757   :  { %v8488_v48 = vadd.f32 %v4670_v61, %v4480_v36 }
 0x758   :  { %5886 = vrot.lane.b32.xlu2 %v5872_v31, %s6441_s13  ;;  %5888 = vrot.lane.b32.xlu0 %v5873_v39, %s6441_s13 }
 0x759   :  { %4850 = vrot.lane.b32.xlu1 %v8832_v32, %s6440_s12 }
 0x75c   :  { %v4661_v49 = vpop.permute.xlu1 %4660 }
 0x75d   :  { %v4668_v3 = vsel %vm4666_vm10, %v4661_v49, %v8492_v30  ;;  %v4669_v6 = vsel %vm4666_vm10, %v4659_v22, %v4661_v49  ;;  %v8517_v37 = vpop.permute.xlu0 %4664 }
 0x75e   :  { %v8500_v47 = vadd.f32 %v4669_v6, %v8422_v52  ;;  %v8503_v25 = vadd.f32 %v4668_v3, %v8428_v24  ;;  %v8838_v52 = vld [vmem:[#allocation42_spill] sm:$0xff] }
 0x760   :  { %4852 = vrot.lane.b32.xlu2 %v8833_v18, %s6440_s12  ;;  %4854 = vrot.lane.b32.xlu0 %v8834_v29, %s6440_s12 }
 0x761   :  { %4856 = vrot.lane.b32.xlu1 %v8835_v56, %s6440_s12 }
 0x764   :  { %v8519_v17 = vpop.permute.xlu1 %4848 }
 0x768   :  { %4858 = vrot.lane.b32.xlu2 %v8836_v54, %s6440_s12  ;;  %4860 = vrot.lane.b32.xlu0 %v8837_v62, %s6440_s12 }
 0x770   :  { %4862 = vrot.lane.b32.xlu0 %v8838_v52, %s6440_s12 }
 0x7a2   :  { %v5875_v24 = vpop.permute.xlu2 %5874 }
 0x7aa   :  { %v5881_v40 = vpop.permute.xlu2 %5880 }
 0x7ba   :  { %v5877_v4 = vpop.permute.xlu0 %5876 }
 0x7bb   :  { %v5897_v19 = vsel %vm5890_vm1, %v5875_v24, %v5877_v4  ;;  %v5879_v10 = vpop.permute.xlu1 %5878 }
 0x7bc   :  { %v8524_v51 = vadd.f32 %v5897_v19, %v5866_v26  ;;  %v5895_v58 = vsel %vm5890_vm1, %v5879_v10, %v5881_v40  ;;  %v5896_v43 = vsel %vm5890_vm1, %v5877_v4, %v5879_v10  ;;  %v5887_v26 = vpop.permute.xlu2 %5886  ;;  %v8840_v4 = vld [vmem:[#allocation47_spill] sm:$0xff]  ;;  %v8841_v19 = vld [vmem:[#allocation48_spill] sm:$0xff] }
 0x7bd   :  { %v8530_v55 = vadd.f32 %v5896_v43, %v5867_v9  ;;  %v8532_v8 = vadd.f32 %v5895_v58, %v5868_v41  ;;  %v8842_v10 = vld [vmem:[#allocation52_spill] sm:$0xff] }
 0x7be   :  { %5907 = vrot.lane.b32.xlu1 %v8524_v51, %s6442_s14 }
 0x7bf   :  { %5909 = vrot.lane.b32.xlu2 %v8530_v55, %s6442_s14  ;;  %5911 = vrot.lane.b32.xlu0 %v8532_v8, %s6442_s14 }
 0x7c2   :  { %v5883_v21 = vpop.permute.xlu0 %5882 }
 0x7c3   :  { %v5894_v57 = vsel %vm5890_vm1, %v5881_v40, %v5883_v21  ;;  %v5885_v36 = vpop.permute.xlu1 %5884 }
 0x7c4   :  { %v8542_v9 = vadd.f32 %v5894_v57, %v5869_v59  ;;  %v5892_v41 = vsel %vm5890_vm1, %v5885_v36, %v5887_v26  ;;  %v5893_v16 = vsel %vm5890_vm1, %v5883_v21, %v5885_v36  ;;  %v4672_v59 = vsel %vm4666_vm10, %v8453_v15, %v8445_v63  ;;  %v4853_v49 = vpop.permute.xlu2 %4852  ;;  %v8843_v21 = vld [vmem:[#allocation46_spill] sm:$0xff]  ;;  %v8844_v36 = vld [vmem:[#allocation51_spill] sm:$0xff] }
 0x7c5   :  { %v8548_v53 = vadd.f32 %v5893_v16, %v5870_v34  ;;  %v8550_v22 = vadd.f32 %v5892_v41, %v5871_v60  ;;  %v4673_v34 = vsel %vm4666_vm10, %v8447_v23, %v8453_v15  ;;  %v4676_v32 = vadd.f32 %v4672_v59, %v8358_v11 }
 0x7c6   :  { %5913 = vrot.lane.b32.xlu1 %v8542_v9, %s6442_s14  ;;  %v4675_v61 = vadd.f32 %v4673_v34, %v8345_v27  ;;  %v4674_v57 = vsel %vm4666_vm10, %v8517_v37, %v8447_v23  ;;  %v8846_v23 = vld [vmem:[#allocation50_spill] sm:$0xff] }
 0x7c7   :  { %5915 = vrot.lane.b32.xlu2 %v8548_v53, %s6442_s14  ;;  %5917 = vrot.lane.b32.xlu0 %v8550_v22, %s6442_s14  ;;  %v4682_v16 = vadd.f32 %v4674_v57, %v8386_v33 }
 0x7ca   :  { %v5889_v60 = vpop.permute.xlu0 %5888 }
 0x7cb   :  { %v5891_v3 = vsel %vm5890_vm1, %v5887_v26, %v5889_v60  ;;  %v5898_v6 = vsel %vm5890_vm1, %v5889_v60, %v5875_v24  ;;  %v4851_v63 = vpop.permute.xlu1 %4850 }
 0x7cc   :  { %v8573_v18 = vadd.f32 %v5891_v3, %v5872_v31  ;;  %v8575_v29 = vadd.f32 %v5898_v6, %v5873_v39  ;;  %v4870_v15 = vsel %vm4864_vm5, %v4851_v63, %v4853_v49  ;;  %v4871_v27 = vsel %vm4864_vm5, %v8519_v17, %v4851_v63  ;;  %v8839_v31 = vld [vmem:[#allocation45_spill] sm:$0xff]  ;;  %v8607_v58 = vpop.permute.xlu2 %4858 }
 0x7cd   :  { %v8582_v11 = vadd.f32 %v4871_v27, %v4675_v61  ;;  %v8584_v56 = vadd.f32 %v4870_v15, %v4676_v32  ;;  %v8845_v61 = vld [vmem:[#allocation49_spill] sm:$0xff] }
 0x7ce   :  { %5919 = vrot.lane.b32.xlu1 %v8573_v18, %s6442_s14 }
 0x7cf   :  { %5921 = vrot.lane.b32.xlu2 %v8575_v29, %s6442_s14  ;;  %5050 = vrot.lane.b32.xlu0 %v8839_v31, %s6443_s15 }
 0x7d2   :  { %v4855_v39 = vpop.permute.xlu0 %4854 }
 0x7d3   :  { %v4869_v54 = vsel %vm4864_vm5, %v4853_v49, %v4855_v39  ;;  %v8593_v62 = vpop.permute.xlu1 %4856 }
 0x7d4   :  { %v8596_v52 = vadd.f32 %v4869_v54, %v8460_v38  ;;  %v4868_v24 = vsel %vm4864_vm5, %v4855_v39, %v8593_v62 }
 0x7d5   :  { %v8602_v40 = vadd.f32 %v4868_v24, %v8488_v48  ;;  %v4667_v48 = vsel %vm4666_vm10, %v8492_v30, %v8517_v37 }
 0x7d6   :  { %5046 = vrot.lane.b32.xlu1 %v8840_v4, %s6443_s15  ;;  %v4681_v41 = vadd.f32 %v4667_v48, %v8430_v2  ;;  %v6444_v2 = vmov 13  }
 0x7d7   :  { %5048 = vrot.lane.b32.xlu2 %v8841_v19, %s6443_s15  ;;  %5056 = vrot.lane.b32.xlu0 %v8842_v10, %s6443_s15 }
 0x7d8   :  { %6391 = vset.pattern.permute.xlu0 %v6444_v2 }
 0x7da   :  { %v4861_v43 = vpop.permute.xlu0 %4860 }
 0x7db   :  { %v4866_v38 = vsel %vm4864_vm5, %v8607_v58, %v4861_v43 }
 0x7dc   :  { %v8613_v26 = vadd.f32 %v4866_v38, %v8503_v25 }
 0x7de   :  { %5052 = vrot.lane.b32.xlu1 %v8843_v21, %s6443_s15  ;;  %v6392_v21 = vld [vmem:[%s8740_s6] sm:$0xf]  ;;  %s6446_s6 = smov [#allocation2]  }
 0x7df   :  { %5054 = vrot.lane.b32.xlu2 %v8844_v36, %s6443_s15  ;;  %s6038_s18 = sshll.u32 %s6446_s6, 4  ;;  %s6039_s18 = int_to_ptr.vmem [resolvable:$true] %s6038_s18 }
 0x7e2   :  { %v4863_v25 = vpop.permute.xlu0 %4862 }
 0x7e3   :  { %v4865_v59 = vsel %vm4864_vm5, %v4861_v43, %v4863_v25  ;;  %v4872_v34 = vsel %vm4864_vm5, %v4863_v25, %v8519_v17 }
 0x7e4   :  { %v8632_v30 = vadd.f32 %v4865_v59, %v4681_v41  ;;  %v8634_v60 = vadd.f32 %v4872_v34, %v4682_v16 }
 0x7e6   :  { %5058 = vrot.lane.b32.xlu1 %v8845_v61, %s6443_s15 }
 0x7e7   :  { %5060 = vrot.lane.b32.xlu2 %v8846_v23, %s6443_s15  ;;  %v4867_v23 = vsel %vm4864_vm5, %v8593_v62, %v8607_v58 }
 0x819   :  { %v5910_v37 = vpop.permute.xlu2 %5909 }
 0x821   :  { %v5916_v63 = vpop.permute.xlu2 %5915 }
 0x829   :  { %v5922_v4 = vpop.permute.xlu2 %5921 }
 0x830   :  { %v5908_v33 = vpop.permute.xlu1 %5907 }
 0x831   :  { %v5930_v32 = vsel %vm5923_vm8, %v5908_v33, %v5910_v37  ;;  %v5912_v49 = vpop.permute.xlu0 %5911  ;;  %v5931_v19 = vsel %vm5923_vm8, %v5922_v4, %v5908_v33  ;;  %v5049_v48 = vpop.permute.xlu2 %5048 }
 0x832   :  { %v5932_v17 = vadd.f32 %v5930_v32, %v8524_v51  ;;  %v5929_v3 = vsel %vm5923_vm8, %v5910_v37, %v5912_v49 }
 0x833   :  { %v5933_v6 = vadd.f32 %v5929_v3, %v8530_v55  ;;  %v4877_v3 = vadd.f32 %v4867_v23, %v8500_v47 }
 0x834   :  { %5940 = vrot.lane.b32.xlu0 %v5932_v17, %s6445_s4 }
 0x835   :  { %5942 = vrot.lane.b32.xlu1 %v5933_v6, %s6445_s4 }
 0x838   :  { %v5914_v15 = vpop.permute.xlu1 %5913 }
 0x839   :  { %v5927_v27 = vsel %vm5923_vm8, %v5914_v15, %v5916_v63  ;;  %v5928_v31 = vsel %vm5923_vm8, %v5912_v49, %v5914_v15  ;;  %v5918_v39 = vpop.permute.xlu0 %5917  ;;  %v5055_v36 = vpop.permute.xlu2 %5054 }
 0x83a   :  { %v5934_v54 = vadd.f32 %v5928_v31, %v8532_v8  ;;  %v5935_v51 = vadd.f32 %v5927_v27, %v8542_v9  ;;  %v5926_v24 = vsel %vm5923_vm8, %v5916_v63, %v5918_v39 }
 0x83b   :  { %v5936_v55 = vadd.f32 %v5926_v24, %v8548_v53  ;;  %v5939_v53 = vadd.f32 %v5931_v19, %v8575_v29 }
 0x83c   :  { %5944 = vrot.lane.b32.xlu2 %v5934_v54, %s6445_s4  ;;  %5946 = vrot.lane.b32.xlu0 %v5935_v51, %s6445_s4 }
 0x83d   :  { %5948 = vrot.lane.b32.xlu1 %v5936_v55, %s6445_s4 }
 0x840   :  { %v5920_v10 = vpop.permute.xlu1 %5919 }
 0x841   :  { %v5924_v43 = vsel %vm5923_vm8, %v5920_v10, %v5922_v4  ;;  %v5925_v8 = vsel %vm5923_vm8, %v5918_v39, %v5920_v10  ;;  %v5051_v41 = vpop.permute.xlu0 %5050  ;;  %v5061_v25 = vpop.permute.xlu2 %5060 }
 0x842   :  { %v5937_v9 = vadd.f32 %v5925_v8, %v8550_v22  ;;  %v5938_v38 = vadd.f32 %v5924_v43, %v8573_v18  ;;  %v5068_v2 = vsel %vm5062_vm9, %v5049_v48, %v5051_v41 }
 0x843   :  { %v5072_v31 = vadd.f32 %v5068_v2, %v8584_v56 }
 0x844   :  { %5950 = vrot.lane.b32.xlu2 %v5937_v9, %s6445_s4  ;;  %5952 = vrot.lane.b32.xlu0 %v5938_v38, %s6445_s4 }
 0x845   :  { %5954 = vrot.lane.b32.xlu1 %v5939_v53, %s6445_s4  ;;  %v5280_v4 = vadd.f32 %v7891_v5, %v5072_v31 }
 0x848   :  { %v5047_v57 = vpop.permute.xlu1 %5046 }
 0x849   :  { %v5057_v22 = vpop.permute.xlu0 %5056  ;;  %v5069_v32 = vsel %vm5062_vm9, %v5047_v57, %v5049_v48  ;;  %v5070_v49 = vsel %vm5062_vm9, %v5061_v25, %v5047_v57 }
 0x84a   :  { %v5065_v33 = vsel %vm5062_vm9, %v5055_v36, %v5057_v22  ;;  %v5071_v54 = vadd.f32 %v5069_v32, %v8582_v11  ;;  %v5078_v51 = vadd.f32 %v5070_v49, %v8634_v60  ;;  %v8847_v11 = vld [vmem:[#allocation53_spill] sm:$0xff] }
 0x84b   :  { %v5075_v39 = vadd.f32 %v5065_v33, %v4877_v3 }
 0x84c   :  { %5288 = vperm.xlu2 %6390, %v6392_v21   ;;  %5966 = vperm.xlu0 %6391, %v6392_v21   ;;  %v5279_v56 = vadd.f32 %v7881_v20, %v5071_v54  ;;  %v5286_v10 = vadd.f32 %v7938_v50, %v5078_v51 }
 0x84d   :  { %v5283_v19 = vadd.f32 %v7942_v12, %v5075_v39 }
 0x850   :  { %v5053_v16 = vpop.permute.xlu1 %5052 }
 0x851   :  { %v5066_v6 = vsel %vm5062_vm9, %v5053_v16, %v5055_v36  ;;  %v5067_v63 = vsel %vm5062_vm9, %v5051_v41, %v5053_v16 }
 0x852   :  { %v5073_v62 = vadd.f32 %v5067_v63, %v8596_v52  ;;  %v5074_v58 = vadd.f32 %v5066_v6, %v8602_v40 }
 0x854   :  { %v5281_v43 = vadd.f32 %v8847_v11, %v5073_v62  ;;  %v5282_v60 = vadd.f32 %v7851_v28, %v5074_v58 }
 0x858   :  { %v5059_v59 = vpop.permute.xlu1 %5058 }
 0x859   :  { %v5064_v15 = vsel %vm5062_vm9, %v5057_v22, %v5059_v59  ;;  %v5063_v27 = vsel %vm5062_vm9, %v5059_v59, %v5061_v25 }
 0x85a   :  { %v5076_v24 = vadd.f32 %v5064_v15, %v8613_v26  ;;  %v5077_v55 = vadd.f32 %v5063_v27, %v8632_v30 }
 0x85c   :  { %v5284_v52 = vadd.f32 %v7956_v14, %v5076_v24  ;;  %v5285_v26 = vadd.f32 %v7894_v42, %v5077_v55 }
 0x896   :  { %v5945_v18 = vpop.permute.xlu2 %5944 }
 0x89e   :  { %v5951_v37 = vpop.permute.xlu2 %5950 }
 0x8a6   :  { %v5941_v34 = vpop.permute.xlu0 %5940  ;;  %v5289_v40 = vpop.permute.xlu2 %5288 }
 0x8a7   :  { %v5943_v29 = vpop.permute.xlu1 %5942  ;;  %v5292_v42 = vadd.f32 %v5289_v40, %v5280_v4  ;;  %v5294_v50 = vadd.f32 %v5289_v40, %v5282_v60  ;;  %v5296_v12 = vadd.f32 %v5289_v40, %v5284_v52  ;;  %v5298_v14 = vadd.f32 %v5289_v40, %v5286_v10 }
 0x8a8   :  { %v5962_v28 = vsel %vm5956_vm11, %v5943_v29, %v5945_v18  ;;  %v5963_v5 = vsel %vm5956_vm11, %v5941_v34, %v5943_v29  ;;  %v5291_v29 = vadd.f32 %v5289_v40, %v5279_v56  ;;  %v5295_v2 = vadd.f32 %v5289_v40, %v5283_v19 }
 0x8a9   :  { %v5297_v33 = vadd.f32 %v5289_v40, %v5285_v26 }
 0x8ae   :  { %v5947_v61 = vpop.permute.xlu0 %5946 }
 0x8af   :  { %v5949_v17 = vpop.permute.xlu1 %5948  ;;  %v5961_v30 = vsel %vm5956_vm11, %v5945_v18, %v5947_v61 }
 0x8b0   :  { %v5959_v8 = vsel %vm5956_vm11, %v5949_v17, %v5951_v37  ;;  %v5960_v9 = vsel %vm5956_vm11, %v5947_v61, %v5949_v17  ;;  %v5293_v61 = vadd.f32 %v5289_v40, %v5281_v43 }
 0x8b6   :  { %v5953_v47 = vpop.permute.xlu0 %5952 }
 0x8b7   :  { %v5955_v20 = vpop.permute.xlu1 %5954  ;;  %v5958_v21 = vsel %vm5956_vm11, %v5951_v37, %v5953_v47 }
 0x8b8   :  { %v5964_v38 = vsel %vm5956_vm11, %v5955_v20, %v5941_v34  ;;  %v5957_v53 = vsel %vm5956_vm11, %v5953_v47, %v5955_v20 }
 0x8be   :  { %v5967_v48 = vpop.permute.xlu0 %5966 }
 0x8bf   :  { %v5969_v57 = vadd.f32 %v5967_v48, %v5964_v38  ;;  %v5970_v36 = vadd.f32 %v5967_v48, %v5963_v5  ;;  %v5971_v41 = vadd.f32 %v5967_v48, %v5962_v28  ;;  %v5972_v16 = vadd.f32 %v5967_v48, %v5961_v30 }
 0x8c0   :  { %v5973_v25 = vadd.f32 %v5967_v48, %v5960_v9  ;;  %v5974_v22 = vadd.f32 %v5967_v48, %v5959_v8  ;;  %v5975_v59 = vadd.f32 %v5967_v48, %v5958_v21  ;;  %v5976_v18 = vadd.f32 %v5967_v48, %v5957_v53 }
 0x8c1   :  { %v6002_v34 = vsel %vm5978_vm13, %v5292_v42, %v5970_v36  ;;  %v6004_v23 = vsel %vm5980_vm15, %v5294_v50, %v5972_v16  ;;  %v6001_v63 = vsel %vm5956_vm11, %v5291_v29, %v5969_v57  ;;  %v6003_v45 = vsel %vm5979_vm6, %v5293_v61, %v5971_v41 }
 0x8c2   :  { %v6006_v37 = vsel %vm5982_vm3, %v5296_v12, %v5974_v22  ;;  %v6008_v32 = vsel %vm5984_vm12, %v5298_v14, %v5976_v18  ;;  %v6017_v49 = vrot.slane %v6002_v34, 4  ;;  %v6018_v17 = vrot.slane %v6004_v23, 4 }
 0x8c3   :  { %v6019_v3 = vrot.slane %v6006_v37, 4  ;;  %v6020_v6 = vrot.slane %v6008_v32, 4  ;;  %v6005_v46 = vsel %vm5981_vm2, %v5295_v2, %v5973_v25  ;;  %v6007_v13 = vsel %vm5983_vm4, %v5297_v33, %v5975_v59 }
 0x8c4   :  { %v6021_v7 = vsel %vm158_vm0, %v6001_v63, %v6017_v49  ;;  %v6022_v35 = vsel %vm158_vm0, %v6003_v45, %v6018_v17 }
 0x8c5   :  { %v6023_v15 = vsel %vm158_vm0, %v6005_v46, %v6019_v3  ;;  %v6024_v44 = vsel %vm158_vm0, %v6007_v13, %v6020_v6  ;;  %6029 = vst [vmem:[#allocation2] sm:$0xff] %v6021_v7 }
 0x8c6   :  { %6030 = vst [vmem:[#allocation2 + $0x8] sm:$0xff] %v6022_v35 }
 0x8c7   :  { %6031 = vst [vmem:[#allocation2 + $0x10] sm:$0xff] %v6023_v15 }
 0x8c8   :  { %6032 = vst [vmem:[#allocation2 + $0x18] sm:$0xff] %v6024_v44 }
 0x8c9   :  { %6043 = dma.vmem_to_hbm [thread:$0]  %s6039_s18, 512, %s6041_s20, [#allocation3]  }
 0x8ca   :  { %6417 = dma.done.wait [#allocation3], 512  }
 0x8cb   :  { %6418 = vsyncadd [#allocation3], 4294966784 }
 0x8cc   :  { %6048 = vsyncpa [#allocation3], 1 }

</bundles_post_ra>
